<compile_context>
chip_gen: v7x
topology: tpu7x:2x2x1
jax: 0.10.0
libtpu: 0.0.40
codegen_flags: <defaults>
</compile_context>

<pallas_src>
import functools

import jax
import jax.numpy as jnp
from jax.experimental import pallas as pl
from jax.experimental.pallas import tpu as pltpu


def _round_up(x, m):
    return (x + m - 1) // m * m


def _pick_tile_rows(H, W, C):
    """Pick the output-row tile height `th` (grid dim T = ceil(H / th))."""
    Wf = W + 2
    # ~4096 matmul rows per tile is past the knee of the mem-bound tiling curve.
    th = max(1, 4096 // Wf)
    th = min(th, H)

    def footprint(t):
        p_in = (t + 7) * Wf
        p_mid = (t + 3) * Wf
        p_out = t * Wf
        # double-buffered f32 input window + f32 output, mask, and a rough bound
        # on f32 in-kernel temporaries (z1 / y1 / z2 / SiLU temps).
        return (2 * p_in * C * 4 + 2 * p_out * C * 4 + 2 * p_mid * 4
                + 8 * p_mid * C * 4)

    # Keep the per-step footprint comfortably under v7x's 64 MiB VMEM.
    while th > 1 and footprint(th) > 20 * 1024 * 1024:
        th = max(1, th // 2)
    return th


# ----------------------------- Pallas kernel ------------------------------- #

def _fused_residual_block_kernel(x_ref, m_ref, w1_ref, w2_ref, s1_ref, s2_ref,
                                 o_ref, *, Wf, P_MID, P_OUT):
    """Fused conv1+BN1+SiLU -> conv2+BN2 -> +residual -> SiLU on one row tile.

    Flattened layouts (all 2D, last dim = C):
      x_ref  : (1, 1, P_IN, C)  input window, rows [r0-3, r0+th+4), cols [-1, W+1)
      m_ref  : (1, P_MID, 1)    validity mask for the conv1 output (doubles as
                                conv2's zero padding)
      w*_ref : (9, C, C)        3x3 weights (BN scale folded), tap index = a*3+b
      s*_ref : (1, C)           folded BN shifts
      o_ref  : (1, 1, P_OUT, C) output rows [r0, r0+th), cols [0, W+2) (last 2
                                columns are garbage, dropped by the wrapper)
    """
    x = x_ref[0, 0]                      # (P_IN, C) f32 activation window
    xc = x.astype(w1_ref.dtype)          # compute dtype (bf16) for the MXU

    # ---- ConvBlock 1: conv3x3 (BN scale folded into w1) + shift + SiLU ----
    z1 = None
    for a in range(3):
        for b in range(3):
            s = (a + 1) * Wf + (b - 1)   # shifted-view start for tap (a, b)
            d = jnp.dot(xc[s:s + P_MID, :], w1_ref[a * 3 + b],
                        preferred_element_type=jnp.float32)
            z1 = d if z1 is None else z1 + d
    z1 = z1 + s1_ref[...]
    y1 = z1 * jax.nn.sigmoid(z1)         # SiLU
    y1 = y1 * m_ref[0]                   # zero halo rows / spatial-pad columns
    y1c = y1.astype(w2_ref.dtype)

    # ---- ConvBlock 2: conv3x3 (BN scale folded into w2) + shift (no act) ----
    z2 = None
    for a in range(3):
        for b in range(3):
            s = a * Wf + b
            d = jnp.dot(y1c[s:s + P_OUT, :], w2_ref[a * 3 + b],
                        preferred_element_type=jnp.float32)
            z2 = d if z2 is None else z2 + d
    z2 = z2 + s2_ref[...]

    # ---- residual add (exact f32 slice of the input window) + final SiLU ----
    z2 = z2 + x[3 * Wf + 1: 3 * Wf + 1 + P_OUT, :]
    o_ref[0, 0] = (z2 * jax.nn.sigmoid(z2)).astype(o_ref.dtype)


# ------------------------------ JAX wrapper --------------------------------- #

def _fold_conv_bn(w_oihw, gamma, beta, mean, var, eps, dtype):
    """Fold eval-mode BN into the conv: (9, Cin, Cout) scaled weight + (1, C) shift."""
    s = gamma / jnp.sqrt(var + eps)
    shift = (beta - mean * s).reshape(1, -1).astype(jnp.float32)
    cout, cin = w_oihw.shape[0], w_oihw.shape[1]
    w = jnp.transpose(w_oihw, (2, 3, 1, 0)).reshape(9, cin, cout)
    w = (w * s[None, None, :]).astype(dtype)
    return w, shift


def residual_block_forward(x_nchw, params, compute_dtype=jnp.bfloat16):
    N, C, H, W = x_nchw.shape
    eps = 1e-5

    x = jnp.transpose(x_nchw, (0, 2, 3, 1)).astype(jnp.float32)   # NHWC

    Wf = W + 2                              # flattened row width (cols [-1, W+1))
    th = _pick_tile_rows(H, W, C)           # output rows per tile
    Hp = _round_up(H, th)
    T = Hp // th
    P_IN = (th + 7) * Wf                    # input window length (flattened)
    P_MID = (th + 3) * Wf                   # conv1-output / conv2-input length
    P_OUT = th * Wf                         # conv2-output length

    # Folded conv + BN weights (scale into the weight columns, shift separate).
    w1, s1 = _fold_conv_bn(params["conv1_w"], params["bn1_gamma"],
                           params["bn1_beta"], params["bn1_mean"],
                           params["bn1_var"], eps, compute_dtype)
    w2, s2 = _fold_conv_bn(params["conv2_w"], params["bn2_gamma"],
                           params["bn2_beta"], params["bn2_mean"],
                           params["bn2_var"], eps, compute_dtype)

    # Zero-padded activation covering rows [-3, Hp+4) and cols [-1, W+1), then
    # per-(image, row-tile) halo windows flattened to (P_IN, C).
    xpad = jnp.pad(x, ((0, 0), (3, Hp - H + 4), (1, 1), (0, 0)))
    wins = jnp.stack([xpad[:, t * th: t * th + th + 7] for t in range(T)],
                     axis=1)
    wins = wins.reshape(N, T, P_IN, C)

    # Validity mask for the conv1 output: zero at the spatial-padding columns
    # and at rows outside the real image -> masked y1 IS conv2's padded input.
    j = jnp.arange(th + 3)                              # conv1-output row in tile
    u = jnp.arange(Wf)                                  # padded column index
    col_ok = (u >= 1) & (u <= W)
    g = jnp.arange(T)[:, None] * th - 1 + j[None, :]    # global image row
    row_ok = (g >= 0) & (g < H)
    mask = (row_ok[:, :, None] & col_ok[None, None, :]).astype(jnp.float32)
    mask = mask.reshape(T, P_MID, 1)

    kernel = functools.partial(_fused_residual_block_kernel,
                               Wf=Wf, P_MID=P_MID, P_OUT=P_OUT)

    out = pl.pallas_call(
        kernel,
        out_shape=jax.ShapeDtypeStruct((N, T, P_OUT, C), jnp.float32),
        grid_spec=pltpu.PrefetchScalarGridSpec(
            num_scalar_prefetch=0,
            grid=(N, T),
            in_specs=[
                pl.BlockSpec((1, 1, P_IN, C), lambda n, t: (n, t, 0, 0)),
                pl.BlockSpec((1, P_MID, 1), lambda n, t: (t, 0, 0)),
                pl.BlockSpec((9, C, C), lambda n, t: (0, 0, 0)),
                pl.BlockSpec((9, C, C), lambda n, t: (0, 0, 0)),
                pl.BlockSpec((1, C), lambda n, t: (0, 0)),
                pl.BlockSpec((1, C), lambda n, t: (0, 0)),
            ],
            out_specs=pl.BlockSpec((1, 1, P_OUT, C), lambda n, t: (n, t, 0, 0)),
        ),
        compiler_params=pltpu.CompilerParams(
            dimension_semantics=("parallel", "parallel"),
            vmem_limit_bytes=48 * 1024 * 1024,
        ),
    )(wins, mask, w1, w2, s1, s2)

    # Drop the flattened-width garbage columns and the H padding, back to NCHW.
    out = out.reshape(N, T, th, Wf, C)[:, :, :, :W, :]
    out = out.reshape(N, Hp, W, C)[:, :H]
    return jnp.transpose(out, (0, 3, 1, 2))


# ---------------------------- pure-JAX reference ---------------------------- #

def _reference(x, params):
    def conv(z, w):
        return jax.lax.conv_general_dilated(
            z, w, (1, 1), ((1, 1), (1, 1)),
            dimension_numbers=("NCHW", "OIHW", "NCHW"),
            precision=jax.lax.Precision.HIGHEST)

    def bn(z, g, b, m, v):
        g, b, m, v = (t[None, :, None, None] for t in (g, b, m, v))
        return (z - m) / jnp.sqrt(v + 1e-5) * g + b

    silu = lambda z: z * jax.nn.sigmoid(z)
    y = silu(bn(conv(x, params["conv1_w"]),
                params["bn1_gamma"], params["bn1_beta"],
                params["bn1_mean"], params["bn1_var"]))
    y = bn(conv(y, params["conv2_w"]),
           params["bn2_gamma"], params["bn2_beta"],
           params["bn2_mean"], params["bn2_var"])
    return silu(y + x)


if __name__ == "__main__":
    N, C, H, W = 2, 4, 16, 16
    key = jax.random.PRNGKey(0)
    kx, k1, k2, kg1, kb1, kg2, kb2 = jax.random.split(key, 7)

    x = jax.random.normal(kx, (N, C, H, W), jnp.float32)
    params = {
        # conv weights: (out_channels, in_channels, 3, 3), no bias (use_bn=True)
        "conv1_w": 0.1 * jax.random.normal(k1, (C, C, 3, 3), jnp.float32),
        "conv2_w": 0.1 * jax.random.normal(k2, (C, C, 3, 3), jnp.float32),
        # BatchNorm2d params / running stats (deterministic synthetic values)
        "bn1_gamma": 1.0 + 0.1 * jax.random.normal(kg1, (C,), jnp.float32),
        "bn1_beta": 0.1 * jax.random.normal(kb1, (C,), jnp.float32),
        "bn1_mean": jnp.zeros((C,), jnp.float32),
        "bn1_var": jnp.ones((C,), jnp.float32),
        "bn2_gamma": 1.0 + 0.1 * jax.random.normal(kg2, (C,), jnp.float32),
        "bn2_beta": 0.1 * jax.random.normal(kb2, (C,), jnp.float32),
        "bn2_mean": jnp.zeros((C,), jnp.float32),
        "bn2_var": jnp.ones((C,), jnp.float32),
    }

    fwd = jax.jit(residual_block_forward, static_argnames=("compute_dtype",))
    out = jax.block_until_ready(fwd(x, params, compute_dtype=jnp.bfloat16))
    ref = _reference(x, params)

    assert out.shape == (N, C, H, W), out.shape
    # bf16 matmul operands with f32 accumulation / f32 epilogue -> ~1e-2 max abs
    # deviation from the pure-f32 reference at these magnitudes.
    assert jnp.allclose(out, ref, atol=2e-2, rtol=2e-2), float(
        jnp.max(jnp.abs(out - ref)))
    print("KERNEL_OK")
</pallas_src>

<mosaic_0001>
module attributes {stable_mosaic.version = 11 : i64} {
  func.func @_fused_residual_block_kernel(%arg0: i32, %arg1: i32, %arg2: memref<1x1x414x4xf32, #tpu.memory_space<vmem>>, %arg3: memref<1x342x1xf32, #tpu.memory_space<vmem>>, %arg4: memref<9x4x4xbf16, #tpu.memory_space<vmem>>, %arg5: memref<9x4x4xbf16, #tpu.memory_space<vmem>>, %arg6: memref<1x4xf32, #tpu.memory_space<vmem>>, %arg7: memref<1x4xf32, #tpu.memory_space<vmem>>, %arg8: memref<1x1x288x4xf32, #tpu.memory_space<vmem>>) attributes {dimension_semantics = [#tpu.dimension_semantics<parallel>, #tpu.dimension_semantics<parallel>], iteration_bounds = array<i64: 2, 1>, scalar_prefetch = 0 : i64, scratch_operands = 0 : i64, tpu.core_type = #tpu.core_type<tc>, window_params = [{transform_indices = @transform_0, window_bounds = array<i64: 1, 1, 414, 4>}, {transform_indices = @transform_1, window_bounds = array<i64: 1, 342, 1>}, {pipeline_mode = #tpu.pipeline_mode<synchronous>, transform_indices = @transform_2, window_bounds = array<i64: 9, 4, 4>}, {pipeline_mode = #tpu.pipeline_mode<synchronous>, transform_indices = @transform_3, window_bounds = array<i64: 9, 4, 4>}, {pipeline_mode = #tpu.pipeline_mode<synchronous>, transform_indices = @transform_4, window_bounds = array<i64: 1, 4>}, {pipeline_mode = #tpu.pipeline_mode<synchronous>, transform_indices = @transform_5, window_bounds = array<i64: 1, 4>}, {transform_indices = @transform_6, window_bounds = array<i64: 1, 1, 288, 4>}]} {
    %c0 = arith.constant 0 : index
    %c0_0 = arith.constant 0 : index
    %c0_1 = arith.constant 0 : index
    %c0_2 = arith.constant 0 : index
    %0 = vector.load %arg2[%c0, %c0_0, %c0_1, %c0_2] : memref<1x1x414x4xf32, #tpu.memory_space<vmem>>, vector<1x1x414x4xf32>
    %1 = vector.shape_cast %0 : vector<1x1x414x4xf32> to vector<414x4xf32>
    %2 = arith.truncf %1 : vector<414x4xf32> to vector<414x4xbf16>
    %3 = vector.extract_strided_slice %2 {offsets = [17, 0], sizes = [342, 4], strides = [1, 1]} : vector<414x4xbf16> to vector<342x4xbf16>
    %c0_3 = arith.constant 0 : index
    %c0_4 = arith.constant 0 : index
    %c0_5 = arith.constant 0 : index
    %4 = vector.load %arg4[%c0_3, %c0_4, %c0_5] : memref<9x4x4xbf16, #tpu.memory_space<vmem>>, vector<1x4x4xbf16>
    %5 = vector.shape_cast %4 : vector<1x4x4xbf16> to vector<4x4xbf16>
    %cst = arith.constant dense<0.000000e+00> : vector<342x4xf32>
    %6 = tpu.matmul %3, %5, %cst {dimension_numbers = #tpu.dot_dimension_numbers<[1], [0], [0], [1], [0, 0, 1, 1], [], []>} : vector<342x4xbf16>, vector<4x4xbf16>, vector<342x4xf32> -> vector<342x4xf32>
    %7 = vector.extract_strided_slice %2 {offsets = [18, 0], sizes = [342, 4], strides = [1, 1]} : vector<414x4xbf16> to vector<342x4xbf16>
    %c1 = arith.constant 1 : index
    %c0_6 = arith.constant 0 : index
    %c0_7 = arith.constant 0 : index
    %8 = vector.load %arg4[%c1, %c0_6, %c0_7] : memref<9x4x4xbf16, #tpu.memory_space<vmem>>, vector<1x4x4xbf16>
    %9 = vector.shape_cast %8 : vector<1x4x4xbf16> to vector<4x4xbf16>
    %cst_8 = arith.constant dense<0.000000e+00> : vector<342x4xf32>
    %10 = tpu.matmul %7, %9, %cst_8 {dimension_numbers = #tpu.dot_dimension_numbers<[1], [0], [0], [1], [0, 0, 1, 1], [], []>} : vector<342x4xbf16>, vector<4x4xbf16>, vector<342x4xf32> -> vector<342x4xf32>
    %11 = arith.addf %6, %10 : vector<342x4xf32>
    %12 = vector.extract_strided_slice %2 {offsets = [19, 0], sizes = [342, 4], strides = [1, 1]} : vector<414x4xbf16> to vector<342x4xbf16>
    %c2 = arith.constant 2 : index
    %c0_9 = arith.constant 0 : index
    %c0_10 = arith.constant 0 : index
    %13 = vector.load %arg4[%c2, %c0_9, %c0_10] : memref<9x4x4xbf16, #tpu.memory_space<vmem>>, vector<1x4x4xbf16>
    %14 = vector.shape_cast %13 : vector<1x4x4xbf16> to vector<4x4xbf16>
    %cst_11 = arith.constant dense<0.000000e+00> : vector<342x4xf32>
    %15 = tpu.matmul %12, %14, %cst_11 {dimension_numbers = #tpu.dot_dimension_numbers<[1], [0], [0], [1], [0, 0, 1, 1], [], []>} : vector<342x4xbf16>, vector<4x4xbf16>, vector<342x4xf32> -> vector<342x4xf32>
    %16 = arith.addf %11, %15 : vector<342x4xf32>
    %17 = vector.extract_strided_slice %2 {offsets = [35, 0], sizes = [342, 4], strides = [1, 1]} : vector<414x4xbf16> to vector<342x4xbf16>
    %c3 = arith.constant 3 : index
    %c0_12 = arith.constant 0 : index
    %c0_13 = arith.constant 0 : index
    %18 = vector.load %arg4[%c3, %c0_12, %c0_13] : memref<9x4x4xbf16, #tpu.memory_space<vmem>>, vector<1x4x4xbf16>
    %19 = vector.shape_cast %18 : vector<1x4x4xbf16> to vector<4x4xbf16>
    %cst_14 = arith.constant dense<0.000000e+00> : vector<342x4xf32>
    %20 = tpu.matmul %17, %19, %cst_14 {dimension_numbers = #tpu.dot_dimension_numbers<[1], [0], [0], [1], [0, 0, 1, 1], [], []>} : vector<342x4xbf16>, vector<4x4xbf16>, vector<342x4xf32> -> vector<342x4xf32>
    %21 = arith.addf %16, %20 : vector<342x4xf32>
    %22 = vector.extract_strided_slice %2 {offsets = [36, 0], sizes = [342, 4], strides = [1, 1]} : vector<414x4xbf16> to vector<342x4xbf16>
    %c4 = arith.constant 4 : index
    %c0_15 = arith.constant 0 : index
    %c0_16 = arith.constant 0 : index
    %23 = vector.load %arg4[%c4, %c0_15, %c0_16] : memref<9x4x4xbf16, #tpu.memory_space<vmem>>, vector<1x4x4xbf16>
    %24 = vector.shape_cast %23 : vector<1x4x4xbf16> to vector<4x4xbf16>
    %cst_17 = arith.constant dense<0.000000e+00> : vector<342x4xf32>
    %25 = tpu.matmul %22, %24, %cst_17 {dimension_numbers = #tpu.dot_dimension_numbers<[1], [0], [0], [1], [0, 0, 1, 1], [], []>} : vector<342x4xbf16>, vector<4x4xbf16>, vector<342x4xf32> -> vector<342x4xf32>
    %26 = arith.addf %21, %25 : vector<342x4xf32>
    %27 = vector.extract_strided_slice %2 {offsets = [37, 0], sizes = [342, 4], strides = [1, 1]} : vector<414x4xbf16> to vector<342x4xbf16>
    %c5 = arith.constant 5 : index
    %c0_18 = arith.constant 0 : index
    %c0_19 = arith.constant 0 : index
    %28 = vector.load %arg4[%c5, %c0_18, %c0_19] : memref<9x4x4xbf16, #tpu.memory_space<vmem>>, vector<1x4x4xbf16>
    %29 = vector.shape_cast %28 : vector<1x4x4xbf16> to vector<4x4xbf16>
    %cst_20 = arith.constant dense<0.000000e+00> : vector<342x4xf32>
    %30 = tpu.matmul %27, %29, %cst_20 {dimension_numbers = #tpu.dot_dimension_numbers<[1], [0], [0], [1], [0, 0, 1, 1], [], []>} : vector<342x4xbf16>, vector<4x4xbf16>, vector<342x4xf32> -> vector<342x4xf32>
    %31 = arith.addf %26, %30 : vector<342x4xf32>
    %32 = vector.extract_strided_slice %2 {offsets = [53, 0], sizes = [342, 4], strides = [1, 1]} : vector<414x4xbf16> to vector<342x4xbf16>
    %c6 = arith.constant 6 : index
    %c0_21 = arith.constant 0 : index
    %c0_22 = arith.constant 0 : index
    %33 = vector.load %arg4[%c6, %c0_21, %c0_22] : memref<9x4x4xbf16, #tpu.memory_space<vmem>>, vector<1x4x4xbf16>
    %34 = vector.shape_cast %33 : vector<1x4x4xbf16> to vector<4x4xbf16>
    %cst_23 = arith.constant dense<0.000000e+00> : vector<342x4xf32>
    %35 = tpu.matmul %32, %34, %cst_23 {dimension_numbers = #tpu.dot_dimension_numbers<[1], [0], [0], [1], [0, 0, 1, 1], [], []>} : vector<342x4xbf16>, vector<4x4xbf16>, vector<342x4xf32> -> vector<342x4xf32>
    %36 = arith.addf %31, %35 : vector<342x4xf32>
    %37 = vector.extract_strided_slice %2 {offsets = [54, 0], sizes = [342, 4], strides = [1, 1]} : vector<414x4xbf16> to vector<342x4xbf16>
    %c7 = arith.constant 7 : index
    %c0_24 = arith.constant 0 : index
    %c0_25 = arith.constant 0 : index
    %38 = vector.load %arg4[%c7, %c0_24, %c0_25] : memref<9x4x4xbf16, #tpu.memory_space<vmem>>, vector<1x4x4xbf16>
    %39 = vector.shape_cast %38 : vector<1x4x4xbf16> to vector<4x4xbf16>
    %cst_26 = arith.constant dense<0.000000e+00> : vector<342x4xf32>
    %40 = tpu.matmul %37, %39, %cst_26 {dimension_numbers = #tpu.dot_dimension_numbers<[1], [0], [0], [1], [0, 0, 1, 1], [], []>} : vector<342x4xbf16>, vector<4x4xbf16>, vector<342x4xf32> -> vector<342x4xf32>
    %41 = arith.addf %36, %40 : vector<342x4xf32>
    %42 = vector.extract_strided_slice %2 {offsets = [55, 0], sizes = [342, 4], strides = [1, 1]} : vector<414x4xbf16> to vector<342x4xbf16>
    %c8 = arith.constant 8 : index
    %c0_27 = arith.constant 0 : index
    %c0_28 = arith.constant 0 : index
    %43 = vector.load %arg4[%c8, %c0_27, %c0_28] : memref<9x4x4xbf16, #tpu.memory_space<vmem>>, vector<1x4x4xbf16>
    %44 = vector.shape_cast %43 : vector<1x4x4xbf16> to vector<4x4xbf16>
    %cst_29 = arith.constant dense<0.000000e+00> : vector<342x4xf32>
    %45 = tpu.matmul %42, %44, %cst_29 {dimension_numbers = #tpu.dot_dimension_numbers<[1], [0], [0], [1], [0, 0, 1, 1], [], []>} : vector<342x4xbf16>, vector<4x4xbf16>, vector<342x4xf32> -> vector<342x4xf32>
    %46 = arith.addf %41, %45 : vector<342x4xf32>
    %c0_30 = arith.constant 0 : index
    %c0_31 = arith.constant 0 : index
    %47 = vector.load %arg6[%c0_30, %c0_31] : memref<1x4xf32, #tpu.memory_space<vmem>>, vector<1x4xf32>
    %48 = vector.broadcast %47 : vector<1x4xf32> to vector<342x4xf32>
    %49 = arith.addf %46, %48 : vector<342x4xf32>
    %50 = arith.negf %49 : vector<342x4xf32>
    %51 = math.exp %50 : vector<342x4xf32>
    %cst_32 = arith.constant 1.000000e+00 : f32
    %52 = vector.broadcast %cst_32 : f32 to vector<342x4xf32>
    %53 = arith.addf %52, %51 : vector<342x4xf32>
    %54 = arith.divf %52, %53 : vector<342x4xf32>
    %55 = arith.mulf %49, %54 : vector<342x4xf32>
    %c0_33 = arith.constant 0 : index
    %c0_34 = arith.constant 0 : index
    %c0_35 = arith.constant 0 : index
    %56 = vector.load %arg3[%c0_33, %c0_34, %c0_35] : memref<1x342x1xf32, #tpu.memory_space<vmem>>, vector<1x342x1xf32>
    %57 = vector.shape_cast %56 : vector<1x342x1xf32> to vector<342x1xf32>
    %58 = vector.broadcast %57 : vector<342x1xf32> to vector<342x4xf32>
    %59 = arith.mulf %55, %58 : vector<342x4xf32>
    %60 = arith.truncf %59 : vector<342x4xf32> to vector<342x4xbf16>
    %61 = vector.extract_strided_slice %60 {offsets = [0, 0], sizes = [288, 4], strides = [1, 1]} : vector<342x4xbf16> to vector<288x4xbf16>
    %c0_36 = arith.constant 0 : index
    %c0_37 = arith.constant 0 : index
    %c0_38 = arith.constant 0 : index
    %62 = vector.load %arg5[%c0_36, %c0_37, %c0_38] : memref<9x4x4xbf16, #tpu.memory_space<vmem>>, vector<1x4x4xbf16>
    %63 = vector.shape_cast %62 : vector<1x4x4xbf16> to vector<4x4xbf16>
    %cst_39 = arith.constant dense<0.000000e+00> : vector<288x4xf32>
    %64 = tpu.matmul %61, %63, %cst_39 {dimension_numbers = #tpu.dot_dimension_numbers<[1], [0], [0], [1], [0, 0, 1, 1], [], []>} : vector<288x4xbf16>, vector<4x4xbf16>, vector<288x4xf32> -> vector<288x4xf32>
    %65 = vector.extract_strided_slice %60 {offsets = [1, 0], sizes = [288, 4], strides = [1, 1]} : vector<342x4xbf16> to vector<288x4xbf16>
    %c1_40 = arith.constant 1 : index
    %c0_41 = arith.constant 0 : index
    %c0_42 = arith.constant 0 : index
    %66 = vector.load %arg5[%c1_40, %c0_41, %c0_42] : memref<9x4x4xbf16, #tpu.memory_space<vmem>>, vector<1x4x4xbf16>
    %67 = vector.shape_cast %66 : vector<1x4x4xbf16> to vector<4x4xbf16>
    %cst_43 = arith.constant dense<0.000000e+00> : vector<288x4xf32>
    %68 = tpu.matmul %65, %67, %cst_43 {dimension_numbers = #tpu.dot_dimension_numbers<[1], [0], [0], [1], [0, 0, 1, 1], [], []>} : vector<288x4xbf16>, vector<4x4xbf16>, vector<288x4xf32> -> vector<288x4xf32>
    %69 = arith.addf %64, %68 : vector<288x4xf32>
    %70 = vector.extract_strided_slice %60 {offsets = [2, 0], sizes = [288, 4], strides = [1, 1]} : vector<342x4xbf16> to vector<288x4xbf16>
    %c2_44 = arith.constant 2 : index
    %c0_45 = arith.constant 0 : index
    %c0_46 = arith.constant 0 : index
    %71 = vector.load %arg5[%c2_44, %c0_45, %c0_46] : memref<9x4x4xbf16, #tpu.memory_space<vmem>>, vector<1x4x4xbf16>
    %72 = vector.shape_cast %71 : vector<1x4x4xbf16> to vector<4x4xbf16>
    %cst_47 = arith.constant dense<0.000000e+00> : vector<288x4xf32>
    %73 = tpu.matmul %70, %72, %cst_47 {dimension_numbers = #tpu.dot_dimension_numbers<[1], [0], [0], [1], [0, 0, 1, 1], [], []>} : vector<288x4xbf16>, vector<4x4xbf16>, vector<288x4xf32> -> vector<288x4xf32>
    %74 = arith.addf %69, %73 : vector<288x4xf32>
    %75 = vector.extract_strided_slice %60 {offsets = [18, 0], sizes = [288, 4], strides = [1, 1]} : vector<342x4xbf16> to vector<288x4xbf16>
    %c3_48 = arith.constant 3 : index
    %c0_49 = arith.constant 0 : index
    %c0_50 = arith.constant 0 : index
    %76 = vector.load %arg5[%c3_48, %c0_49, %c0_50] : memref<9x4x4xbf16, #tpu.memory_space<vmem>>, vector<1x4x4xbf16>
    %77 = vector.shape_cast %76 : vector<1x4x4xbf16> to vector<4x4xbf16>
    %cst_51 = arith.constant dense<0.000000e+00> : vector<288x4xf32>
    %78 = tpu.matmul %75, %77, %cst_51 {dimension_numbers = #tpu.dot_dimension_numbers<[1], [0], [0], [1], [0, 0, 1, 1], [], []>} : vector<288x4xbf16>, vector<4x4xbf16>, vector<288x4xf32> -> vector<288x4xf32>
    %79 = arith.addf %74, %78 : vector<288x4xf32>
    %80 = vector.extract_strided_slice %60 {offsets = [19, 0], sizes = [288, 4], strides = [1, 1]} : vector<342x4xbf16> to vector<288x4xbf16>
    %c4_52 = arith.constant 4 : index
    %c0_53 = arith.constant 0 : index
    %c0_54 = arith.constant 0 : index
    %81 = vector.load %arg5[%c4_52, %c0_53, %c0_54] : memref<9x4x4xbf16, #tpu.memory_space<vmem>>, vector<1x4x4xbf16>
    %82 = vector.shape_cast %81 : vector<1x4x4xbf16> to vector<4x4xbf16>
    %cst_55 = arith.constant dense<0.000000e+00> : vector<288x4xf32>
    %83 = tpu.matmul %80, %82, %cst_55 {dimension_numbers = #tpu.dot_dimension_numbers<[1], [0], [0], [1], [0, 0, 1, 1], [], []>} : vector<288x4xbf16>, vector<4x4xbf16>, vector<288x4xf32> -> vector<288x4xf32>
    %84 = arith.addf %79, %83 : vector<288x4xf32>
    %85 = vector.extract_strided_slice %60 {offsets = [20, 0], sizes = [288, 4], strides = [1, 1]} : vector<342x4xbf16> to vector<288x4xbf16>
    %c5_56 = arith.constant 5 : index
    %c0_57 = arith.constant 0 : index
    %c0_58 = arith.constant 0 : index
    %86 = vector.load %arg5[%c5_56, %c0_57, %c0_58] : memref<9x4x4xbf16, #tpu.memory_space<vmem>>, vector<1x4x4xbf16>
    %87 = vector.shape_cast %86 : vector<1x4x4xbf16> to vector<4x4xbf16>
    %cst_59 = arith.constant dense<0.000000e+00> : vector<288x4xf32>
    %88 = tpu.matmul %85, %87, %cst_59 {dimension_numbers = #tpu.dot_dimension_numbers<[1], [0], [0], [1], [0, 0, 1, 1], [], []>} : vector<288x4xbf16>, vector<4x4xbf16>, vector<288x4xf32> -> vector<288x4xf32>
    %89 = arith.addf %84, %88 : vector<288x4xf32>
    %90 = vector.extract_strided_slice %60 {offsets = [36, 0], sizes = [288, 4], strides = [1, 1]} : vector<342x4xbf16> to vector<288x4xbf16>
    %c6_60 = arith.constant 6 : index
    %c0_61 = arith.constant 0 : index
    %c0_62 = arith.constant 0 : index
    %91 = vector.load %arg5[%c6_60, %c0_61, %c0_62] : memref<9x4x4xbf16, #tpu.memory_space<vmem>>, vector<1x4x4xbf16>
    %92 = vector.shape_cast %91 : vector<1x4x4xbf16> to vector<4x4xbf16>
    %cst_63 = arith.constant dense<0.000000e+00> : vector<288x4xf32>
    %93 = tpu.matmul %90, %92, %cst_63 {dimension_numbers = #tpu.dot_dimension_numbers<[1], [0], [0], [1], [0, 0, 1, 1], [], []>} : vector<288x4xbf16>, vector<4x4xbf16>, vector<288x4xf32> -> vector<288x4xf32>
    %94 = arith.addf %89, %93 : vector<288x4xf32>
    %95 = vector.extract_strided_slice %60 {offsets = [37, 0], sizes = [288, 4], strides = [1, 1]} : vector<342x4xbf16> to vector<288x4xbf16>
    %c7_64 = arith.constant 7 : index
    %c0_65 = arith.constant 0 : index
    %c0_66 = arith.constant 0 : index
    %96 = vector.load %arg5[%c7_64, %c0_65, %c0_66] : memref<9x4x4xbf16, #tpu.memory_space<vmem>>, vector<1x4x4xbf16>
    %97 = vector.shape_cast %96 : vector<1x4x4xbf16> to vector<4x4xbf16>
    %cst_67 = arith.constant dense<0.000000e+00> : vector<288x4xf32>
    %98 = tpu.matmul %95, %97, %cst_67 {dimension_numbers = #tpu.dot_dimension_numbers<[1], [0], [0], [1], [0, 0, 1, 1], [], []>} : vector<288x4xbf16>, vector<4x4xbf16>, vector<288x4xf32> -> vector<288x4xf32>
    %99 = arith.addf %94, %98 : vector<288x4xf32>
    %100 = vector.extract_strided_slice %60 {offsets = [38, 0], sizes = [288, 4], strides = [1, 1]} : vector<342x4xbf16> to vector<288x4xbf16>
    %c8_68 = arith.constant 8 : index
    %c0_69 = arith.constant 0 : index
    %c0_70 = arith.constant 0 : index
    %101 = vector.load %arg5[%c8_68, %c0_69, %c0_70] : memref<9x4x4xbf16, #tpu.memory_space<vmem>>, vector<1x4x4xbf16>
    %102 = vector.shape_cast %101 : vector<1x4x4xbf16> to vector<4x4xbf16>
    %cst_71 = arith.constant dense<0.000000e+00> : vector<288x4xf32>
    %103 = tpu.matmul %100, %102, %cst_71 {dimension_numbers = #tpu.dot_dimension_numbers<[1], [0], [0], [1], [0, 0, 1, 1], [], []>} : vector<288x4xbf16>, vector<4x4xbf16>, vector<288x4xf32> -> vector<288x4xf32>
    %104 = arith.addf %99, %103 : vector<288x4xf32>
    %c0_72 = arith.constant 0 : index
    %c0_73 = arith.constant 0 : index
    %105 = vector.load %arg7[%c0_72, %c0_73] : memref<1x4xf32, #tpu.memory_space<vmem>>, vector<1x4xf32>
    %106 = vector.broadcast %105 : vector<1x4xf32> to vector<288x4xf32>
    %107 = arith.addf %104, %106 : vector<288x4xf32>
    %108 = vector.extract_strided_slice %1 {offsets = [55, 0], sizes = [288, 4], strides = [1, 1]} : vector<414x4xf32> to vector<288x4xf32>
    %109 = arith.addf %107, %108 : vector<288x4xf32>
    %110 = arith.negf %109 : vector<288x4xf32>
    %111 = math.exp %110 : vector<288x4xf32>
    %cst_74 = arith.constant 1.000000e+00 : f32
    %112 = vector.broadcast %cst_74 : f32 to vector<288x4xf32>
    %113 = arith.addf %112, %111 : vector<288x4xf32>
    %114 = arith.divf %112, %113 : vector<288x4xf32>
    %115 = arith.mulf %109, %114 : vector<288x4xf32>
    %c0_75 = arith.constant 0 : index
    %c0_76 = arith.constant 0 : index
    %c0_77 = arith.constant 0 : index
    %c0_78 = arith.constant 0 : index
    %116 = vector.load %arg8[%c0_75, %c0_76, %c0_77, %c0_78] : memref<1x1x288x4xf32, #tpu.memory_space<vmem>>, vector<1x1x288x4xf32>
    %117 = vector.shape_cast %116 : vector<1x1x288x4xf32> to vector<288x4xf32>
    %118 = vector.shape_cast %115 : vector<288x4xf32> to vector<1x1x288x4xf32>
    tpu.vector_store %arg8[%c0_75, %c0_76, %c0_77, %c0_78], %118 {strides = array<i32>} : memref<1x1x288x4xf32, #tpu.memory_space<vmem>>, vector<1x1x288x4xf32>,
    return
  }
  func.func @transform_0(%arg0: i32, %arg1: i32) -> (i32, i32, i32, i32) {
    %c0_i32 = arith.constant 0 : i32
    %c0_i32_0 = arith.constant 0 : i32
    %c0_i32_1 = arith.constant 0 : i32
    return %arg0, %arg1, %c0_i32, %c0_i32_0 : i32, i32, i32, i32
  }
  func.func @transform_1(%arg0: i32, %arg1: i32) -> (i32, i32, i32) {
    %c0_i32 = arith.constant 0 : i32
    %c0_i32_0 = arith.constant 0 : i32
    %c0_i32_1 = arith.constant 0 : i32
    return %arg1, %c0_i32, %c0_i32_0 : i32, i32, i32
  }
  func.func @transform_2(%arg0: i32, %arg1: i32) -> (i32, i32, i32) {
    %c0_i32 = arith.constant 0 : i32
    %c0_i32_0 = arith.constant 0 : i32
    %c0_i32_1 = arith.constant 0 : i32
    %c0_i32_2 = arith.constant 0 : i32
    return %c0_i32, %c0_i32_0, %c0_i32_1 : i32, i32, i32
  }
  func.func @transform_3(%arg0: i32, %arg1: i32) -> (i32, i32, i32) {
    %c0_i32 = arith.constant 0 : i32
    %c0_i32_0 = arith.constant 0 : i32
    %c0_i32_1 = arith.constant 0 : i32
    %c0_i32_2 = arith.constant 0 : i32
    return %c0_i32, %c0_i32_0, %c0_i32_1 : i32, i32, i32
  }
  func.func @transform_4(%arg0: i32, %arg1: i32) -> (i32, i32) {
    %c0_i32 = arith.constant 0 : i32
    %c0_i32_0 = arith.constant 0 : i32
    %c0_i32_1 = arith.constant 0 : i32
    return %c0_i32, %c0_i32_0 : i32, i32
  }
  func.func @transform_5(%arg0: i32, %arg1: i32) -> (i32, i32) {
    %c0_i32 = arith.constant 0 : i32
    %c0_i32_0 = arith.constant 0 : i32
    %c0_i32_1 = arith.constant 0 : i32
    return %c0_i32, %c0_i32_0 : i32, i32
  }
  func.func @transform_6(%arg0: i32, %arg1: i32) -> (i32, i32, i32, i32) {
    %c0_i32 = arith.constant 0 : i32
    %c0_i32_0 = arith.constant 0 : i32
    %c0_i32_1 = arith.constant 0 : i32
    return %arg0, %arg1, %c0_i32, %c0_i32_0 : i32, i32, i32, i32
  }
}

</mosaic_0001>

<bundles_post_ra>
// kernel: residual_block_forward.1
= control target key start
LH: loop header
LB: loop body
LE: loop exit
PB: predicated region body
PF: predicated region fallthrough
CT: control target
= control target key end

     0   :  { %s10320_s21 = smov 0   ;;  %s10322_s22 = smov 0   ;;  %s13152_s0 = inlined_call_operand.vmem [shape: f32[2,1,414,4], index: 0, kind: input, shape index: {}]   ;;  %s13153_s1 = inlined_call_operand.vmem [shape: f32[1,342,1], index: 1, kind: input, shape index: {}]   ;;  %s13154_s2 = inlined_call_operand.vmem [shape: bf16[9,4,4], index: 2, kind: input, shape index: {}]   ;;  %s13155_s3 = inlined_call_operand.vmem [shape: bf16[9,4,4], index: 3, kind: input, shape index: {}]   ;;  %s13156_s4 = inlined_call_operand.vmem [shape: f32[1,4], index: 4, kind: input, shape index: {}]   ;;  %s13157_s5 = inlined_call_operand.vmem [shape: f32[1,4], index: 5, kind: input, shape index: {}]   ;;  %s13158_s6 = inlined_call_operand.vmem [shape: f32[2,1,288,4], index: 6, kind: output, shape index: {}]  }
   0x1   :  { %s10324_s23 = smov 0  }
   0x2 LB: > { %s28_s24 = sadd.s32 1, %s10278_s22  ;;  %p7658_p0 = scmp.ge.s32.totalorder %s10282_s23, 1  ;;  %s10282_s23 = sphi %s10324_s23, %s16_s23   ;;  %s10278_s22 = sphi %s10322_s22, %s13502_s22   ;;  %s10274_s21 = sphi %s10320_s21, %s13501_s21  }
   0x3   : > { %p30_p1 = scmp.ge.s32.totalorder %s28_s24, 2  ;;  %p242_p2 = scmp.lt.s32.totalorder %s10282_s23, 3 }
   0x5   : > { %s13504_s24 = smov (%p30_p1, %s28_s24), 0  ;;  %p243_p3 = pnand %p7658_p0, %p242_p2 }
   0x7   : > { %246 = sbr.rel (%p243_p3) target bundleno = 1838 (0x72e), region = 44 }
   0xe   : > { %v7661_v0 = vld [vmem:[%s13154_s2 + $0x2] sm:$0x3]  ;;  %vm517_vm0 = vcmask 1041408   ;;  %p285_p4 = scmp.lt.s32.totalorder %s10274_s21, 1  ;;  %v381_v2 = vld [vmem:[%s13154_s2] sm:$0x3] }
   0xf   : > { %9863 = vmatprep.subr.msk.bf16.mxu0 %vm517_vm0, %v7661_v0  ;;  %v519_v1 = vsel %vm517_vm0, %v7661_v0, 0  ;;  %9864 = vmatprep.subr.msk.bf16.mxu1 %vm517_vm0, %v7661_v0  ;;  %vm406_vm1 = vcmask 1046528   ;;  %vm450_vm2 = vcmask 31744   ;;  %v971_v21 = vsel %vm517_vm0, %v381_v2, 0  ;;  %v7706_v32 = vld [vmem:[%s13154_s2 + $0x4] sm:$0x3] }
  0x10   : > { %8498 = vmatpush3.bf16.msra.mxu0 %v519_v1  ;;  %s13506_s21 = smov (!%p285_p4, %s10274_s21), 1  ;;  %9254 = vmatpush3.bf16.msra.mxu1 %v519_v1  ;;  %vm728_vm3 = vsmask.f32 7424  ;;  %vm1182_vm4 = vsmask.f32 6400  ;;  %vm1860_vm5 = vcmask 1045504  }
  0x11   : > { %9865 = vmatprep.subr.msk.bf16.mxu0 %vm517_vm0, %v381_v2  ;;  %s9882_s29 = smul.u32 416, %s13506_s21  ;;  %vm2224_vm6 = vsmask.f32 5376  ;;  %vm2902_vm7 = vcmask 1044480   ;;  %vm3266_vm8 = vsmask.f32 4352 }
  0x12   : > { %vm7111_vm9 = vcmask 1040384   ;;  %s9883_s15 = smul.u32 288, %s13506_s21 }
  0x13   : > { %s10354_s8 = scalar_lea.vmem %s13152_s0, %s9882_s29 }
  0x14   : > { %v309_v3 = vld [vmem:[%s10354_s8 + $0x10] sm:$0xff]  ;;  %v310_v4 = vld [vmem:[%s10354_s8 + $0x18] sm:$0xff]  ;;  %v311_v5 = vld [vmem:[%s10354_s8 + $0x20] sm:$0xff]  ;;  %s12833_s17 = scalar_lea.vmem %s13158_s6, %s9883_s15 }
  0x15   : > { %v312_v6 = vld [vmem:[%s10354_s8 + $0x28] sm:$0xff]  ;;  %v10360_v7 = vpack.c.bf16 %v310_v4, %v309_v3  ;;  %v313_v8 = vld [vmem:[%s10354_s8 + $0x30] sm:$0xff]  ;;  %v314_v9 = vld [vmem:[%s10354_s8 + $0x38] sm:$0xff] }
  0x16   : > { %v10364_v10 = vpack.c.bf16 %v312_v6, %v311_v5  ;;  %v10366_v11 = vpack.c.bf16 %v314_v9, %v313_v8  ;;  %v315_v12 = vld [vmem:[%s10354_s8 + $0x40] sm:$0xff]  ;;  %v316_v13 = vld [vmem:[%s10354_s8 + $0x48] sm:$0xff]  ;;  %v317_v14 = vld [vmem:[%s10354_s8 + $0x50] sm:$0xff] }
  0x17   : > { %v407_v15 = vrot.slane %v10360_v7, 1  ;;  %v10372_v16 = vpack.c.bf16 %v316_v13, %v315_v12  ;;  %v318_v17 = vld [vmem:[%s10354_s8 + $0x58] sm:$0xff]  ;;  %v732_v18 = vshll.u32 %v10360_v7, 16  ;;  %v730_v24 = vshrl.u32 %v10360_v7, 16  ;;  %v319_v29 = vld [vmem:[%s10354_s8 + $0x60] sm:$0xff]  ;;  %v320_v30 = vld [vmem:[%s10354_s8 + $0x68] sm:$0xff] }
  0x18   : > { %v408_v19 = vrot.slane %v10364_v10, 1  ;;  %v410_v20 = vrot.slane %v10366_v11, 1  ;;  %v10380_v23 = vpack.c.bf16 %v318_v17, %v317_v14  ;;  %v10388_v28 = vshll.u32 %v10364_v10, 16  ;;  %v321_v33 = vld [vmem:[%s10354_s8 + $0x70] sm:$0xff]  ;;  %v322_v34 = vld [vmem:[%s10354_s8 + $0x78] sm:$0xff]  ;;  %v323_v40 = vld [vmem:[%s10354_s8 + $0x80] sm:$0xff] }
  0x19   : > { %v412_v22 = vrot.slane %v10372_v16, 1  ;;  %v734_v27 = vrot.slane %v732_v18, 1  ;;  %v10402_v36 = vpack.c.bf16 %v320_v30, %v319_v29  ;;  %v10408_v39 = vpack.c.bf16 %v322_v34, %v321_v33  ;;  %v324_v41 = vld [vmem:[%s10354_s8 + $0x88] sm:$0xff]  ;;  %v325_v45 = vld [vmem:[%s10354_s8 + $0x90] sm:$0xff]  ;;  %v326_v50 = vld [vmem:[%s10354_s8 + $0x98] sm:$0xff] }
  0x1a   : > { %v409_v25 = vsel %vm406_vm1, %v407_v15, %v408_v19  ;;  %v411_v26 = vsel %vm406_vm1, %v408_v19, %v410_v20  ;;  %13270 = vst [vmem:[#allocation2_spill] sm:$0xff] %v10388_v28  ;;  %v414_v35 = vrot.slane %v10380_v23, 1  ;;  %v739_v38 = vrot.slane %v10388_v28, 1  ;;  %v327_v51 = vld [vmem:[%s10354_s8 + $0xa0] sm:$0xff]  ;;  %v328_v52 = vld [vmem:[%s10354_s8 + $0xa8] sm:$0xff]  ;;  %v329_v3 = vld [vmem:[%s10354_s8 + $0xb0] sm:$0xff] }
  0x1b   : > { %8499 = vmatprep.mubr.msk.bf16.mxu0 %vm450_vm2, %v409_v25  ;;  %v413_v31 = vsel %vm406_vm1, %v410_v20, %v412_v22  ;;  %v735_v37 = vor.u32 %v734_v27, %v730_v24  ;;  %v416_v42 = vrot.slane %v10402_v36, 1  ;;  %v10414_v43 = vshll.u32 %v10366_v11, 16  ;;  %v330_v4 = vld [vmem:[%s10354_s8 + $0xb8] sm:$0xff]  ;;  %v331_v8 = vld [vmem:[%s10354_s8 + $0xc0] sm:$0xff]  ;;  %v332_v9 = vld [vmem:[%s10354_s8 + $0xc8] sm:$0xff] }
  0x1c   : > { %8500 = vmatmul.mubr.msk.bf16.vlgmr.msra.gmra.mrb[0].mxu0 %vm450_vm2, %v411_v26  ;;  %v418_v44 = vrot.slane %v10408_v39, 1  ;;  %v415_v46 = vsel %vm406_vm1, %v412_v22, %v414_v35  ;;  %v10420_v47 = vshrl.u32 %v10364_v10, 16  ;;  %v10423_v49 = vpack.c.bf16 %v324_v41, %v323_v40  ;;  %v10482_v25 = vld [vmem:[%s13154_s2 + $0x6] sm:$0x3]  ;;  %v333_v33 = vld [vmem:[%s10354_s8 + $0xd0] sm:$0xff]  ;;  %v334_v34 = vld [vmem:[%s10354_s8 + $0xd8] sm:$0xff] }
  0x1d   : > { %8544 = vmatpush3.bf16.msra.mxu0 %v971_v21  ;;  %8503 = vmatprep.mubr.msk.bf16.mxu0 %vm450_vm2, %v413_v31  ;;  %13271 = vst [vmem:[#allocation3_spill] sm:$0xff] %v10414_v43  ;;  %v417_v48 = vsel %vm406_vm1, %v414_v35, %v416_v42  ;;  %v740_v53 = vsel %vm728_vm3, %v735_v37, %v739_v38  ;;  %v10430_v54 = vshrl.u32 %v10366_v11, 16  ;;  %v10433_v55 = vshll.u32 %v10372_v16, 16  ;;  %v336_v40 = vld [vmem:[%s10354_s8 + $0xe8] sm:$0xff] }
  0x1e   : > { %9866 = vmatprep.subr.msk.bf16.mxu0 %vm517_vm0, %v7706_v32  ;;  %8507 = vmatprep.mubr.msk.bf16.mxu1 %vm450_vm2, %v417_v48  ;;  %v419_v56 = vsel %vm406_vm1, %v416_v42, %v418_v44  ;;  %v420_v57 = vrot.slane %v10423_v49, 1  ;;  %v747_v58 = vrot.slane %v10414_v43, 1  ;;  %v10441_v59 = vpack.c.bf16 %v326_v50, %v325_v45 }
  0x1f   : > { %8508 = vmatmul.mubr.msk.bf16.vlgmr.msra.gmra.mrb[0].mxu1 %vm450_vm2, %v419_v56  ;;  %v10443_v60 = vpack.c.bf16 %v328_v52, %v327_v51  ;;  %v743_v61 = vor.u32 %v10420_v47, %v739_v38  ;;  %v755_v0 = vrot.slane %v10433_v55, 1  ;;  %v10456_v5 = vshll.u32 %v10380_v23, 16  ;;  %v335_v38 = vld [vmem:[%s10354_s8 + $0xe0] sm:$0xff] }
  0x20   : > { %13272 = vst [vmem:[#allocation4_spill] sm:$0xff] %v10441_v59  ;;  %v421_v62 = vsel %vm406_vm1, %v418_v44, %v420_v57  ;;  %v751_v63 = vor.u32 %v10430_v54, %v747_v58  ;;  %v422_v1 = vrot.slane %v10441_v59, 1  ;;  %v1337_v13 = vsel %vm517_vm0, %v7706_v32, 0 }
  0x21   : > { %13273 = vst [vmem:[#allocation5_spill] sm:$0xff] %v10443_v60  ;;  %8511 = vmatprep.mubr.msk.bf16.mxu1 %vm450_vm2, %v421_v62  ;;  %v424_v2 = vrot.slane %v10443_v60, 1  ;;  %13274 = vst [vmem:[#allocation6_spill] sm:$0xff] %v10456_v5  ;;  %v748_v12 = vsel %vm728_vm3, %v743_v61, %v747_v58  ;;  %v10464_v14 = vshrl.u32 %v10372_v16, 16  ;;  %v10469_v19 = vshrl.u32 %v10380_v23, 16  ;;  %v337_v62 = vld [vmem:[%s10354_s8 + $0xf0] sm:$0xff] }
  0x22   : > { %v423_v6 = vsel %vm406_vm1, %v420_v57, %v422_v1  ;;  %v756_v17 = vsel %vm728_vm3, %v751_v63, %v755_v0  ;;  %v10472_v20 = vshll.u32 %v10402_v36, 16  ;;  %v10474_v21 = vpack.c.bf16 %v330_v4, %v329_v3  ;;  %v338_v63 = vld [vmem:[%s10354_s8 + $0xf8] sm:$0xff]  ;;  %v340_v3 = vld [vmem:[%s10354_s8 + $0x108] sm:$0xff] }
  0x23   : > { %v425_v15 = vsel %vm406_vm1, %v422_v1, %v424_v2  ;;  %13275 = vst [vmem:[#allocation7_spill] sm:$0xff] %v10469_v19  ;;  %v10477_v22 = vpack.c.bf16 %v332_v9, %v331_v8  ;;  %v763_v26 = vrot.slane %v10456_v5, 1  ;;  %v759_v29 = vor.u32 %v10464_v14, %v755_v0 }
  0x24   : > { %8504 = vmatmul.mubr.msk.bf16.gmra.mrb[4].mxu0 %vm450_vm2, %v415_v46  ;;  %13276 = vst [vmem:[#allocation8_spill] sm:$0xff] %v10472_v20  ;;  %13277 = vst [vmem:[#allocation9_spill] sm:$0xff] %v10474_v21  ;;  %v426_v27 = vrot.slane %v10474_v21, 1  ;;  %v771_v32 = vrot.slane %v10472_v20, 1  ;;  %v10498_v35 = vshll.u32 %v10408_v39, 16  ;;  %v10505_v42 = vshrl.u32 %v10402_v36, 16 }
  0x25   : > { %8545 = vmatprep.mubr.msk.bf16.mxu0 %vm450_vm2, %v740_v53  ;;  %13278 = vst [vmem:[#allocation10_spill] sm:$0xff] %v10477_v22  ;;  %v428_v30 = vrot.slane %v10477_v22, 1  ;;  %v767_v31 = vor.u32 %v10469_v19, %v763_v26  ;;  %v764_v41 = vsel %vm728_vm3, %v759_v29, %v763_v26  ;;  %v10510_v46 = vshrl.u32 %v10408_v39, 16 }
  0x26   : > { %13279 = vst [vmem:[#allocation11_spill] sm:$0xff] %v10498_v35  ;;  %v427_v37 = vsel %vm406_vm1, %v424_v2, %v426_v27  ;;  %13280 = vst [vmem:[#allocation12_spill] sm:$0xff] %v10505_v42  ;;  %v10513_v48 = vshll.u32 %v10423_v49, 16  ;;  %v10515_v50 = vpack.c.bf16 %v334_v34, %v333_v33  ;;  %v10518_v51 = vpack.c.bf16 %v336_v40, %v335_v38  ;;  %v339_v2 = vld [vmem:[%s10354_s8 + $0x100] sm:$0xff]  ;;  %v342_v38 = vld [vmem:[%s10354_s8 + $0x118] sm:$0xff] }
  0x27   : > { %8512 = vmatmul.mubr.msk.bf16.gmra.mrb[4].mxu1 %vm450_vm2, %v423_v6  ;;  %v429_v44 = vsel %vm406_vm1, %v426_v27, %v428_v30  ;;  %v772_v45 = vsel %vm728_vm3, %v767_v31, %v771_v32  ;;  %13281 = vst [vmem:[#allocation13_spill] sm:$0xff] %v10510_v46  ;;  %v779_v52 = vrot.slane %v10498_v35, 1  ;;  %v775_v56 = vor.u32 %v10505_v42, %v771_v32 }
  0x28   : > { %8515 = vmatprep.mubr.msk.bf16.mxu1 %vm450_vm2, %v425_v15  ;;  %13282 = vst [vmem:[#allocation14_spill] sm:$0xff] %v10513_v48  ;;  %13283 = vst [vmem:[#allocation15_spill] sm:$0xff] %v10515_v50  ;;  %v430_v53 = vrot.slane %v10515_v50, 1  ;;  %v432_v57 = vrot.slane %v10518_v51, 1  ;;  %v787_v61 = vrot.slane %v10513_v48, 1  ;;  %v10532_v0 = vshll.u32 %v10441_v59, 16 }
  0x29   : > { %13284 = vst [vmem:[#allocation16_spill] sm:$0xff] %v10518_v51  ;;  %v783_v58 = vor.u32 %v10510_v46, %v779_v52  ;;  %v780_v4 = vsel %vm728_vm3, %v775_v56, %v779_v52  ;;  %v10539_v6 = vshrl.u32 %v10423_v49, 16  ;;  %v10549_v15 = vpack.c.bf16 %v338_v63, %v337_v62 }
  0x2a   : > { %13285 = vst [vmem:[#allocation17_spill] sm:$0xff] %v10532_v0  ;;  %v431_v1 = vsel %vm406_vm1, %v428_v30, %v430_v53  ;;  %v433_v8 = vsel %vm406_vm1, %v430_v53, %v432_v57  ;;  %v795_v26 = vrot.slane %v10532_v0, 1  ;;  %v10560_v29 = vrot.slane %v730_v24, 1 }
  0x2b   : > { %13286 = vst [vmem:[#allocation18_spill] sm:$0xff] %v10539_v6  ;;  %v788_v9 = vsel %vm728_vm3, %v783_v58, %v787_v61  ;;  %13289 = vst [vmem:[#allocation21_spill] sm:$0xff] %v10549_v15  ;;  %v434_v27 = vrot.slane %v10549_v15, 1  ;;  %v791_v30 = vor.u32 %v10539_v6, %v787_v61  ;;  %v10569_v34 = vrot.slane %v732_v18, 2 }
  0x2c   : > { %8546 = vmatmul.mubr.msk.bf16.vlgmr.msra.gmra.mrb[0].mxu0 %vm450_vm2, %v748_v12  ;;  %v10544_v12 = vshrl.u32 %v10441_v59, 16  ;;  %v10574_v40 = vshll.u32 %v10474_v21, 16  ;;  %v10583_v53 = vshrl.u32 %v10443_v60, 16  ;;  %v10588_v56 = vshrl.u32 %v10474_v21, 16 }
  0x2d   : > { %8590 = vmatpush3.bf16.msra.mxu0 %v1337_v13  ;;  %8549 = vmatprep.mubr.msk.bf16.mxu0 %vm450_vm2, %v756_v17  ;;  %v10547_v13 = vshll.u32 %v10443_v60, 16  ;;  %v10552_v17 = vpack.c.bf16 %v340_v3, %v339_v2  ;;  %v435_v24 = vsel %vm406_vm1, %v432_v57, %v434_v27  ;;  %v796_v52 = vsel %vm728_vm3, %v791_v30, %v795_v26  ;;  %v347_v30 = vld [vmem:[%s10354_s8 + $0x140] sm:$0xff] }
  0x2e   : > { %9867 = vmatprep.subr.msk.bf16.mxu0 %vm517_vm0, %v10482_v25  ;;  %13287 = vst [vmem:[#allocation19_spill] sm:$0xff] %v10544_v12  ;;  %v799_v32 = vor.u32 %v10544_v12, %v795_v26  ;;  %13291 = vst [vmem:[#allocation23_spill] sm:$0xff] %v10574_v40  ;;  %v10591_v57 = vshll.u32 %v10477_v22, 16  ;;  %v811_v62 = vrot.slane %v10574_v40, 1  ;;  %v10610_v26 = vshll.u32 %v10515_v50, 16 }
  0x2f   : > { %8516 = vmatmul.mubr.msk.bf16.gmra.mrb[8].mxu1 %vm450_vm2, %v427_v37  ;;  %13288 = vst [vmem:[#allocation20_spill] sm:$0xff] %v10547_v13  ;;  %13290 = vst [vmem:[#allocation22_spill] sm:$0xff] %v10552_v17  ;;  %v436_v31 = vrot.slane %v10552_v17, 1  ;;  %v803_v33 = vrot.slane %v10547_v13, 1  ;;  %v341_v37 = vld [vmem:[%s10354_s8 + $0x110] sm:$0xff]  ;;  %v1187_v60 = vrot.slane %v10388_v28, 2 }
  0x30   : > { %8519 = vmatprep.mubr.msk.bf16.mxu1 %vm450_vm2, %v429_v44  ;;  %v344_v44 = vld [vmem:[%s10354_s8 + $0x128] sm:$0xff]  ;;  %13292 = vst [vmem:[#allocation24_spill] sm:$0xff] %v10583_v53  ;;  %13293 = vst [vmem:[#allocation25_spill] sm:$0xff] %v10588_v56  ;;  %v10593_v58 = vpack.c.bf16 %v342_v38, %v341_v37  ;;  %v815_v3 = vor.u32 %v10588_v56, %v811_v62  ;;  %v10617_v38 = vshrl.u32 %v10477_v22, 16  ;;  %v10659_v22 = vshll.u32 %v10552_v17, 16 }
  0x31   : > { %v437_v7 = vsel %vm406_vm1, %v434_v27, %v436_v31  ;;  %v804_v18 = vsel %vm728_vm3, %v799_v32, %v803_v33  ;;  %13294 = vst [vmem:[#allocation26_spill] sm:$0xff] %v10591_v57  ;;  %13297 = vst [vmem:[#allocation29_spill] sm:$0xff] %v10610_v26  ;;  %v348_v32 = vld [vmem:[%s10354_s8 + $0x148] sm:$0xff]  ;;  %v1190_v59 = vrot.slane %v10430_v54, 1  ;;  %v1195_v28 = vrot.slane %v10433_v55, 2 }
  0x32   : > { %13295 = vst [vmem:[#allocation27_spill] sm:$0xff] %v10593_v58  ;;  %v438_v63 = vrot.slane %v10593_v58, 1  ;;  %13298 = vst [vmem:[#allocation30_spill] sm:$0xff] %v10617_v38 }
  0x33   : > { %13306 = vst [vmem:[#allocation38_spill] sm:$0xff] %v10659_v22 }
  0x34   : > { %8550 = vmatmul.mubr.msk.bf16.gmra.mrb[4].mxu0 %vm450_vm2, %v764_v41  ;;  %v343_v41 = vld [vmem:[%s10354_s8 + $0x120] sm:$0xff]  ;;  %v439_v27 = vsel %vm406_vm1, %v436_v31, %v438_v63 }
  0x35   : > { %8553 = vmatprep.mubr.msk.bf16.mxu0 %vm450_vm2, %v772_v45  ;;  %v10596_v61 = vpack.c.bf16 %v344_v44, %v343_v41  ;;  %v10622_v41 = vshrl.u32 %v10515_v50, 16  ;;  %v10625_v44 = vshll.u32 %v10518_v51, 16  ;;  %v10656_v50 = vshrl.u32 %v10549_v15, 16 }
  0x37   : > { %8520 = vmatmul.mubr.msk.bf16.gmra.mrb[12].mxu1 %vm450_vm2, %v431_v1  ;;  %13296 = vst [vmem:[#allocation28_spill] sm:$0xff] %v10596_v61  ;;  %v807_v1 = vor.u32 %v10583_v53, %v803_v33  ;;  %v440_v2 = vrot.slane %v10596_v61, 1  ;;  %13299 = vst [vmem:[#allocation31_spill] sm:$0xff] %v10622_v41 }
  0x38   : > { %8523 = vmatprep.mubr.msk.bf16.mxu1 %vm450_vm2, %v433_v8  ;;  %v345_v8 = vld [vmem:[%s10354_s8 + $0x130] sm:$0xff]  ;;  %13300 = vst [vmem:[#allocation32_spill] sm:$0xff] %v10625_v44  ;;  %13305 = vst [vmem:[#allocation37_spill] sm:$0xff] %v10656_v50 }
  0x39   : > { %v812_v37 = vsel %vm728_vm3, %v807_v1, %v811_v62  ;;  %v441_v33 = vsel %vm406_vm1, %v438_v63, %v440_v2 }
  0x3c   : > { %8554 = vmatmul.mubr.msk.bf16.gmra.mrb[8].mxu0 %vm450_vm2, %v780_v4  ;;  %v819_v4 = vrot.slane %v10591_v57, 1 }
  0x3d   : > { %8557 = vmatprep.mubr.msk.bf16.mxu0 %vm450_vm2, %v788_v9  ;;  %v346_v9 = vld [vmem:[%s10354_s8 + $0x138] sm:$0xff] }
  0x3e   : > { %v10627_v31 = vpack.c.bf16 %v346_v9, %v345_v8  ;;  %v823_v62 = vor.u32 %v10617_v38, %v819_v4  ;;  %v349_v8 = vld [vmem:[%s10354_s8 + $0x150] sm:$0xff]  ;;  %v350_v9 = vld [vmem:[%s10354_s8 + $0x158] sm:$0xff] }
  0x3f   : > { %8524 = vmatmul.mubr.msk.bf16.gmra.mrb[16].mxu1 %vm450_vm2, %v435_v24  ;;  %v820_v24 = vsel %vm728_vm3, %v815_v3, %v819_v4  ;;  %v835_v3 = vrot.slane %v10625_v44, 1  ;;  %v10661_v21 = vpack.c.bf16 %v350_v9, %v349_v8  ;;  %v851_v9 = vrot.slane %v10659_v22, 1 }
  0x40   : > { %8527 = vmatprep.mubr.msk.bf16.mxu1 %vm450_vm2, %v437_v7  ;;  %13301 = vst [vmem:[#allocation33_spill] sm:$0xff] %v10627_v31  ;;  %v827_v7 = vrot.slane %v10610_v26, 1 }
  0x41   : > { %13307 = vst [vmem:[#allocation39_spill] sm:$0xff] %v10661_v21 }
  0x42   : > { %v831_v1 = vor.u32 %v10622_v41, %v827_v7 }
  0x44   : > { %8558 = vmatmul.mubr.msk.bf16.gmra.mrb[12].mxu0 %vm450_vm2, %v796_v52  ;;  %v10630_v52 = vpack.c.bf16 %v348_v32, %v347_v30  ;;  %v351_v32 = vld [vmem:[%s10354_s8 + $0x160] sm:$0xff]  ;;  %v836_v45 = vsel %vm728_vm3, %v831_v1, %v835_v3 }
  0x45   : > { %8561 = vmatprep.mubr.msk.bf16.mxu0 %vm450_vm2, %v804_v18  ;;  %v442_v18 = vrot.slane %v10627_v31, 1 }
  0x46   : > { %13302 = vst [vmem:[#allocation34_spill] sm:$0xff] %v10630_v52  ;;  %v444_v63 = vrot.slane %v10630_v52, 1 }
  0x47   : > { %8528 = vmatmul.mubr.msk.bf16.gmra.mrb[20].mxu1 %vm450_vm2, %v439_v27  ;;  %v10644_v27 = vshll.u32 %v10549_v15, 16  ;;  %v443_v30 = vsel %vm406_vm1, %v440_v2, %v442_v18  ;;  %v10689_v15 = vshll.u32 %v10596_v61, 16 }
  0x48   : > { %8531 = vmatprep.mubr.msk.bf16.mxu1 %vm450_vm2, %v441_v33  ;;  %v828_v33 = vsel %vm728_vm3, %v823_v62, %v827_v7  ;;  %v445_v4 = vsel %vm406_vm1, %v442_v18, %v444_v63  ;;  %v446_v18 = vrot.slane %v10661_v21, 1 }
  0x49   : > { %13303 = vst [vmem:[#allocation35_spill] sm:$0xff] %v10644_v27  ;;  %v843_v7 = vrot.slane %v10644_v27, 1  ;;  %13311 = vst [vmem:[#allocation43_spill] sm:$0xff] %v10689_v15 }
  0x4b   : > { %v847_v8 = vor.u32 %v10656_v50, %v843_v7 }
  0x4c   : > { %8562 = vmatmul.mubr.msk.bf16.gmra.mrb[16].mxu0 %vm450_vm2, %v812_v37  ;;  %v352_v37 = vld [vmem:[%s10354_s8 + $0x168] sm:$0xff] }
  0x4d   : > { %8565 = vmatprep.mubr.msk.bf16.mxu0 %vm450_vm2, %v820_v24  ;;  %v10651_v24 = vshrl.u32 %v10518_v51, 16  ;;  %v10664_v2 = vpack.c.bf16 %v352_v37, %v351_v32  ;;  %v447_v32 = vsel %vm406_vm1, %v444_v63, %v446_v18 }
  0x4f   : > { %13304 = vst [vmem:[#allocation36_spill] sm:$0xff] %v10651_v24  ;;  %8532 = vmatmul.mubr.msk.bf16.gmra.mrb[24].mxu1 %vm450_vm2, %v443_v30  ;;  %v839_v62 = vor.u32 %v10651_v24, %v835_v3  ;;  %v448_v1 = vrot.slane %v10664_v2, 1  ;;  %v10676_v30 = vshll.u32 %v10593_v58, 16  ;;  %v852_v3 = vsel %vm728_vm3, %v847_v8, %v851_v9 }
  0x50   : > { %8535 = vmatprep.mubr.msk.bf16.mxu1 %vm450_vm2, %v445_v4  ;;  %v10686_v4 = vshrl.u32 %v10593_v58, 16  ;;  %v10700_v8 = vshll.u32 %v10627_v31, 16 }
  0x51   : > { %13308 = vst [vmem:[#allocation40_spill] sm:$0xff] %v10676_v30  ;;  %v844_v37 = vsel %vm728_vm3, %v839_v62, %v843_v7  ;;  %v859_v63 = vrot.slane %v10676_v30, 1  ;;  %v867_v62 = vrot.slane %v10689_v15, 1 }
  0x52   : > { %13310 = vst [vmem:[#allocation42_spill] sm:$0xff] %v10686_v4  ;;  %13312 = vst [vmem:[#allocation44_spill] sm:$0xff] %v10700_v8 }
  0x54   : > { %8566 = vmatmul.mubr.msk.bf16.gmra.mrb[20].mxu0 %vm450_vm2, %v828_v33  ;;  %v10681_v33 = vshrl.u32 %v10552_v17, 16  ;;  %v10725_v17 = vshrl.u32 %v10630_v52, 16 }
  0x55   : > { %8569 = vmatprep.mubr.msk.bf16.mxu0 %vm450_vm2, %v836_v45  ;;  %v449_v45 = vsel %vm406_vm1, %v446_v18, %v448_v1  ;;  %v863_v18 = vor.u32 %v10686_v4, %v859_v63 }
  0x56   : > { %13309 = vst [vmem:[#allocation41_spill] sm:$0xff] %v10681_v33  ;;  %v855_v7 = vor.u32 %v10681_v33, %v851_v9  ;;  %v875_v9 = vrot.slane %v10700_v8, 1  ;;  %13317 = vst [vmem:[#allocation49_spill] sm:$0xff] %v10725_v17 }
  0x57   : > { %8536 = vmatmul.mubr.msk.bf16.gmra.mrb[28].mxu1 %vm450_vm2, %v447_v32  ;;  %v10704_v32 = vshrl.u32 %v10596_v61, 16 }
  0x58   : > { %8539 = vmatprep.mubr.msk.bf16.mxu1 %vm450_vm2, %v449_v45  ;;  %v860_v58 = vsel %vm728_vm3, %v855_v7, %v859_v63  ;;  %v10708_v45 = vshrl.u32 %v10627_v31, 16  ;;  %v10721_v31 = vshll.u32 %v10661_v21, 16 }
  0x59   : > { %13313 = vst [vmem:[#allocation45_spill] sm:$0xff] %v10704_v32  ;;  %v871_v63 = vor.u32 %v10704_v32, %v867_v62 }
  0x5a   : > { %13314 = vst [vmem:[#allocation46_spill] sm:$0xff] %v10708_v45  ;;  %v879_v7 = vor.u32 %v10708_v45, %v875_v9  ;;  %13316 = vst [vmem:[#allocation48_spill] sm:$0xff] %v10721_v31 }
  0x5b   : > { %v876_v61 = vsel %vm728_vm3, %v871_v63, %v875_v9 }
  0x5c   : > { %8570 = vmatmul.mubr.msk.bf16.gmra.mrb[24].mxu0 %vm450_vm2, %v844_v37  ;;  %v868_v37 = vsel %vm728_vm3, %v863_v18, %v867_v62  ;;  %v891_v62 = vrot.slane %v10721_v31, 1 }
  0x5d   : > { %8573 = vmatprep.mubr.msk.bf16.mxu0 %vm450_vm2, %v852_v3  ;;  %v10711_v3 = vshll.u32 %v10630_v52, 16  ;;  %v1186_v52 = vrot.slane %v10420_v47, 1 }
  0x5f   : > { %13315 = vst [vmem:[#allocation47_spill] sm:$0xff] %v10711_v3  ;;  %8540 = vmatmul.mubr.msk.bf16.gmra.mrb[32].mxu1 %vm450_vm2, %v448_v1  ;;  %v883_v18 = vrot.slane %v10711_v3, 1  ;;  %v10729_v1 = vshrl.u32 %v10661_v21, 16 }
  0x61   : > { %13318 = vst [vmem:[#allocation50_spill] sm:$0xff] %v10729_v1  ;;  %v887_v51 = vor.u32 %v10725_v17, %v883_v18  ;;  %v895_v9 = vor.u32 %v10729_v1, %v891_v62 }
  0x64   : > { %8574 = vmatmul.mubr.msk.bf16.gmra.mrb[28].mxu0 %vm450_vm2, %v860_v58  ;;  %v884_v58 = vsel %vm728_vm3, %v879_v7, %v883_v18  ;;  %v892_v7 = vsel %vm728_vm3, %v887_v51, %v891_v62  ;;  %v1188_v18 = vor.u32 %v1187_v60, %v1186_v52  ;;  %v1191_v51 = vrot.slane %v10414_v43, 2 }
  0x65   : > { %8577 = vmatprep.mubr.msk.bf16.mxu0 %vm450_vm2, %v868_v37  ;;  %v10732_v37 = vshll.u32 %v10664_v2, 16  ;;  %v13319_v62 = vor.u32 %v10569_v34, %v10560_v29  ;;  %v1199_v43 = vrot.slane %v10456_v5, 2  ;;  %v1606_v29 = vsel %vm517_vm0, %v10482_v25, 0 }
  0x66   : > { %v1192_v60 = vor.u32 %v1191_v51, %v1190_v59  ;;  %v1206_v51 = vrot.slane %v10510_v46, 1 }
  0x67   : > { %v899_v63 = vrot.slane %v10732_v37, 1 }
  0x68   : > { %v10761_v52 = vsel %vm1182_vm4, %v1188_v18, %v1192_v60 }
  0x69   : > { %v900_v21 = vsel %vm728_vm3, %v895_v9, %v899_v63  ;;  %v1189_v9 = vsel %vm1182_vm4, %v13319_v62, %v1188_v18  ;;  %v1202_v62 = vrot.slane %v10505_v42, 1 }
  0x6c   : > { %8578 = vmatmul.mubr.msk.bf16.gmra.mrb[32].mxu0 %vm450_vm2, %v876_v61  ;;  %v10746_v61 = vshrl.u32 %v10664_v2, 16 }
  0x6d   : > { %8581 = vmatprep.mubr.msk.bf16.mxu0 %vm450_vm2, %v884_v58 }
  0x6e   : > { %v903_v58 = vor.u32 %v10746_v61, %v899_v63  ;;  %v1198_v63 = vrot.slane %v10469_v19, 1 }
  0x70   : > { %v1200_v59 = vor.u32 %v1199_v43, %v1198_v63 }
  0x74   : > { %8582 = vmatmul.mubr.msk.bf16.gmra.mrb[36].mxu0 %vm450_vm2, %v892_v7  ;;  %v1194_v7 = vrot.slane %v10464_v14, 1 }
  0x75   : > { %8585 = vmatprep.mubr.msk.bf16.mxu0 %vm450_vm2, %v900_v21 }
  0x76   : > { %v1196_v21 = vor.u32 %v1195_v28, %v1194_v7  ;;  %v10775_v28 = vld [vmem:[%s13154_s2 + $0x8] sm:$0x3] }
  0x78   : > { %v10768_v34 = vsel %vm1182_vm4, %v1192_v60, %v1196_v21  ;;  %v10784_v18 = vsel %vm1182_vm4, %v1196_v21, %v1200_v59  ;;  %v1210_v60 = vrot.slane %v10539_v6, 1  ;;  %v1219_v6 = vrot.slane %v10547_v13, 2 }
  0x79   : > { %v1226_v13 = vrot.slane %v10617_v38, 1  ;;  %v1235_v38 = vrot.slane %v10625_v44, 2  ;;  %v1242_v44 = vrot.slane %v10681_v33, 1  ;;  %v1250_v33 = vrot.slane %v10704_v32, 1 }
  0x7c   : > { %8586 = vmatmul.mubr.msk.bf16.gmra.mrb[40].mxu0 %vm450_vm2, %v903_v58  ;;  %v1203_v58 = vrot.slane %v10472_v20, 2 }
  0x7d   : > { %8591 = vmatprep.mubr.msk.bf16.mxu0 %vm450_vm2, %v1189_v9  ;;  %v1207_v9 = vrot.slane %v10498_v35, 2 }
  0x7e   : > { %v1204_v25 = vor.u32 %v1203_v58, %v1202_v62  ;;  %v1214_v62 = vrot.slane %v10544_v12, 1  ;;  %v1215_v58 = vrot.slane %v10532_v0, 2 }
  0x7f   : > { %v1208_v43 = vor.u32 %v1207_v9, %v1206_v51 }
  0x80   : > { %v10789_v7 = vsel %vm1182_vm4, %v1200_v59, %v1204_v25  ;;  %v1216_v51 = vor.u32 %v1215_v58, %v1214_v62  ;;  %v1230_v62 = vrot.slane %v10622_v41, 1  ;;  %v1231_v58 = vrot.slane %v10610_v26, 2 }
  0x81   : > { %v10798_v63 = vsel %vm1182_vm4, %v1204_v25, %v1208_v43 }
  0x84   : > { %8592 = vmatmul.mubr.msk.bf16.vlgmr.msra.gmra.mrb[0].mxu0 %vm450_vm2, %v10761_v52 }
  0x85   : > { %8636 = vmatpush3.bf16.msra.mxu0 %v1606_v29  ;;  %8595 = vmatprep.mubr.msk.bf16.mxu0 %vm450_vm2, %v10768_v34  ;;  %v1211_v29 = vrot.slane %v10513_v48, 2  ;;  %v1218_v48 = vrot.slane %v10583_v53, 1  ;;  %v1227_v53 = vrot.slane %v10591_v57, 2  ;;  %v1234_v57 = vrot.slane %v10651_v24, 1 }
  0x86   : > { %9868 = vmatprep.subr.msk.bf16.mxu0 %vm517_vm0, %v10775_v28  ;;  %v1243_v24 = vrot.slane %v10659_v22, 2  ;;  %v1251_v22 = vrot.slane %v10689_v15, 2 }
  0x87   : > { %v1212_v21 = vor.u32 %v1211_v29, %v1210_v60  ;;  %v1220_v25 = vor.u32 %v1219_v6, %v1218_v48  ;;  %v1222_v60 = vrot.slane %v10588_v56, 1  ;;  %v1223_v29 = vrot.slane %v10574_v40, 2 }
  0x88   : > { %v1228_v6 = vor.u32 %v1227_v53, %v1226_v13  ;;  %v1232_v13 = vor.u32 %v1231_v58, %v1230_v62  ;;  %v1236_v53 = vor.u32 %v1235_v38, %v1234_v57  ;;  %v1244_v38 = vor.u32 %v1243_v24, %v1242_v44 }
  0x89   : > { %v10803_v59 = vsel %vm1182_vm4, %v1208_v43, %v1212_v21  ;;  %v10812_v9 = vsel %vm1182_vm4, %v1212_v21, %v1216_v51  ;;  %v10817_v43 = vsel %vm1182_vm4, %v1216_v51, %v1220_v25  ;;  %v1224_v48 = vor.u32 %v1223_v29, %v1222_v60 }
  0x8a   : > { %v1238_v60 = vrot.slane %v10656_v50, 1  ;;  %v1239_v29 = vrot.slane %v10644_v27, 2  ;;  %v1246_v62 = vrot.slane %v10686_v4, 1  ;;  %v1247_v58 = vrot.slane %v10676_v30, 2 }
  0x8b   : > { %v10826_v21 = vsel %vm1182_vm4, %v1220_v25, %v1224_v48  ;;  %v10831_v51 = vsel %vm1182_vm4, %v1224_v48, %v1228_v6  ;;  %v10840_v25 = vsel %vm1182_vm4, %v1228_v6, %v1232_v13  ;;  %v10845_v48 = vsel %vm1182_vm4, %v1232_v13, %v1236_v53 }
  0x8c   : > { %8596 = vmatmul.mubr.msk.bf16.gmra.mrb[4].mxu0 %vm450_vm2, %v10784_v18  ;;  %v1240_v57 = vor.u32 %v1239_v29, %v1238_v60  ;;  %v1248_v27 = vor.u32 %v1247_v58, %v1246_v62  ;;  %v1252_v50 = vor.u32 %v1251_v22, %v1250_v33  ;;  %v1254_v24 = vrot.slane %v10708_v45, 1 }
  0x8d   : > { %8599 = vmatprep.mubr.msk.bf16.mxu0 %vm450_vm2, %v10789_v7  ;;  %v1258_v29 = vrot.slane %v10725_v17, 1  ;;  %v1262_v33 = vrot.slane %v10729_v1, 1  ;;  %v1267_v58 = vrot.slane %v10732_v37, 2 }
  0x8e   : > { %v1241_v6 = vsel %vm1182_vm4, %v1236_v53, %v1240_v57  ;;  %v1245_v13 = vsel %vm1182_vm4, %v1240_v57, %v1244_v38  ;;  %v1249_v44 = vsel %vm1182_vm4, %v1244_v38, %v1248_v27  ;;  %v1255_v53 = vrot.slane %v10700_v8, 2 }
  0x8f   : > { %v1253_v60 = vsel %vm1182_vm4, %v1248_v27, %v1252_v50  ;;  %v1259_v57 = vrot.slane %v10711_v3, 2  ;;  %v1263_v38 = vrot.slane %v10721_v31, 2  ;;  %v1266_v27 = vrot.slane %v10746_v61, 1 }
  0x90   : > { %v1256_v15 = vor.u32 %v1255_v53, %v1254_v24  ;;  %v10889_v53 = vld [vmem:[%s13154_s2 + $0xa] sm:$0x3] }
  0x91   : > { %v1260_v32 = vor.u32 %v1259_v57, %v1258_v29  ;;  %v1264_v3 = vor.u32 %v1263_v38, %v1262_v33  ;;  %v1268_v17 = vor.u32 %v1267_v58, %v1266_v27  ;;  %v354_v29 = vld [vmem:[%s10354_s8 + $0x178] sm:$0xff] }
  0x92   : > { %v1257_v22 = vsel %vm1182_vm4, %v1252_v50, %v1256_v15 }
  0x93   : > { %v1261_v62 = vsel %vm1182_vm4, %v1256_v15, %v1260_v32  ;;  %v1265_v24 = vsel %vm1182_vm4, %v1260_v32, %v1264_v3  ;;  %v1269_v50 = vsel %vm1182_vm4, %v1264_v3, %v1268_v17  ;;  %v1971_v15 = vsel %vm517_vm0, %v10775_v28, 0 }
  0x94   : > { %8600 = vmatmul.mubr.msk.bf16.gmra.mrb[8].mxu0 %vm450_vm2, %v10798_v63 }
  0x95   : > { %8603 = vmatprep.mubr.msk.bf16.mxu0 %vm450_vm2, %v10803_v59 }
  0x9c   : > { %8604 = vmatmul.mubr.msk.bf16.gmra.mrb[12].mxu0 %vm450_vm2, %v10812_v9 }
  0x9d   : > { %8607 = vmatprep.mubr.msk.bf16.mxu0 %vm450_vm2, %v10817_v43 }
  0xa4   : > { %8608 = vmatmul.mubr.msk.bf16.gmra.mrb[16].mxu0 %vm450_vm2, %v10826_v21 }
  0xa5   : > { %8611 = vmatprep.mubr.msk.bf16.mxu0 %vm450_vm2, %v10831_v51 }
  0xac   : > { %8612 = vmatmul.mubr.msk.bf16.gmra.mrb[20].mxu0 %vm450_vm2, %v10840_v25 }
  0xad   : > { %8615 = vmatprep.mubr.msk.bf16.mxu0 %vm450_vm2, %v10845_v48 }
  0xb4   : > { %8616 = vmatmul.mubr.msk.bf16.gmra.mrb[24].mxu0 %vm450_vm2, %v1241_v6 }
  0xb5   : > { %8619 = vmatprep.mubr.msk.bf16.mxu0 %vm450_vm2, %v1245_v13 }
  0xbc   : > { %8620 = vmatmul.mubr.msk.bf16.gmra.mrb[28].mxu0 %vm450_vm2, %v1249_v44 }
  0xbd   : > { %8623 = vmatprep.mubr.msk.bf16.mxu0 %vm450_vm2, %v1253_v60 }
  0xc4   : > { %8624 = vmatmul.mubr.msk.bf16.gmra.mrb[32].mxu0 %vm450_vm2, %v1257_v22 }
  0xc5   : > { %8627 = vmatprep.mubr.msk.bf16.mxu0 %vm450_vm2, %v1261_v62 }
  0xcc   : > { %8628 = vmatmul.mubr.msk.bf16.gmra.mrb[36].mxu0 %vm450_vm2, %v1265_v24 }
  0xcd   : > { %8631 = vmatprep.mubr.msk.bf16.mxu0 %vm450_vm2, %v1269_v50 }
  0xd4   : > { %8632 = vmatmul.mubr.msk.bf16.gmra.mrb[44].mxu0 %vm450_vm2, %v1268_v17 }
  0xd5   : > { %8637 = vmatprep.mubr.msk.bf16.mxu0 %vm450_vm2, %v10761_v52 }
  0xdc   : > { %8638 = vmatmul.mubr.msk.bf16.vlgmr.msra.gmra.mrb[0].mxu0 %vm450_vm2, %v10768_v34 }
  0xdd   : > { %8682 = vmatpush3.bf16.msra.mxu0 %v1971_v15  ;;  %8641 = vmatprep.mubr.msk.bf16.mxu0 %vm450_vm2, %v10784_v18 }
  0xde   : > { %9869 = vmatprep.subr.msk.bf16.mxu0 %vm517_vm0, %v10889_v53 }
  0xe4   : > { %8642 = vmatmul.mubr.msk.bf16.gmra.mrb[4].mxu0 %vm450_vm2, %v10789_v7 }
  0xe5   : > { %8645 = vmatprep.mubr.msk.bf16.mxu0 %vm450_vm2, %v10798_v63 }
  0xec   : > { %8646 = vmatmul.mubr.msk.bf16.gmra.mrb[8].mxu0 %vm450_vm2, %v10803_v59 }
  0xed   : > { %8649 = vmatprep.mubr.msk.bf16.mxu0 %vm450_vm2, %v10812_v9 }
  0xf2   : > { %v10909_v32 = vpop.f32.mrb[0].mxu1 }
  0xf3   : > { %13320 = vst [vmem:[#allocation51_spill] sm:$0xff] %v10909_v32  ;;  %v10911_v3 = vpop.f32.mrb[1].mxu1  ;;  %v2232_v32 = vrot.slane %v10464_v14, 2 }
  0xf4   : > { %8650 = vmatmul.mubr.msk.bf16.gmra.mrb[12].mxu0 %vm450_vm2, %v10817_v43  ;;  %13321 = vst [vmem:[#allocation52_spill] sm:$0xff] %v10911_v3  ;;  %v10913_v52 = vpop.f32.mrb[2].mxu1  ;;  %v13366_v3 = vld [vmem:[#allocation3_spill] sm:$0xff] }
  0xf5   : > { %8653 = vmatprep.mubr.msk.bf16.mxu0 %vm450_vm2, %v10826_v21  ;;  %13322 = vst [vmem:[#allocation53_spill] sm:$0xff] %v10913_v52  ;;  %v10915_v34 = vpop.f32.mrb[3].mxu1 }
  0xf6   : > { %13323 = vst [vmem:[#allocation54_spill] sm:$0xff] %v10915_v34  ;;  %v13365_v34 = vld [vmem:[#allocation2_spill] sm:$0xff] }
  0xf7   : > { %v2226_v52 = vrot.slane %v13365_v34, 3  ;;  %v2237_v34 = vrot.slane %v10456_v5, 3 }
  0xfa   : > { %v10921_v28 = vpop.f32.mrb[4].mxu1 }
  0xfb   : > { %13324 = vst [vmem:[#allocation55_spill] sm:$0xff] %v10921_v28  ;;  %v10923_v18 = vpop.f32.mrb[5].mxu1  ;;  %v2225_v28 = vrot.slane %v10420_v47, 2  ;;  %v2236_v47 = vrot.slane %v10469_v19, 2  ;;  %v13375_v19 = vld [vmem:[#allocation37_spill] sm:$0xff] }
  0xfc   : > { %8654 = vmatmul.mubr.msk.bf16.gmra.mrb[16].mxu0 %vm450_vm2, %v10831_v51  ;;  %13325 = vst [vmem:[#allocation56_spill] sm:$0xff] %v10923_v18  ;;  %v10925_v7 = vpop.f32.mrb[6].mxu1  ;;  %v13364_v18 = vld [vmem:[#allocation39_spill] sm:$0xff] }
  0xfd   : > { %8657 = vmatprep.mubr.msk.bf16.mxu0 %vm450_vm2, %v10840_v25  ;;  %13326 = vst [vmem:[#allocation57_spill] sm:$0xff] %v10925_v7  ;;  %v10927_v63 = vpop.f32.mrb[7].mxu1  ;;  %v353_v25 = vld [vmem:[%s10354_s8 + $0x170] sm:$0xff]  ;;  %v13363_v7 = vld [vmem:[#allocation34_spill] sm:$0xff] }
  0xfe   : > { %13327 = vst [vmem:[#allocation58_spill] sm:$0xff] %v10927_v63  ;;  %v10952_v33 = vpack.c.bf16 %v354_v29, %v353_v25 }
 0x102   : > { %v10932_v59 = vpop.f32.mrb[8].mxu1 }
 0x103   : > { %13328 = vst [vmem:[#allocation59_spill] sm:$0xff] %v10932_v59  ;;  %v10934_v9 = vpop.f32.mrb[9].mxu1 }
 0x104   : > { %8658 = vmatmul.mubr.msk.bf16.gmra.mrb[20].mxu0 %vm450_vm2, %v10845_v48  ;;  %13329 = vst [vmem:[#allocation60_spill] sm:$0xff] %v10934_v9  ;;  %v10936_v43 = vpop.f32.mrb[10].mxu1 }
 0x105   : > { %8661 = vmatprep.mubr.msk.bf16.mxu0 %vm450_vm2, %v1241_v6  ;;  %13330 = vst [vmem:[#allocation61_spill] sm:$0xff] %v10936_v43  ;;  %v10938_v21 = vpop.f32.mrb[11].mxu1 }
 0x106   : > { %13331 = vst [vmem:[#allocation62_spill] sm:$0xff] %v10938_v21 }
 0x10a   : > { %v10942_v51 = vpop.f32.mrb[12].mxu1 }
 0x10b   : > { %13332 = vst [vmem:[#allocation63_spill] sm:$0xff] %v10942_v51  ;;  %v10946_v57 = vpop.f32.mrb[13].mxu1 }
 0x10c   : > { %8662 = vmatmul.mubr.msk.bf16.gmra.mrb[24].mxu0 %vm450_vm2, %v1245_v13  ;;  %13333 = vst [vmem:[#allocation64_spill] sm:$0xff] %v10946_v57  ;;  %v10948_v48 = vpop.f32.mrb[14].mxu1  ;;  %v10957_v13 = vshrl.u32 %v10952_v33, 16  ;;  %v13356_v57 = vld [vmem:[#allocation15_spill] sm:$0xff] }
 0x10d   : > { %8665 = vmatprep.mubr.msk.bf16.mxu0 %vm450_vm2, %v1249_v44  ;;  %13334 = vst [vmem:[#allocation65_spill] sm:$0xff] %v10948_v48  ;;  %v10950_v6 = vpop.f32.mrb[15].mxu1  ;;  %v10960_v44 = vshll.u32 %v10952_v33, 16  ;;  %v13355_v48 = vld [vmem:[#allocation10_spill] sm:$0xff] }
 0x10e   : > { %13335 = vst [vmem:[#allocation66_spill] sm:$0xff] %v10950_v6  ;;  %v1593_v25 = vrot.slane %v10957_v13, 1 }
 0x112   : > { %v10962_v38 = vpop.f32.mrb[16].mxu1 }
 0x113   : > { %13336 = vst [vmem:[#allocation67_spill] sm:$0xff] %v10962_v38  ;;  %v10964_v27 = vpop.f32.mrb[17].mxu1 }
 0x114   : > { %8666 = vmatmul.mubr.msk.bf16.gmra.mrb[28].mxu0 %vm450_vm2, %v1253_v60  ;;  %13337 = vst [vmem:[#allocation68_spill] sm:$0xff] %v10964_v27  ;;  %v10966_v58 = vpop.f32.mrb[18].mxu1  ;;  %v1596_v60 = vrot.slane %v10960_v44, 2 }
 0x115   : > { %8669 = vmatprep.mubr.msk.bf16.mxu0 %vm450_vm2, %v1257_v22  ;;  %13338 = vst [vmem:[#allocation69_spill] sm:$0xff] %v10966_v58  ;;  %v10968_v15 = vpop.f32.mrb[19].mxu1 }
 0x116   : > { %13339 = vst [vmem:[#allocation70_spill] sm:$0xff] %v10968_v15  ;;  %v1597_v22 = vor.u32 %v1596_v60, %v1593_v25  ;;  %v1861_v15 = vrot.slane %v10364_v10, 2  ;;  %v1866_v10 = vrot.slane %v10380_v23, 2 }
 0x118   : > { %v1598_v58 = vsel %vm1182_vm4, %v1268_v17, %v1597_v22  ;;  %v1864_v17 = vrot.slane %v10372_v16, 2 }
 0x11a   : > { %v10974_v29 = vpop.f32.mrb[20].mxu1 }
 0x11b   : > { %13340 = vst [vmem:[#allocation71_spill] sm:$0xff] %v10974_v29  ;;  %v10976_v6 = vpop.f32.mrb[21].mxu1  ;;  %v13354_v29 = vld [vmem:[#allocation9_spill] sm:$0xff] }
 0x11c   : > { %8670 = vmatmul.mubr.msk.bf16.gmra.mrb[32].mxu0 %vm450_vm2, %v1261_v62  ;;  %13341 = vst [vmem:[#allocation72_spill] sm:$0xff] %v10976_v6  ;;  %v10978_v38 = vpop.f32.mrb[22].mxu1  ;;  %v1862_v62 = vrot.slane %v10366_v11, 2 }
 0x11d   : > { %8673 = vmatprep.mubr.msk.bf16.mxu0 %vm450_vm2, %v1265_v24  ;;  %13342 = vst [vmem:[#allocation73_spill] sm:$0xff] %v10978_v38  ;;  %v10980_v27 = vpop.f32.mrb[23].mxu1 }
 0x11e   : > { %13343 = vst [vmem:[#allocation74_spill] sm:$0xff] %v10980_v27  ;;  %v1863_v27 = vsel %vm1860_vm5, %v1861_v15, %v1862_v62  ;;  %v2379_v15 = vsel %vm517_vm0, %v10889_v53, 0 }
 0x122   : > { %v10987_v24 = vpop.f32.mrb[24].mxu1 }
 0x123   : > { %13344 = vst [vmem:[#allocation75_spill] sm:$0xff] %v10987_v24  ;;  %v10989_v25 = vpop.f32.mrb[25].mxu1 }
 0x124   : > { %8674 = vmatmul.mubr.msk.bf16.gmra.mrb[36].mxu0 %vm450_vm2, %v1269_v50  ;;  %13345 = vst [vmem:[#allocation76_spill] sm:$0xff] %v10989_v25  ;;  %v10991_v60 = vpop.f32.mrb[26].mxu1 }
 0x125   : > { %8677 = vmatprep.mubr.msk.bf16.mxu0 %vm450_vm2, %v1598_v58  ;;  %13346 = vst [vmem:[#allocation77_spill] sm:$0xff] %v10991_v60  ;;  %v10993_v38 = vpop.f32.mrb[27].mxu1  ;;  %v1865_v60 = vsel %vm1860_vm5, %v1862_v62, %v1864_v17  ;;  %v1870_v62 = vrot.slane %v10408_v39, 2 }
 0x126   : > { %13347 = vst [vmem:[#allocation78_spill] sm:$0xff] %v10993_v38 }
 0x12a   : > { %v11000_v50 = vpop.f32.mrb[28].mxu1 }
 0x12b   : > { %13348 = vst [vmem:[#allocation79_spill] sm:$0xff] %v11000_v50  ;;  %v11002_v58 = vpop.f32.mrb[29].mxu1 }
 0x12c   : > { %8678 = vmatmul.mubr.msk.bf16.gmra.mrb[48].mxu0 %vm450_vm2, %v1597_v22  ;;  %13349 = vst [vmem:[#allocation80_spill] sm:$0xff] %v11002_v58  ;;  %v11004_v24 = vpop.f32.mrb[30].mxu1  ;;  %v1867_v22 = vsel %vm1860_vm5, %v1864_v17, %v1866_v10 }
 0x12d   : > { %8683 = vmatprep.mubr.msk.bf16.mxu0 %vm450_vm2, %v1863_v27  ;;  %13350 = vst [vmem:[#allocation81_spill] sm:$0xff] %v11004_v24  ;;  %v11007_v25 = vpop.f32.mrb[31].mxu1  ;;  %v11015_v27 = vld [vmem:[%s13154_s2 + $0xc] sm:$0x3]  ;;  %v1868_v24 = vrot.slane %v10402_v36, 2 }
 0x12e   : > { %13351 = vst [vmem:[#allocation82_spill] sm:$0xff] %v11007_v25 }
 0x12f   : > { %v1869_v58 = vsel %vm1860_vm5, %v1866_v10, %v1868_v24  ;;  %v1871_v38 = vsel %vm1860_vm5, %v1868_v24, %v1870_v62  ;;  %v13353_v10 = vld [vmem:[#allocation5_spill] sm:$0xff]  ;;  %v1878_v24 = vrot.slane %v13354_v29, 2 }
 0x132   : > { %v8541_v25 = vpop.f32.mrb[32].mxu1 }
 0x133   : > { %v715_v53 = vpop.f32.mrb[33].mxu1 }
 0x134   : > { %8684 = vmatmul.mubr.msk.bf16.vlgmr.msra.gmra.mrb[0].mxu0 %vm450_vm2, %v1865_v60  ;;  %v8542_v17 = vpop.f32.mrb[34].mxu1  ;;  %v1872_v60 = vrot.slane %v10423_v49, 2 }
 0x135   : > { %8728 = vmatpush3.bf16.msra.mxu0 %v2379_v15  ;;  %8687 = vmatprep.mubr.msk.bf16.mxu0 %vm450_vm2, %v1867_v22  ;;  %v718_v50 = vpop.f32.mrb[35].mxu1  ;;  %v13352_v15 = vld [vmem:[#allocation4_spill] sm:$0xff]  ;;  %v1876_v17 = vrot.slane %v13353_v10, 2 }
 0x136   : > { %9870 = vmatprep.subr.msk.bf16.mxu0 %vm517_vm0, %v11015_v27  ;;  %v1874_v22 = vrot.slane %v13352_v15, 2  ;;  %v1873_v25 = vsel %vm1860_vm5, %v1870_v62, %v1872_v60  ;;  %v1880_v62 = vrot.slane %v13355_v48, 2 }
 0x138   : > { %v1875_v6 = vsel %vm1860_vm5, %v1872_v60, %v1874_v22  ;;  %v1882_v60 = vrot.slane %v13356_v57, 2  ;;  %v1881_v43 = vsel %vm1860_vm5, %v1878_v24, %v1880_v62 }
 0x13c   : > { %8688 = vmatmul.mubr.msk.bf16.gmra.mrb[4].mxu0 %vm450_vm2, %v1869_v58  ;;  %v1877_v58 = vsel %vm1860_vm5, %v1874_v22, %v1876_v17  ;;  %v1883_v22 = vsel %vm1860_vm5, %v1880_v62, %v1882_v60 }
 0x13d   : > { %8691 = vmatprep.mubr.msk.bf16.mxu0 %vm450_vm2, %v1871_v38  ;;  %v1879_v38 = vsel %vm1860_vm5, %v1876_v17, %v1878_v24  ;;  %v13357_v17 = vld [vmem:[#allocation16_spill] sm:$0xff]  ;;  %v13359_v24 = vld [vmem:[#allocation22_spill] sm:$0xff] }
 0x13e   : > { %v1888_v62 = vrot.slane %v13359_v24, 2 }
 0x144   : > { %8692 = vmatmul.mubr.msk.bf16.gmra.mrb[8].mxu0 %vm450_vm2, %v1873_v25 }
 0x145   : > { %8695 = vmatprep.mubr.msk.bf16.mxu0 %vm450_vm2, %v1875_v6 }
 0x14c   : > { %8696 = vmatmul.mubr.msk.bf16.gmra.mrb[12].mxu0 %vm450_vm2, %v1877_v58  ;;  %v1884_v58 = vrot.slane %v13357_v17, 2 }
 0x14d   : > { %8699 = vmatprep.mubr.msk.bf16.mxu0 %vm450_vm2, %v1879_v38  ;;  %v13358_v38 = vld [vmem:[#allocation21_spill] sm:$0xff] }
 0x14e   : > { %v1886_v63 = vrot.slane %v13358_v38, 2 }
 0x14f   : > { %v8587_v51 = vpop.f32.mrb[40].mxu0 }
 0x150   : > { %v1167_v25 = vpop.f32.mrb[41].mxu0  ;;  %v1885_v51 = vsel %vm1860_vm5, %v1882_v60, %v1884_v58 }
 0x151   : > { %v11041_v21 = vadd.f32 %v1167_v25, %v715_v53  ;;  %v8588_v6 = vpop.f32.mrb[42].mxu0  ;;  %v1887_v53 = vsel %vm1860_vm5, %v1884_v58, %v1886_v63 }
 0x152   : > { %v1170_v9 = vpop.f32.mrb[43].mxu0  ;;  %v13361_v6 = vld [vmem:[#allocation28_spill] sm:$0xff] }
 0x153   : > { %v11045_v59 = vadd.f32 %v1170_v9, %v718_v50  ;;  %v13360_v9 = vld [vmem:[#allocation27_spill] sm:$0xff]  ;;  %v1892_v60 = vrot.slane %v13361_v6, 2 }
 0x154   : > { %8700 = vmatmul.mubr.msk.bf16.gmra.mrb[16].mxu0 %vm450_vm2, %v1881_v43  ;;  %v1890_v50 = vrot.slane %v13360_v9, 2  ;;  %v1889_v43 = vsel %vm1860_vm5, %v1886_v63, %v1888_v62  ;;  %v1896_v63 = vrot.slane %v13363_v7, 2 }
 0x155   : > { %8703 = vmatprep.mubr.msk.bf16.mxu0 %vm450_vm2, %v1883_v22  ;;  %v13362_v22 = vld [vmem:[#allocation33_spill] sm:$0xff] }
 0x156   : > { %v1891_v25 = vsel %vm1860_vm5, %v1888_v62, %v1890_v50  ;;  %v1894_v58 = vrot.slane %v13362_v22, 2  ;;  %v1898_v62 = vrot.slane %v13364_v18, 2 }
 0x15c   : > { %8704 = vmatmul.mubr.msk.bf16.gmra.mrb[20].mxu0 %vm450_vm2, %v1885_v51  ;;  %v1893_v51 = vsel %vm1860_vm5, %v1890_v50, %v1892_v60  ;;  %v1900_v50 = vrot.slane %v10664_v2, 2 }
 0x15d   : > { %8707 = vmatprep.mubr.msk.bf16.mxu0 %vm450_vm2, %v1887_v53  ;;  %v1895_v53 = vsel %vm1860_vm5, %v1892_v60, %v1894_v58  ;;  %v1902_v60 = vrot.slane %v10952_v33, 2 }
 0x164   : > { %8708 = vmatmul.mubr.msk.bf16.gmra.mrb[24].mxu0 %vm450_vm2, %v1889_v43  ;;  %v1897_v43 = vsel %vm1860_vm5, %v1894_v58, %v1896_v63  ;;  %v2228_v58 = vrot.slane %v10430_v54, 2 }
 0x165   : > { %8711 = vmatprep.mubr.msk.bf16.mxu0 %vm450_vm2, %v1891_v25  ;;  %v1899_v25 = vsel %vm1860_vm5, %v1896_v63, %v1898_v62  ;;  %v2229_v63 = vrot.slane %v13366_v3, 3  ;;  %v2238_v3 = vor.u32 %v2237_v34, %v2236_v47  ;;  %v13368_v34 = vld [vmem:[#allocation14_spill] sm:$0xff] }
 0x16c   : > { %8712 = vmatmul.mubr.msk.bf16.gmra.mrb[28].mxu0 %vm450_vm2, %v1893_v51  ;;  %v1901_v51 = vsel %vm1860_vm5, %v1898_v62, %v1900_v50  ;;  %v2233_v62 = vrot.slane %v10433_v55, 3 }
 0x16d   : > { %8715 = vmatprep.mubr.msk.bf16.mxu0 %vm450_vm2, %v1895_v53  ;;  %v1903_v53 = vsel %vm1860_vm5, %v1900_v50, %v1902_v60 }
 0x174   : > { %8716 = vmatmul.mubr.msk.bf16.gmra.mrb[32].mxu0 %vm450_vm2, %v1897_v43  ;;  %v2227_v43 = vor.u32 %v2226_v52, %v2225_v28  ;;  %v2240_v28 = vrot.slane %v10505_v42, 2 }
 0x175   : > { %8719 = vmatprep.mubr.msk.bf16.mxu0 %vm450_vm2, %v1899_v25  ;;  %v2230_v25 = vor.u32 %v2229_v63, %v2228_v58  ;;  %v2648_v58 = vsel %vm517_vm0, %v11015_v27, 0 }
 0x177   : > { %v2231_v50 = vsel %vm2224_vm6, %v2227_v43, %v2230_v25  ;;  %v2244_v43 = vrot.slane %v10510_v46, 2  ;;  %v2253_v46 = vrot.slane %v10532_v0, 3  ;;  %v2260_v0 = vrot.slane %v10588_v56, 2 }
 0x178   : > { %v2269_v56 = vrot.slane %v10610_v26, 3  ;;  %v13374_v26 = vld [vmem:[#allocation32_spill] sm:$0xff] }
 0x17c   : > { %8720 = vmatmul.mubr.msk.bf16.gmra.mrb[36].mxu0 %vm450_vm2, %v1901_v51  ;;  %v2234_v51 = vor.u32 %v2233_v62, %v2232_v32  ;;  %v11105_v32 = vld [vmem:[%s13154_s2 + $0xe] sm:$0x3] }
 0x17d   : > { %8723 = vmatprep.mubr.msk.bf16.mxu0 %vm450_vm2, %v1903_v53  ;;  %v2241_v53 = vrot.slane %v10472_v20, 3  ;;  %v2273_v20 = vrot.slane %v13374_v26, 3 }
 0x17e   : > { %v11091_v52 = vsel %vm2224_vm6, %v2230_v25, %v2234_v51  ;;  %v11098_v63 = vsel %vm2224_vm6, %v2234_v51, %v2238_v3  ;;  %v2249_v51 = vrot.slane %v13368_v34, 3  ;;  %v13370_v34 = vld [vmem:[#allocation20_spill] sm:$0xff] }
 0x17f   : > { %v2242_v27 = vor.u32 %v2241_v53, %v2240_v28 }
 0x181   : > { %v11114_v62 = vsel %vm2224_vm6, %v2238_v3, %v2242_v27 }
 0x184   : > { %8724 = vmatmul.mubr.msk.bf16.gmra.mrb[52].mxu0 %vm450_vm2, %v1902_v60  ;;  %v2245_v60 = vrot.slane %v10498_v35, 3 }
 0x185   : > { %8729 = vmatprep.mubr.msk.bf16.mxu0 %vm450_vm2, %v2231_v50  ;;  %v13367_v50 = vld [vmem:[#allocation18_spill] sm:$0xff] }
 0x186   : > { %v2246_v25 = vor.u32 %v2245_v60, %v2244_v43  ;;  %v2248_v47 = vrot.slane %v13367_v50, 2  ;;  %v13369_v43 = vld [vmem:[#allocation24_spill] sm:$0xff] }
 0x187   : > { %v2256_v60 = vrot.slane %v13369_v43, 2 }
 0x188   : > { %v11119_v35 = vsel %vm2224_vm6, %v2242_v27, %v2246_v25  ;;  %v2250_v28 = vor.u32 %v2249_v51, %v2248_v47  ;;  %v2257_v27 = vrot.slane %v13370_v34, 3  ;;  %v13371_v51 = vld [vmem:[#allocation30_spill] sm:$0xff] }
 0x189   : > { %v13372_v34 = vld [vmem:[#allocation26_spill] sm:$0xff] }
 0x18a   : > { %v11128_v53 = vsel %vm2224_vm6, %v2246_v25, %v2250_v28 }
 0x18c   : > { %8730 = vmatmul.mubr.msk.bf16.vlgmr.msra.gmra.mrb[0].mxu0 %vm450_vm2, %v11091_v52 }
 0x18d   : > { %8774 = vmatpush3.bf16.msra.mxu0 %v2648_v58  ;;  %8733 = vmatprep.mubr.msk.bf16.mxu0 %vm450_vm2, %v11098_v63  ;;  %v2252_v58 = vrot.slane %v10544_v12, 2  ;;  %v2261_v12 = vrot.slane %v10574_v40, 3  ;;  %v2268_v40 = vrot.slane %v10622_v41, 2  ;;  %v13373_v41 = vld [vmem:[#allocation36_spill] sm:$0xff] }
 0x18e   : > { %9871 = vmatprep.subr.msk.bf16.mxu0 %vm517_vm0, %v11105_v32 }
 0x18f   : > { %v2254_v3 = vor.u32 %v2253_v46, %v2252_v58  ;;  %v2258_v46 = vor.u32 %v2257_v27, %v2256_v60  ;;  %v2262_v25 = vor.u32 %v2261_v12, %v2260_v0  ;;  %v2264_v58 = vrot.slane %v13371_v51, 2 }
 0x190   : > { %v2270_v12 = vor.u32 %v2269_v56, %v2268_v40  ;;  %v2272_v51 = vrot.slane %v13373_v41, 2  ;;  %v13376_v40 = vld [vmem:[#allocation35_spill] sm:$0xff] }
 0x191   : > { %v11133_v50 = vsel %vm2224_vm6, %v2250_v28, %v2254_v3  ;;  %v11142_v47 = vsel %vm2224_vm6, %v2254_v3, %v2258_v46  ;;  %v2265_v28 = vrot.slane %v13372_v34, 3  ;;  %v11147_v43 = vsel %vm2224_vm6, %v2258_v46, %v2262_v25 }
 0x192   : > { %v2277_v56 = vrot.slane %v13376_v40, 3 }
 0x193   : > { %v2266_v0 = vor.u32 %v2265_v28, %v2264_v58  ;;  %v2276_v58 = vrot.slane %v13375_v19, 2 }
 0x194   : > { %8734 = vmatmul.mubr.msk.bf16.gmra.mrb[4].mxu0 %vm450_vm2, %v11114_v62 }
 0x195   : > { %8737 = vmatprep.mubr.msk.bf16.mxu0 %vm450_vm2, %v11119_v35  ;;  %v11159_v46 = vsel %vm2224_vm6, %v2262_v25, %v2266_v0  ;;  %v11164_v5 = vsel %vm2224_vm6, %v2266_v0, %v2270_v12  ;;  %v13377_v0 = vld [vmem:[#allocation41_spill] sm:$0xff] }
 0x19c   : > { %8738 = vmatmul.mubr.msk.bf16.gmra.mrb[8].mxu0 %vm450_vm2, %v11128_v53 }
 0x19d   : > { %8741 = vmatprep.mubr.msk.bf16.mxu0 %vm450_vm2, %v11133_v50 }
 0x1a4   : > { %8742 = vmatmul.mubr.msk.bf16.gmra.mrb[12].mxu0 %vm450_vm2, %v11142_v47 }
 0x1a5   : > { %8745 = vmatprep.mubr.msk.bf16.mxu0 %vm450_vm2, %v11147_v43 }
 0x1a7   : > { %v8633_v3 = vpop.f32.mrb[44].mxu0 }
 0x1a8   : > { %v1533_v60 = vpop.f32.mrb[45].mxu0  ;;  %v2280_v3 = vrot.slane %v13377_v0, 2 }
 0x1a9   : > { %v11156_v27 = vadd.f32 %v1533_v60, %v11041_v21  ;;  %v8634_v34 = vpop.f32.mrb[46].mxu0  ;;  %v2274_v21 = vor.u32 %v2273_v20, %v2272_v51  ;;  %v13378_v60 = vld [vmem:[#allocation38_spill] sm:$0xff] }
 0x1aa   : > { %v1536_v42 = vpop.f32.mrb[47].mxu0  ;;  %v2278_v34 = vor.u32 %v2277_v56, %v2276_v58  ;;  %v2281_v19 = vrot.slane %v13378_v60, 3  ;;  %v13379_v58 = vld [vmem:[#allocation45_spill] sm:$0xff]  ;;  %v13380_v60 = vld [vmem:[#allocation43_spill] sm:$0xff] }
 0x1ab   : > { %v11169_v28 = vadd.f32 %v1536_v42, %v11045_v59  ;;  %v11176_v25 = vsel %vm2224_vm6, %v2270_v12, %v2274_v21  ;;  %v2284_v42 = vrot.slane %v10686_v4, 2  ;;  %v2285_v59 = vrot.slane %v10676_v30, 3 }
 0x1ac   : > { %8746 = vmatmul.mubr.msk.bf16.gmra.mrb[16].mxu0 %vm450_vm2, %v11159_v46  ;;  %v11181_v40 = vsel %vm2224_vm6, %v2274_v21, %v2278_v34  ;;  %v2282_v20 = vor.u32 %v2281_v19, %v2280_v3  ;;  %v2288_v56 = vrot.slane %v13379_v58, 2  ;;  %v2289_v0 = vrot.slane %v13380_v60, 3  ;;  %v13381_v3 = vld [vmem:[#allocation49_spill] sm:$0xff] }
 0x1ad   : > { %8749 = vmatprep.mubr.msk.bf16.mxu0 %vm450_vm2, %v11164_v5  ;;  %v2286_v51 = vor.u32 %v2285_v59, %v2284_v42  ;;  %v2292_v4 = vrot.slane %v10708_v45, 2  ;;  %v2293_v30 = vrot.slane %v10700_v8, 3  ;;  %v13382_v42 = vld [vmem:[#allocation47_spill] sm:$0xff]  ;;  %v2301_v45 = vrot.slane %v10721_v31, 3 }
 0x1ae   : > { %v2283_v12 = vsel %vm2224_vm6, %v2278_v34, %v2282_v20  ;;  %v2290_v26 = vor.u32 %v2289_v0, %v2288_v56  ;;  %v2296_v34 = vrot.slane %v13381_v3, 2  ;;  %v2297_v59 = vrot.slane %v13382_v42, 3 }
 0x1af   : > { %v2287_v21 = vsel %vm2224_vm6, %v2282_v20, %v2286_v51  ;;  %v2294_v41 = vor.u32 %v2293_v30, %v2292_v4  ;;  %v2300_v20 = vrot.slane %v10729_v1, 2  ;;  %v2304_v4 = vrot.slane %v10746_v61, 2 }
 0x1b0   : > { %v2291_v19 = vsel %vm2224_vm6, %v2286_v51, %v2290_v26  ;;  %v2298_v8 = vor.u32 %v2297_v59, %v2296_v34  ;;  %v2305_v0 = vrot.slane %v10732_v37, 3  ;;  %v2309_v56 = vrot.slane %v10960_v44, 3  ;;  %v7844_v34 = vld [vmem:[%s13154_s2 + $0x10] sm:$0x3] }
 0x1b1   : > { %v2295_v60 = vsel %vm2224_vm6, %v2290_v26, %v2294_v41  ;;  %v2302_v58 = vor.u32 %v2301_v45, %v2300_v20  ;;  %v2308_v26 = vrot.slane %v10957_v13, 2  ;;  %v3421_v59 = vsel %vm517_vm0, %v7844_v34, 0 }
 0x1b2   : > { %v2299_v30 = vsel %vm2224_vm6, %v2294_v41, %v2298_v8  ;;  %v2306_v31 = vor.u32 %v2305_v0, %v2304_v4  ;;  %v2912_v4 = vrot.slane %v10423_v49, 3  ;;  %v4020_v0 = vld [vmem:[%s13153_s1 + $0x28] sm:$0xff]  ;;  %v4021_v49 = vld [vmem:[%s13153_s1 + $0x30] sm:$0xff] }
 0x1b3   : > { %v2303_v51 = vsel %vm2224_vm6, %v2298_v8, %v2302_v58  ;;  %v2310_v1 = vor.u32 %v2309_v56, %v2308_v26  ;;  %v3013_v8 = vsel %vm517_vm0, %v11105_v32, 0 }
 0x1b4   : > { %8750 = vmatmul.mubr.msk.bf16.gmra.mrb[20].mxu0 %vm450_vm2, %v11176_v25  ;;  %v2307_v45 = vsel %vm2224_vm6, %v2302_v58, %v2306_v31  ;;  %v4017_v58 = vld [vmem:[%s13153_s1 + $0x10] sm:$0xff] }
 0x1b5   : > { %8753 = vmatprep.mubr.msk.bf16.mxu0 %vm450_vm2, %v11181_v40  ;;  %v2311_v41 = vsel %vm2224_vm6, %v2306_v31, %v2310_v1 }
 0x1bc   : > { %8754 = vmatmul.mubr.msk.bf16.gmra.mrb[24].mxu0 %vm450_vm2, %v2283_v12 }
 0x1bd   : > { %8757 = vmatprep.mubr.msk.bf16.mxu0 %vm450_vm2, %v2287_v21 }
 0x1c4   : > { %8758 = vmatmul.mubr.msk.bf16.gmra.mrb[28].mxu0 %vm450_vm2, %v2291_v19 }
 0x1c5   : > { %8761 = vmatprep.mubr.msk.bf16.mxu0 %vm450_vm2, %v2295_v60 }
 0x1cc   : > { %8762 = vmatmul.mubr.msk.bf16.gmra.mrb[32].mxu0 %vm450_vm2, %v2299_v30 }
 0x1cd   : > { %8765 = vmatprep.mubr.msk.bf16.mxu0 %vm450_vm2, %v2303_v51 }
 0x1d4   : > { %8766 = vmatmul.mubr.msk.bf16.gmra.mrb[36].mxu0 %vm450_vm2, %v2307_v45 }
 0x1d5   : > { %8769 = vmatprep.mubr.msk.bf16.mxu0 %vm450_vm2, %v2311_v41 }
 0x1dc   : > { %8770 = vmatmul.mubr.msk.bf16.gmra.mrb[56].mxu0 %vm450_vm2, %v2310_v1 }
 0x1dd   : > { %8775 = vmatprep.mubr.msk.bf16.mxu0 %vm450_vm2, %v11091_v52 }
 0x1e4   : > { %8776 = vmatmul.mubr.msk.bf16.vlgmr.msra.gmra.mrb[0].mxu0 %vm450_vm2, %v11098_v63 }
 0x1e5   : > { %8820 = vmatpush3.bf16.msra.mxu0 %v3013_v8  ;;  %8779 = vmatprep.mubr.msk.bf16.mxu0 %vm450_vm2, %v11114_v62  ;;  %v4024_v8 = vld [vmem:[%s13153_s1 + $0x48] sm:$0xff] }
 0x1e6   : > { %9872 = vmatprep.subr.msk.bf16.mxu0 %vm517_vm0, %v7844_v34  ;;  %v4023_v34 = vld [vmem:[%s13153_s1 + $0x40] sm:$0xff] }
 0x1ec   : > { %8780 = vmatmul.mubr.msk.bf16.gmra.mrb[4].mxu0 %vm450_vm2, %v11119_v35 }
 0x1ed   : > { %8783 = vmatprep.mubr.msk.bf16.mxu0 %vm450_vm2, %v11128_v53  ;;  %v356_v53 = vld [vmem:[%s10354_s8 + $0x188] sm:$0xff] }
 0x1f4   : > { %8784 = vmatmul.mubr.msk.bf16.gmra.mrb[8].mxu0 %vm450_vm2, %v11133_v50  ;;  %v355_v50 = vld [vmem:[%s10354_s8 + $0x180] sm:$0xff] }
 0x1f5   : > { %8787 = vmatprep.mubr.msk.bf16.mxu0 %vm450_vm2, %v11142_v47 }
 0x1fc   : > { %8788 = vmatmul.mubr.msk.bf16.gmra.mrb[12].mxu0 %vm450_vm2, %v11147_v43  ;;  %v11259_v43 = vpack.c.bf16 %v356_v53, %v355_v50  ;;  %v4028_v50 = vld [vmem:[%s13153_s1 + $0x68] sm:$0xff]  ;;  %v4027_v53 = vld [vmem:[%s13153_s1 + $0x60] sm:$0xff] }
 0x1fd   : > { %8791 = vmatprep.mubr.msk.bf16.mxu0 %vm450_vm2, %v11159_v46 }
 0x1fe   : > { %v2636_v47 = vshll.u32 %v11259_v43, 16 }
 0x1ff   : > { %v8679_v31 = vpop.f32.mrb[48].mxu0 }
 0x200   : > { %v1802_v52 = vpop.f32.mrb[49].mxu0  ;;  %v2638_v46 = vrot.slane %v2636_v47, 3 }
 0x201   : > { %v11243_v35 = vadd.f32 %v1802_v52, %v11156_v27  ;;  %v8680_v63 = vpop.f32.mrb[50].mxu0 }
 0x202   : > { %v1805_v32 = vpop.f32.mrb[51].mxu0  ;;  %v2918_v63 = vrot.slane %v13354_v29, 3  ;;  %v4029_v29 = vld [vmem:[%s13153_s1 + $0x70] sm:$0xff] }
 0x203   : > { %v11246_v62 = vadd.f32 %v1805_v32, %v11169_v28  ;;  %v2920_v32 = vrot.slane %v13355_v48, 3  ;;  %v4030_v48 = vld [vmem:[%s13153_s1 + $0x78] sm:$0xff] }
 0x204   : > { %8792 = vmatmul.mubr.msk.bf16.gmra.mrb[16].mxu0 %vm450_vm2, %v11164_v5  ;;  %v2633_v5 = vshrl.u32 %v11259_v43, 16 }
 0x205   : > { %8795 = vmatprep.mubr.msk.bf16.mxu0 %vm450_vm2, %v11176_v25  ;;  %v2903_v25 = vrot.slane %v10366_v11, 3  ;;  %v10284_v11 = vmov 0  }
 0x206   : > { %v2635_v27 = vrot.slane %v2633_v5, 2  ;;  %9910 = vset.pattern.permute.xlu1 %v10284_v11  ;;  %9909 = vset.pattern.permute.xlu0 %v10284_v11 }
 0x207   : > { %4069 = vperm.xlu1 %9910, %v4017_v58  }
 0x20c   : > { %8796 = vmatmul.mubr.msk.bf16.gmra.mrb[20].mxu0 %vm450_vm2, %v11181_v40  ;;  %v2639_v40 = vor.u32 %v2638_v46, %v2635_v27  ;;  %v2921_v46 = vsel %vm2902_vm7, %v2918_v63, %v2920_v32 }
 0x20d   : > { %8799 = vmatprep.mubr.msk.bf16.mxu0 %vm450_vm2, %v2283_v12 }
 0x20e   : > { %v2640_v28 = vsel %vm2224_vm6, %v2310_v1, %v2639_v40  ;;  %v4015_v1 = vld [vmem:[%s13153_s1] sm:$0xff] }
 0x20f   : > { %4059 = vperm.xlu0 %9909, %v4015_v1  }
 0x214   : > { %8800 = vmatmul.mubr.msk.bf16.gmra.mrb[24].mxu0 %vm450_vm2, %v2287_v21  ;;  %v2906_v21 = vrot.slane %v10380_v23, 3  ;;  %v4016_v23 = vld [vmem:[%s13153_s1 + $0x8] sm:$0xff] }
 0x215   : > { %8803 = vmatprep.mubr.msk.bf16.mxu0 %vm450_vm2, %v2291_v19  ;;  %4064 = vperm.xlu0 %9909, %v4016_v23  }
 0x21c   : > { %8804 = vmatmul.mubr.msk.bf16.gmra.mrb[28].mxu0 %vm450_vm2, %v2295_v60  ;;  %v2904_v60 = vrot.slane %v10372_v16, 3  ;;  %v2908_v16 = vrot.slane %v10402_v36, 3  ;;  %v2910_v36 = vrot.slane %v10408_v39, 3  ;;  %v4022_v39 = vld [vmem:[%s13153_s1 + $0x38] sm:$0xff] }
 0x21d   : > { %8807 = vmatprep.mubr.msk.bf16.mxu0 %vm450_vm2, %v2299_v30  ;;  %v4018_v30 = vld [vmem:[%s13153_s1 + $0x18] sm:$0xff] }
 0x21e   : > { %v2905_v12 = vsel %vm2902_vm7, %v2903_v25, %v2904_v60  ;;  %v2907_v19 = vsel %vm2902_vm7, %v2904_v60, %v2906_v21  ;;  %v2909_v20 = vsel %vm2902_vm7, %v2906_v21, %v2908_v16  ;;  %4074 = vperm.xlu1 %9910, %v4018_v30   ;;  %v2911_v26 = vsel %vm2902_vm7, %v2908_v16, %v2910_v36  ;;  %v4032_v60 = vld [vmem:[%s13153_s1 + $0x88] sm:$0xff]  ;;  %v4035_v30 = vld [vmem:[%s13153_s1 + $0xa0] sm:$0xff] }
 0x21f   : > { %v2913_v56 = vsel %vm2902_vm7, %v2910_v36, %v2912_v4 }
 0x222   : > { %4084 = vperm.xlu1 %9910, %v4020_v0   ;;  %v2932_v0 = vrot.slane %v13361_v6, 3  ;;  %v4041_v6 = vld [vmem:[%s13153_s1 + $0xd0] sm:$0xff] }
 0x224   : > { %8808 = vmatmul.mubr.msk.bf16.gmra.mrb[32].mxu0 %vm450_vm2, %v2303_v51  ;;  %v4019_v51 = vld [vmem:[%s13153_s1 + $0x20] sm:$0xff] }
 0x225   : > { %8811 = vmatprep.mubr.msk.bf16.mxu0 %vm450_vm2, %v2307_v45  ;;  %4079 = vperm.xlu0 %9909, %v4019_v51   ;;  %v2914_v45 = vrot.slane %v13352_v15, 3  ;;  %v4026_v15 = vld [vmem:[%s13153_s1 + $0x58] sm:$0xff]  ;;  %v4040_v51 = vld [vmem:[%s13153_s1 + $0xc8] sm:$0xff] }
 0x226   : > { %4094 = vperm.xlu1 %9910, %v4022_v39  }
 0x227   : > { %v2915_v31 = vsel %vm2902_vm7, %v2912_v4, %v2914_v45  ;;  %v2930_v4 = vrot.slane %v13360_v9, 3  ;;  %v4042_v9 = vld [vmem:[%s13153_s1 + $0xd8] sm:$0xff] }
 0x229   : > { %4089 = vperm.xlu0 %9909, %v4021_v49   ;;  %v2933_v39 = vsel %vm2902_vm7, %v2930_v4, %v2932_v0  ;;  %v2934_v49 = vrot.slane %v13362_v22, 3  ;;  %v4045_v22 = vld [vmem:[%s13153_s1 + $0xf0] sm:$0xff] }
 0x22a   : > { %4104 = vperm.xlu1 %9910, %v4024_v8   ;;  %v4043_v8 = vld [vmem:[%s13153_s1 + $0xe0] sm:$0xff] }
 0x22c   : > { %8812 = vmatmul.mubr.msk.bf16.gmra.mrb[36].mxu0 %vm450_vm2, %v2311_v41  ;;  %v2916_v41 = vrot.slane %v13353_v10, 3  ;;  %v4025_v10 = vld [vmem:[%s13153_s1 + $0x50] sm:$0xff] }
 0x22d   : > { %8815 = vmatprep.mubr.msk.bf16.mxu0 %vm450_vm2, %v2640_v28  ;;  %4099 = vperm.xlu0 %9909, %v4023_v34   ;;  %v2924_v28 = vrot.slane %v13357_v17, 3  ;;  %v2935_v34 = vsel %vm2902_vm7, %v2932_v0, %v2934_v49 }
 0x22e   : > { %v2917_v52 = vsel %vm2902_vm7, %v2914_v45, %v2916_v41  ;;  %4114 = vperm.xlu1 %9910, %v4026_v15   ;;  %v2919_v27 = vsel %vm2902_vm7, %v2916_v41, %v2918_v63  ;;  %v2936_v45 = vrot.slane %v13363_v7, 3  ;;  %v4044_v41 = vld [vmem:[%s13153_s1 + $0xe8] sm:$0xff]  ;;  %v4046_v7 = vld [vmem:[%s13153_s1 + $0xf8] sm:$0xff]  ;;  %v2940_v15 = vrot.slane %v10664_v2, 3  ;;  %v4047_v63 = vld [vmem:[%s13153_s1 + $0x100] sm:$0xff] }
 0x22f   : > { %v4050_v2 = vld [vmem:[%s13153_s1 + $0x118] sm:$0xff] }
 0x231   : > { %4109 = vperm.xlu0 %9909, %v4025_v10   ;;  %v4048_v10 = vld [vmem:[%s13153_s1 + $0x108] sm:$0xff] }
 0x232   : > { %4124 = vperm.xlu1 %9910, %v4028_v50  }
 0x234   : > { %8816 = vmatmul.mubr.msk.bf16.gmra.mrb[60].mxu0 %vm450_vm2, %v2639_v40  ;;  %v2922_v40 = vrot.slane %v13356_v57, 3 }
 0x235   : > { %8821 = vmatprep.mubr.msk.bf16.mxu0 %vm450_vm2, %v2905_v12  ;;  %4119 = vperm.xlu0 %9909, %v4027_v53   ;;  %v4031_v12 = vld [vmem:[%s13153_s1 + $0x80] sm:$0xff]  ;;  %v2942_v53 = vrot.slane %v10952_v33, 3 }
 0x236   : > { %4134 = vperm.xlu1 %9910, %v4030_v48   ;;  %v2923_v57 = vsel %vm2902_vm7, %v2920_v32, %v2922_v40  ;;  %v2925_v17 = vsel %vm2902_vm7, %v2922_v40, %v2924_v28  ;;  %v4051_v48 = vld [vmem:[%s13153_s1 + $0x120] sm:$0xff] }
 0x239   : > { %4129 = vperm.xlu0 %9909, %v4029_v29   ;;  %v2943_v29 = vsel %vm2902_vm7, %v2940_v15, %v2942_v53 }
 0x23a   : > { %4144 = vperm.xlu1 %9910, %v4032_v60   ;;  %v3270_v60 = vrot.slane %v10464_v14, 3 }
 0x23c   : > { %8822 = vmatmul.mubr.msk.bf16.vlgmr.msra.gmra.mrb[0].mxu0 %vm450_vm2, %v2907_v19  ;;  %v4034_v19 = vld [vmem:[%s13153_s1 + $0x98] sm:$0xff] }
 0x23d   : > { %8866 = vmatpush3.bf16.msra.mxu0 %v3421_v59  ;;  %8825 = vmatprep.mubr.msk.bf16.mxu0 %vm450_vm2, %v2909_v20  ;;  %v2926_v59 = vrot.slane %v13358_v38, 3  ;;  %v2928_v20 = vrot.slane %v13359_v24, 3  ;;  %v4038_v38 = vld [vmem:[%s13153_s1 + $0xb8] sm:$0xff]  ;;  %v4037_v24 = vld [vmem:[%s13153_s1 + $0xb0] sm:$0xff] }
 0x23e   : > { %4139 = vperm.xlu0 %9909, %v4031_v12   ;;  %4154 = vperm.xlu1 %9910, %v4034_v19   ;;  %v3271_v12 = vrot.slane %v10433_v55, 4  ;;  %v13384_v55 = vld [vmem:[#allocation7_spill] sm:$0xff] }
 0x23f   : > { %v2927_v23 = vsel %vm2902_vm7, %v2924_v28, %v2926_v59  ;;  %v2929_v36 = vsel %vm2902_vm7, %v2926_v59, %v2928_v20  ;;  %v3267_v28 = vrot.slane %v10430_v54, 3  ;;  %v3274_v14 = vrot.slane %v13384_v55, 3 }
 0x244   : > { %8826 = vmatmul.mubr.msk.bf16.gmra.mrb[4].mxu0 %vm450_vm2, %v2911_v26  ;;  %v4039_v26 = vld [vmem:[%s13153_s1 + $0xc0] sm:$0xff] }
 0x245   : > { %8829 = vmatprep.mubr.msk.bf16.mxu0 %vm450_vm2, %v2913_v56  ;;  %v2931_v56 = vsel %vm2902_vm7, %v2928_v20, %v2930_v4  ;;  %v13387_v20 = vld [vmem:[#allocation8_spill] sm:$0xff] }
 0x24c   : > { %8830 = vmatmul.mubr.msk.bf16.gmra.mrb[8].mxu0 %vm450_vm2, %v2915_v31  ;;  %v2937_v31 = vsel %vm2902_vm7, %v2934_v49, %v2936_v45 }
 0x24d   : > { %8833 = vmatprep.mubr.msk.bf16.mxu0 %vm450_vm2, %v2917_v52  ;;  %v2938_v52 = vrot.slane %v13364_v18, 3  ;;  %v4049_v18 = vld [vmem:[%s13153_s1 + $0x110] sm:$0xff] }
 0x24f   : > { %v2939_v32 = vsel %vm2902_vm7, %v2936_v45, %v2938_v52  ;;  %v2941_v50 = vsel %vm2902_vm7, %v2938_v52, %v2940_v15  ;;  %v13391_v45 = vld [vmem:[#allocation14_spill] sm:$0xff]  ;;  %v13393_v52 = vld [vmem:[#allocation17_spill] sm:$0xff] }
 0x250   : > { %v3291_v15 = vrot.slane %v13393_v52, 4  ;;  %v13409_v52 = vld [vmem:[#allocation40_spill] sm:$0xff] }
 0x254   : > { %8834 = vmatmul.mubr.msk.bf16.gmra.mrb[12].mxu0 %vm450_vm2, %v2919_v27  ;;  %v2944_v27 = vrot.slane %v11259_v43, 3 }
 0x255   : > { %8837 = vmatprep.mubr.msk.bf16.mxu0 %vm450_vm2, %v2921_v46  ;;  %v4052_v46 = vld [vmem:[%s13153_s1 + $0x128] sm:$0xff] }
 0x256   : > { %v2945_v40 = vsel %vm2902_vm7, %v2942_v53, %v2944_v27 }
 0x257   : > { %v8725_v25 = vpop.f32.mrb[52].mxu0 }
 0x258   : > { %v2167_v58 = vpop.f32.mrb[53].mxu0  ;;  %v13383_v25 = vld [vmem:[#allocation3_spill] sm:$0xff] }
 0x259   : > { %v11361_v1 = vadd.f32 %v2167_v58, %v11243_v35  ;;  %v8726_v21 = vpop.f32.mrb[54].mxu0  ;;  %v4033_v35 = vld [vmem:[%s13153_s1 + $0x90] sm:$0xff]  ;;  %v3268_v33 = vrot.slane %v13383_v25, 4  ;;  %v4054_v58 = vld [vmem:[%s13153_s1 + $0x138] sm:$0xff]  ;;  %v13398_v25 = vld [vmem:[#allocation30_spill] sm:$0xff] }
 0x25a   : > { %v2170_v11 = vpop.f32.mrb[55].mxu0  ;;  %4149 = vperm.xlu0 %9909, %v4033_v35   ;;  %v4053_v21 = vld [vmem:[%s13153_s1 + $0x130] sm:$0xff] }
 0x25b   : > { %v11366_v16 = vadd.f32 %v2170_v11, %v11246_v62  ;;  %v4036_v62 = vld [vmem:[%s13153_s1 + $0xa8] sm:$0xff]  ;;  %v3269_v54 = vor.u32 %v3268_v33, %v3267_v28  ;;  %v13385_v11 = vld [vmem:[#allocation6_spill] sm:$0xff]  ;;  %v13386_v35 = vld [vmem:[#allocation12_spill] sm:$0xff]  ;;  %v3302_v33 = vrot.slane %v13398_v25, 3  ;;  %v3335_v25 = vrot.slane %v13382_v42, 4 }
 0x25c   : > { %8838 = vmatmul.mubr.msk.bf16.gmra.mrb[16].mxu0 %vm450_vm2, %v2923_v57  ;;  %4164 = vperm.xlu1 %9910, %v4036_v62   ;;  %v3272_v57 = vor.u32 %v3271_v12, %v3270_v60  ;;  %v3278_v59 = vrot.slane %v13386_v35, 3  ;;  %v3279_v62 = vrot.slane %v13387_v20, 4  ;;  %v13399_v60 = vld [vmem:[#allocation26_spill] sm:$0xff] }
 0x25d   : > { %8841 = vmatprep.mubr.msk.bf16.mxu0 %vm450_vm2, %v2925_v17  ;;  %v3275_v17 = vrot.slane %v13385_v11, 4  ;;  %v3303_v12 = vrot.slane %v13399_v60, 4 }
 0x25e   : > { %4159 = vperm.xlu0 %9909, %v4035_v30   ;;  %v3273_v19 = vsel %vm3266_vm8, %v3269_v54, %v3272_v57  ;;  %v4056_v30 = vld [vmem:[%s13153_s1 + $0x148] sm:$0xff]  ;;  %v3280_v4 = vor.u32 %v3279_v62, %v3278_v59  ;;  %v13403_v59 = vld [vmem:[#allocation32_spill] sm:$0xff] }
 0x25f   : > { %v3311_v20 = vrot.slane %v13403_v59, 4 }
 0x260   : > { %4174 = vperm.xlu1 %9910, %v4038_v38  }
 0x262   : > { %4169 = vperm.xlu0 %9909, %v4037_v24   ;;  %v3276_v24 = vor.u32 %v3275_v17, %v3274_v14  ;;  %v13401_v14 = vld [vmem:[#allocation29_spill] sm:$0xff] }
 0x263   : > { %v3307_v11 = vrot.slane %v13401_v14, 4  ;;  %v3342_v14 = vrot.slane %v10746_v61, 3 }
 0x264   : > { %8842 = vmatmul.mubr.msk.bf16.gmra.mrb[20].mxu0 %vm450_vm2, %v2927_v23  ;;  %4184 = vperm.xlu1 %9910, %v4040_v51   ;;  %v4055_v23 = vld [vmem:[%s13153_s1 + $0x140] sm:$0xff]  ;;  %v3277_v0 = vsel %vm3266_vm8, %v3272_v57, %v3276_v24  ;;  %v13388_v51 = vld [vmem:[#allocation13_spill] sm:$0xff]  ;;  %v13400_v57 = vld [vmem:[#allocation31_spill] sm:$0xff] }
 0x265   : > { %8845 = vmatprep.mubr.msk.bf16.mxu0 %vm450_vm2, %v2929_v36  ;;  %v7910_v36 = vld [vmem:[%s13155_s3 + $0x2] sm:$0x3]  ;;  %v3306_v55 = vrot.slane %v13400_v57, 3 }
 0x266   : > { %4179 = vperm.xlu0 %9909, %v4039_v26   ;;  %9873 = vmatprep.subr.msk.bf16.mxu1 %vm517_vm0, %v7910_v36  ;;  %v4536_v38 = vsel %vm517_vm0, %v7910_v36, 0  ;;  %v3282_v26 = vrot.slane %v13388_v51, 3 }
 0x267   : > { %8912 = vmatpush3.bf16.msra.mxu1 %v4536_v38  ;;  %v3308_v62 = vor.u32 %v3307_v11, %v3306_v55 }
 0x268   : > { %4194 = vperm.xlu1 %9910, %v4042_v9   ;;  %v3281_v9 = vsel %vm3266_vm8, %v3276_v24, %v3280_v4 }
 0x26a   : > { %4189 = vperm.xlu0 %9909, %v4041_v6   ;;  %v13390_v6 = vld [vmem:[#allocation18_spill] sm:$0xff] }
 0x26b   : > { %v3286_v49 = vrot.slane %v13390_v6, 3  ;;  %v13406_v6 = vld [vmem:[#allocation41_spill] sm:$0xff] }
 0x26c   : > { %8846 = vmatmul.mubr.msk.bf16.gmra.mrb[24].mxu0 %vm450_vm2, %v2931_v56  ;;  %4204 = vperm.xlu1 %9910, %v4044_v41   ;;  %v13389_v56 = vld [vmem:[#allocation11_spill] sm:$0xff]  ;;  %v3287_v41 = vrot.slane %v13391_v45, 4  ;;  %v13407_v45 = vld [vmem:[#allocation38_spill] sm:$0xff] }
 0x26d   : > { %8849 = vmatprep.mubr.msk.bf16.mxu0 %vm450_vm2, %v2933_v39  ;;  %v3283_v39 = vrot.slane %v13389_v56, 4 }
 0x26e   : > { %4199 = vperm.xlu0 %9909, %v4043_v8  }
 0x26f   : > { %v3284_v8 = vor.u32 %v3283_v39, %v3282_v26  ;;  %v13405_v26 = vld [vmem:[#allocation35_spill] sm:$0xff] }
 0x270   : > { %4214 = vperm.xlu1 %9910, %v4046_v7   ;;  %v13392_v7 = vld [vmem:[#allocation19_spill] sm:$0xff]  ;;  %v3315_v56 = vrot.slane %v13405_v26, 4 }
 0x272   : > { %4209 = vperm.xlu0 %9909, %v4045_v22   ;;  %v3290_v22 = vrot.slane %v13392_v7, 3  ;;  %v13408_v7 = vld [vmem:[#allocation42_spill] sm:$0xff] }
 0x274   : > { %8850 = vmatmul.mubr.msk.bf16.gmra.mrb[28].mxu0 %vm450_vm2, %v2935_v34  ;;  %4224 = vperm.xlu1 %9910, %v4048_v10   ;;  %v3288_v34 = vor.u32 %v3287_v41, %v3286_v49  ;;  %v3318_v49 = vrot.slane %v13406_v6, 3  ;;  %v3319_v41 = vrot.slane %v13407_v45, 4 }
 0x275   : > { %8853 = vmatprep.mubr.msk.bf16.mxu0 %vm450_vm2, %v2937_v31  ;;  %v3285_v31 = vsel %vm3266_vm8, %v3280_v4, %v3284_v8 }
 0x276   : > { %4219 = vperm.xlu0 %9909, %v4047_v63   ;;  %v3289_v10 = vsel %vm3266_vm8, %v3284_v8, %v3288_v34  ;;  %v13394_v63 = vld [vmem:[#allocation24_spill] sm:$0xff] }
 0x278   : > { %4234 = vperm.xlu1 %9910, %v4050_v2  }
 0x27a   : > { %4229 = vperm.xlu0 %9909, %v4049_v18   ;;  %v3292_v18 = vor.u32 %v3291_v15, %v3290_v22  ;;  %v3322_v22 = vrot.slane %v13408_v7, 3  ;;  %v3323_v15 = vrot.slane %v13409_v52, 4 }
 0x27c   : > { %8854 = vmatmul.mubr.msk.bf16.gmra.mrb[32].mxu0 %vm450_vm2, %v2939_v32  ;;  %4244 = vperm.xlu1 %9910, %v4052_v46   ;;  %v3294_v32 = vrot.slane %v13394_v63, 3  ;;  %v13396_v46 = vld [vmem:[#allocation25_spill] sm:$0xff] }
 0x27d   : > { %8857 = vmatprep.mubr.msk.bf16.mxu0 %vm450_vm2, %v2941_v50  ;;  %v13395_v50 = vld [vmem:[#allocation20_spill] sm:$0xff]  ;;  %v13410_v63 = vld [vmem:[#allocation45_spill] sm:$0xff] }
 0x27e   : > { %4239 = vperm.xlu0 %9909, %v4051_v48   ;;  %v3295_v2 = vrot.slane %v13395_v50, 4  ;;  %v3298_v48 = vrot.slane %v13396_v46, 3  ;;  %v13411_v50 = vld [vmem:[#allocation43_spill] sm:$0xff] }
 0x280   : > { %4254 = vperm.xlu1 %9910, %v4054_v58   ;;  %v3296_v53 = vor.u32 %v3295_v2, %v3294_v32  ;;  %v3326_v32 = vrot.slane %v13410_v63, 3  ;;  %v3327_v2 = vrot.slane %v13411_v50, 4 }
 0x282   : > { %4249 = vperm.xlu0 %9909, %v4053_v21   ;;  %v3297_v28 = vsel %vm3266_vm8, %v3292_v18, %v3296_v53  ;;  %v3304_v21 = vor.u32 %v3303_v12, %v3302_v33 }
 0x284   : > { %8858 = vmatmul.mubr.msk.bf16.gmra.mrb[36].mxu0 %vm450_vm2, %v2943_v29  ;;  %4264 = vperm.xlu1 %9910, %v4056_v30   ;;  %v13397_v29 = vld [vmem:[#allocation23_spill] sm:$0xff]  ;;  %v3309_v4 = vsel %vm3266_vm8, %v3304_v21, %v3308_v62 }
 0x285   : > { %8861 = vmatprep.mubr.msk.bf16.mxu0 %vm450_vm2, %v2945_v40  ;;  %v3299_v40 = vrot.slane %v13397_v29, 4 }
 0x286   : > { %4259 = vperm.xlu0 %9909, %v4055_v23  }
 0x287   : > { %v3300_v58 = vor.u32 %v3299_v40, %v3298_v48  ;;  %v13413_v48 = vld [vmem:[#allocation44_spill] sm:$0xff] }
 0x288   : > { %v3331_v29 = vrot.slane %v13413_v48, 4 }
 0x289   : > { %v3301_v54 = vsel %vm3266_vm8, %v3296_v53, %v3300_v58  ;;  %v3305_v17 = vsel %vm3266_vm8, %v3300_v58, %v3304_v21  ;;  %v13414_v58 = vld [vmem:[#allocation50_spill] sm:$0xff] }
 0x28a   : > { %v3338_v21 = vrot.slane %v13414_v58, 3 }
 0x28c   : > { %8862 = vmatmul.mubr.msk.bf16.gmra.mrb[64].mxu0 %vm450_vm2, %v2944_v27  ;;  %v3293_v27 = vsel %vm3266_vm8, %v3288_v34, %v3292_v18  ;;  %v3320_v34 = vor.u32 %v3319_v41, %v3318_v49  ;;  %v3328_v18 = vor.u32 %v3327_v2, %v3326_v32 }
 0x28d   : > { %8867 = vmatprep.mubr.msk.bf16.mxu0 %vm450_vm2, %v3273_v19  ;;  %v13402_v19 = vld [vmem:[#allocation36_spill] sm:$0xff] }
 0x28e   : > { %v3310_v35 = vrot.slane %v13402_v19, 3  ;;  %v3346_v19 = vrot.slane %v10957_v13, 3  ;;  %v11600_v52 = vpop.permute.xlu0 %4059 }
 0x290   : > { %v3312_v30 = vor.u32 %v3311_v20, %v3310_v35  ;;  %v3347_v35 = vrot.slane %v10960_v44, 4  ;;  %v3350_v20 = vrot.slane %v2633_v5, 3 }
 0x292   : > { %v3348_v61 = vor.u32 %v3347_v35, %v3346_v19 }
 0x294   : > { %8868 = vmatmul.mubr.msk.bf16.vlgmr.msra.gmra.mrb[0].mxu0 %vm450_vm2, %v3277_v0  ;;  %v13404_v0 = vld [vmem:[#allocation37_spill] sm:$0xff] }
 0x295   : > { %8871 = vmatprep.mubr.msk.bf16.mxu0 %vm450_vm2, %v3281_v9  ;;  %v3314_v51 = vrot.slane %v13404_v0, 3  ;;  %v3313_v9 = vsel %vm3266_vm8, %v3308_v62, %v3312_v30 }
 0x29c   : > { %8872 = vmatmul.mubr.msk.bf16.gmra.mrb[4].mxu0 %vm450_vm2, %v3285_v31 }
 0x29d   : > { %8875 = vmatprep.mubr.msk.bf16.mxu0 %vm450_vm2, %v3289_v10 }
 0x2a4   : > { %8876 = vmatmul.mubr.msk.bf16.gmra.mrb[8].mxu0 %vm450_vm2, %v3293_v27  ;;  %v13412_v27 = vld [vmem:[#allocation46_spill] sm:$0xff] }
 0x2a5   : > { %8879 = vmatprep.mubr.msk.bf16.mxu0 %vm450_vm2, %v3297_v28  ;;  %v3330_v46 = vrot.slane %v13412_v27, 3  ;;  %v3334_v28 = vrot.slane %v13381_v3, 3  ;;  %v3343_v3 = vrot.slane %v10732_v37, 4  ;;  %v3351_v37 = vrot.slane %v2636_v47, 4 }
 0x2a7   : > { %v3332_v33 = vor.u32 %v3331_v29, %v3330_v46  ;;  %v3336_v60 = vor.u32 %v3335_v25, %v3334_v28  ;;  %v3344_v11 = vor.u32 %v3343_v3, %v3342_v14  ;;  %v3352_v62 = vor.u32 %v3351_v37, %v3350_v20  ;;  %v11615_v46 = vpop.permute.xlu0 %4064 }
 0x2a9   : > { %v3333_v12 = vsel %vm3266_vm8, %v3328_v18, %v3332_v33  ;;  %v3337_v55 = vsel %vm3266_vm8, %v3332_v33, %v3336_v60  ;;  %v3353_v13 = vsel %vm3266_vm8, %v3348_v61, %v3352_v62 }
 0x2ac   : > { %8880 = vmatmul.mubr.msk.bf16.gmra.mrb[12].mxu0 %vm450_vm2, %v3301_v54  ;;  %v13415_v54 = vld [vmem:[#allocation48_spill] sm:$0xff] }
 0x2ad   : > { %8883 = vmatprep.mubr.msk.bf16.mxu0 %vm450_vm2, %v3305_v17  ;;  %v3339_v57 = vrot.slane %v13415_v54, 4 }
 0x2af   : > { %v8771_v23 = vpop.f32.mrb[56].mxu0  ;;  %v3340_v42 = vor.u32 %v3339_v57, %v3338_v21  ;;  %v13416_v57 = vld [vmem:[#allocation51_spill] sm:$0xff] }
 0x2b0   : > { %v2575_v36 = vpop.f32.mrb[57].mxu0 }
 0x2b1   : > { %v2628_v38 = vadd.f32 %v2575_v36, %v11361_v1  ;;  %v8772_v24 = vpop.f32.mrb[58].mxu0  ;;  %v3316_v1 = vor.u32 %v3315_v56, %v3314_v51  ;;  %v3341_v17 = vsel %vm3266_vm8, %v3336_v60, %v3340_v42  ;;  %v3345_v59 = vsel %vm3266_vm8, %v3340_v42, %v3344_v11  ;;  %v11626_v42 = vpop.permute.xlu0 %4079 }
 0x2b2   : > { %v2578_v39 = vpop.f32.mrb[59].mxu0  ;;  %v11572_v24 = vld [vmem:[%s13155_s3] sm:$0x3] }
 0x2b3   : > { %v2629_v8 = vadd.f32 %v2578_v39, %v11366_v16  ;;  %v3317_v31 = vsel %vm3266_vm8, %v3312_v30, %v3316_v1  ;;  %v3321_v10 = vsel %vm3266_vm8, %v3316_v1, %v3320_v34  ;;  %v3324_v16 = vor.u32 %v3323_v15, %v3322_v22  ;;  %9874 = vmatprep.subr.msk.bf16.mxu1 %vm517_vm0, %v11572_v24 }
 0x2b4   : > { %8884 = vmatmul.mubr.msk.bf16.gmra.mrb[16].mxu0 %vm450_vm2, %v3309_v4  ;;  %v3349_v30 = vsel %vm3266_vm8, %v3344_v11, %v3348_v61  ;;  %v13418_v61 = vld [vmem:[#allocation53_spill] sm:$0xff] }
 0x2b5   : > { %8887 = vmatprep.mubr.msk.bf16.mxu0 %vm450_vm2, %v3313_v9  ;;  %v3325_v53 = vsel %vm3266_vm8, %v3320_v34, %v3324_v16  ;;  %v3329_v40 = vsel %vm3266_vm8, %v3324_v16, %v3328_v18 }
 0x2bc   : > { %8888 = vmatmul.mubr.msk.bf16.gmra.mrb[20].mxu0 %vm450_vm2, %v3317_v31 }
 0x2bd   : > { %8891 = vmatprep.mubr.msk.bf16.mxu0 %vm450_vm2, %v3321_v10  ;;  %v11603_v10 = vpop.permute.xlu1 %4069 }
 0x2c4   : > { %8892 = vmatmul.mubr.msk.bf16.gmra.mrb[24].mxu0 %vm450_vm2, %v3325_v53 }
 0x2c5   : > { %8895 = vmatprep.mubr.msk.bf16.mxu0 %vm450_vm2, %v3329_v40  ;;  %v11621_v40 = vpop.permute.xlu1 %4074 }
 0x2cc   : > { %8896 = vmatmul.mubr.msk.bf16.gmra.mrb[28].mxu0 %vm450_vm2, %v3333_v12 }
 0x2cd   : > { %8899 = vmatprep.mubr.msk.bf16.mxu0 %vm450_vm2, %v3337_v55 }
 0x2d4   : > { %8900 = vmatmul.mubr.msk.bf16.gmra.mrb[32].mxu0 %vm450_vm2, %v3341_v17  ;;  %v13417_v17 = vld [vmem:[#allocation52_spill] sm:$0xff] }
 0x2d5   : > { %8903 = vmatprep.mubr.msk.bf16.mxu0 %vm450_vm2, %v3345_v59  ;;  %v11629_v59 = vpop.permute.xlu1 %4084 }
 0x2dc   : > { %8904 = vmatmul.mubr.msk.bf16.gmra.mrb[36].mxu0 %vm450_vm2, %v3349_v30 }
 0x2dd   : > { %8907 = vmatprep.mubr.msk.bf16.mxu0 %vm450_vm2, %v3353_v13 }
 0x2e4   : > { %8908 = vmatmul.mubr.msk.bf16.gmra.mrb[68].mxu0 %vm450_vm2, %v3352_v62 }
 0x307   : > { %v8817_v44 = vpop.f32.mrb[60].mxu0 }
 0x308   : > { %v2844_v5 = vpop.f32.mrb[61].mxu0  ;;  %v13419_v44 = vld [vmem:[#allocation54_spill] sm:$0xff] }
 0x309   : > { %v2897_v43 = vadd.f32 %v2844_v5, %v2628_v38  ;;  %v8818_v47 = vpop.f32.mrb[62].mxu0  ;;  %v11583_v38 = vld [vmem:[%s13156_s4] ss:$0 sm:$0xff] }
 0x30a   : > { %v2847_v23 = vpop.f32.mrb[63].mxu0 }
 0x30b   : > { %v2898_v36 = vadd.f32 %v2847_v23, %v2629_v8 }
 0x35f   : > { %v8863_v4 = vpop.f32.mrb[64].mxu0 }
 0x360   : > { %v3209_v0 = vpop.f32.mrb[65].mxu0 }
 0x361   : > { %v11576_v51 = vadd.f32 %v3209_v0, %v2897_v43  ;;  %v8864_v26 = vpop.f32.mrb[66].mxu0 }
 0x362   : > { %v3212_v56 = vpop.f32.mrb[67].mxu0 }
 0x363   : > { %v11578_v39 = vadd.f32 %v3212_v56, %v2898_v36  ;;  %v11648_v56 = vpop.permute.xlu0 %4089 }
 0x367   : > { %v8869_v9 = vpop.f32.mrb[0].mxu0 }
 0x368   : > { %v11586_v6 = vadd.f32 %v8869_v9, %v11583_v38  ;;  %v3457_v49 = vpop.f32.mrb[1].mxu0 }
 0x369   : > { %v11589_v45 = vadd.f32 %v11583_v38, %v3457_v49  ;;  %v8870_v41 = vpop.f32.mrb[2].mxu0 }
 0x36a   : > { %v7870_v8 = vmul.f32 -1.442695, %v11586_v6  ;;  %v11593_v1 = vadd.f32 %v8870_v41, %v11583_v38  ;;  %v3460_v34 = vpop.f32.mrb[3].mxu0 }
 0x36b   : > { %v7868_v31 = vmul.f32 -1.442695, %v11589_v45  ;;  %v11597_v7 = vadd.f32 %v11583_v38, %v3460_v34 }
 0x36c   : > { %9911 = vpow2.f32 %v7870_v8  ;;  %v7871_v22 = vmul.f32 -1.442695, %v11593_v1  ;;  %v11650_v8 = vpop.permute.xlu1 %4094 }
 0x36d   : > { %9913 = vpow2.f32 %v7868_v31  ;;  %v7869_v15 = vmul.f32 -1.442695, %v11597_v7  ;;  %v13420_v31 = vld [vmem:[#allocation55_spill] sm:$0xff] }
 0x36e   : > { %9915 = vpow2.f32 %v7871_v22 }
 0x36f   : > { %9917 = vpow2.f32 %v7869_v15  ;;  %v8873_v63 = vpop.f32.mrb[4].mxu0 }
 0x370   : > { %v11606_v32 = vadd.f32 %v8873_v63, %v11583_v38  ;;  %v3473_v50 = vpop.f32.mrb[5].mxu0 }
 0x371   : > { %v11609_v2 = vadd.f32 %v11583_v38, %v3473_v50  ;;  %v8874_v16 = vpop.f32.mrb[6].mxu0 }
 0x372   : > { %v7874_v18 = vmul.f32 -1.442695, %v11606_v32  ;;  %v11613_v53 = vadd.f32 %v8874_v16, %v11583_v38  ;;  %v3476_v27 = vpop.f32.mrb[7].mxu0 }
 0x373   : > { %v7872_v48 = vmul.f32 -1.442695, %v11609_v2  ;;  %v11619_v29 = vadd.f32 %v11583_v38, %v3476_v27 }
 0x374   : > { %9919 = vpow2.f32 %v7874_v18  ;;  %v7875_v28 = vmul.f32 -1.442695, %v11613_v53  ;;  %v13421_v18 = vld [vmem:[#allocation56_spill] sm:$0xff] }
 0x375   : > { %9921 = vpow2.f32 %v7872_v48  ;;  %v7873_v25 = vmul.f32 -1.442695, %v11619_v29 }
 0x376   : > { %v9912_v33 = vpop.eup %9911  ;;  %9923 = vpow2.f32 %v7875_v28 }
 0x377   : > { %v9914_v60 = vpop.eup %9913  ;;  %v3849_v12 = vadd.f32 1.0, %v9912_v33  ;;  %9925 = vpow2.f32 %v7873_v25  ;;  %v8877_v58 = vpop.f32.mrb[8].mxu0  ;;  %v13422_v33 = vld [vmem:[#allocation57_spill] sm:$0xff] }
 0x378   : > { %v9916_v21 = vpop.eup %9915  ;;  %v3847_v54 = vadd.f32 1.0, %v9914_v60  ;;  %v9255_v55 = vadd.f32 %v8877_v58, %v13416_v57  ;;  %v3489_v14 = vpop.f32.mrb[9].mxu0 }
 0x379   : > { %v9918_v3 = vpop.eup %9917  ;;  %9927 = vrcp.f32 %v3849_v12  ;;  %v3850_v11 = vadd.f32 1.0, %v9916_v21  ;;  %v9256_v19 = vadd.f32 %v3489_v14, %v13417_v17  ;;  %v8878_v35 = vpop.f32.mrb[10].mxu0 }
 0x37a   : > { %9929 = vrcp.f32 %v3847_v54  ;;  %v3848_v20 = vadd.f32 1.0, %v9918_v3  ;;  %v11632_v37 = vadd.f32 %v9255_v55, %v11583_v38  ;;  %v9257_v62 = vadd.f32 %v8878_v35, %v13418_v61  ;;  %v3492_v30 = vpop.f32.mrb[11].mxu0  ;;  %v13423_v54 = vld [vmem:[#allocation58_spill] sm:$0xff] }
 0x37b   : > { %9931 = vrcp.f32 %v3850_v11  ;;  %v11636_v13 = vadd.f32 %v9256_v19, %v11583_v38  ;;  %v9258_v5 = vadd.f32 %v3492_v30, %v13419_v44  ;;  %v11668_v19 = vpop.permute.xlu0 %4099  ;;  %v11675_v30 = vpop.permute.xlu1 %4104 }
 0x37c   : > { %9933 = vrcp.f32 %v3848_v20  ;;  %v7878_v43 = vmul.f32 -1.442695, %v11632_v37  ;;  %v11641_v47 = vadd.f32 %v9257_v62, %v11583_v38 }
 0x37d   : > { %v7876_v23 = vmul.f32 -1.442695, %v11636_v13  ;;  %v11645_v36 = vadd.f32 %v9258_v5, %v11583_v38  ;;  %v11681_v5 = vsel %vm517_vm0, %v11572_v24, 0 }
 0x37e   : > { %v9920_v4 = vpop.eup %9919  ;;  %9935 = vpow2.f32 %v7878_v43  ;;  %v7879_v0 = vmul.f32 -1.442695, %v11641_v47 }
 0x37f   : > { %v9922_v26 = vpop.eup %9921  ;;  %v3853_v9 = vadd.f32 1.0, %v9920_v4  ;;  %9937 = vpow2.f32 %v7876_v23  ;;  %v8881_v49 = vpop.f32.mrb[12].mxu0  ;;  %v7877_v16 = vmul.f32 -1.442695, %v11645_v36 }
 0x380   : > { %v9924_v41 = vpop.eup %9923  ;;  %v3851_v34 = vadd.f32 1.0, %v9922_v26  ;;  %9939 = vpow2.f32 %v7879_v0  ;;  %v9259_v22 = vadd.f32 %v8881_v49, %v13420_v31  ;;  %v3505_v15 = vpop.f32.mrb[13].mxu0 }
 0x381   : > { %v9926_v63 = vpop.eup %9925  ;;  %9941 = vrcp.f32 %v3853_v9  ;;  %v3854_v50 = vadd.f32 1.0, %v9924_v41  ;;  %v9260_v27 = vadd.f32 %v3505_v15, %v13421_v18  ;;  %v8882_v48 = vpop.f32.mrb[14].mxu0  ;;  %v13424_v9 = vld [vmem:[#allocation59_spill] sm:$0xff] }
 0x382   : > { %9943 = vrcp.f32 %v3851_v34  ;;  %v3852_v28 = vadd.f32 1.0, %v9926_v63  ;;  %v11656_v25 = vadd.f32 %v9259_v22, %v11583_v38  ;;  %v9261_v60 = vadd.f32 %v8882_v48, %v13422_v33  ;;  %v3508_v12 = vpop.f32.mrb[15].mxu0  ;;  %v11697_v48 = vpop.permute.xlu0 %4109 }
 0x383   : > { %v9928_v58 = vpop.eup %9927  ;;  %9945 = vrcp.f32 %v3854_v50  ;;  %v11660_v21 = vadd.f32 %v9260_v27, %v11583_v38  ;;  %v9262_v57 = vadd.f32 %v3508_v12, %v13423_v54  ;;  %v11704_v12 = vpop.permute.xlu1 %4114 }
 0x384   : > { %v9930_v55 = vpop.eup %9929  ;;  %v3975_v14 = vmul.f32 %v9928_v58, %v11586_v6  ;;  %9947 = vrcp.f32 %v3852_v28  ;;  %v7882_v3 = vmul.f32 -1.442695, %v11656_v25  ;;  %v11666_v11 = vadd.f32 %v9261_v60, %v11583_v38 }
 0x385   : > { %v9932_v17 = vpop.eup %9931  ;;  %v3973_v35 = vmul.f32 %v9930_v55, %v11589_v45  ;;  %9949 = vpow2.f32 %v7877_v16  ;;  %v7880_v20 = vmul.f32 -1.442695, %v11660_v21  ;;  %v11673_v61 = vadd.f32 %v9262_v57, %v11583_v38 }
 0x386   : > { %v9934_v62 = vpop.eup %9933  ;;  %v3976_v6 = vmul.f32 %v9932_v17, %v11593_v1  ;;  %9951 = vpow2.f32 %v7882_v3  ;;  %v7883_v44 = vmul.f32 -1.442695, %v11666_v11  ;;  %v4269_v45 = vmul.f32 %v11603_v10, %v3975_v14  ;;  %v13425_v10 = vld [vmem:[#allocation60_spill] sm:$0xff]  ;;  %v13427_v17 = vld [vmem:[#allocation62_spill] sm:$0xff] }
 0x387   : > { %v3974_v43 = vmul.f32 %v9934_v62, %v11597_v7  ;;  %9953 = vpow2.f32 %v7880_v20  ;;  %v7881_v23 = vmul.f32 -1.442695, %v11673_v61  ;;  %v8885_v4 = vpop.f32.mrb[16].mxu0  ;;  %v4267_v26 = vmul.f32 %v11600_v52, %v3973_v35 }
 0x388   : > { %v9936_v0 = vpop.eup %9935  ;;  %v4270_v1 = vmul.f32 %v11621_v40, %v3976_v6  ;;  %9955 = vpow2.f32 %v7883_v44  ;;  %v9263_v49 = vadd.f32 %v8885_v4, %v13424_v9  ;;  %v3521_v41 = vpop.f32.mrb[17].mxu0  ;;  %v13426_v40 = vld [vmem:[#allocation61_spill] sm:$0xff] }
 0x389   : > { %v9938_v34 = vpop.eup %9937  ;;  %v4268_v24 = vmul.f32 %v11615_v46, %v3974_v43  ;;  %v3857_v31 = vadd.f32 1.0, %v9936_v0  ;;  %9957 = vpow2.f32 %v7881_v23  ;;  %v9264_v7 = vadd.f32 %v3521_v41, %v13425_v10  ;;  %v8886_v22 = vpop.f32.mrb[18].mxu0 }
 0x38a   : > { %v9940_v15 = vpop.eup %9939  ;;  %v11691_v63 = vpack.c.bf16 %v4270_v1, %v4269_v45  ;;  %v3855_v50 = vadd.f32 1.0, %v9938_v34  ;;  %v11694_v52 = vadd.f32 %v9263_v49, %v11583_v38  ;;  %v9265_v16 = vadd.f32 %v8886_v22, %v13426_v40  ;;  %v3524_v18 = vpop.f32.mrb[19].mxu0  ;;  %v13429_v34 = vld [vmem:[#allocation64_spill] sm:$0xff] }
 0x38b   : > { %v9942_v27 = vpop.eup %9941  ;;  %v11699_v28 = vpack.c.bf16 %v4268_v24, %v4267_v26  ;;  %9959 = vrcp.f32 %v3857_v31  ;;  %v3858_v46 = vadd.f32 1.0, %v9940_v15  ;;  %v11702_v33 = vadd.f32 %v9264_v7, %v11583_v38  ;;  %v11724_v49 = vpop.permute.xlu0 %4119 }
 0x38c   : > { %v9944_v60 = vpop.eup %9943  ;;  %v3979_v58 = vmul.f32 %v9942_v27, %v11606_v32  ;;  %9961 = vrcp.f32 %v3855_v50  ;;  %v7886_v54 = vmul.f32 -1.442695, %v11694_v52  ;;  %v11709_v57 = vadd.f32 %v9265_v16, %v11583_v38  ;;  %v11729_v7 = vpop.permute.xlu1 %4124 }
 0x38d   : > { %v9946_v55 = vpop.eup %9945  ;;  %v3977_v14 = vmul.f32 %v9944_v60, %v11609_v2  ;;  %9963 = vrcp.f32 %v3858_v46  ;;  %v7884_v3 = vmul.f32 -1.442695, %v11702_v33  ;;  %v9266_v35 = vadd.f32 %v3524_v18, %v13427_v17  ;;  %v13430_v60 = vld [vmem:[#allocation65_spill] sm:$0xff] }
 0x38e   : > { %v9948_v20 = vpop.eup %9947  ;;  %v4273_v62 = vmul.f32 %v11648_v56, %v3979_v58  ;;  %v3980_v6 = vmul.f32 %v9946_v55, %v11613_v53  ;;  %9965 = vpow2.f32 %v7886_v54  ;;  %v7887_v32 = vmul.f32 -1.442695, %v11709_v57  ;;  %v13428_v56 = vld [vmem:[#allocation63_spill] sm:$0xff] }
 0x38f   : > { %v9950_v44 = vpop.eup %9949  ;;  %v4271_v45 = vmul.f32 %v11626_v42, %v3977_v14  ;;  %v3978_v43 = vmul.f32 %v9948_v20, %v11619_v29  ;;  %9967 = vpow2.f32 %v7884_v3  ;;  %v11720_v2 = vadd.f32 %v9266_v35, %v11583_v38  ;;  %v8889_v23 = vpop.f32.mrb[20].mxu0  ;;  %v13431_v14 = vld [vmem:[#allocation66_spill] sm:$0xff] }
 0x390   : > { %v9952_v4 = vpop.eup %9951  ;;  %v4274_v0 = vmul.f32 %v11650_v8, %v3980_v6  ;;  %v3856_v26 = vadd.f32 1.0, %v9950_v44  ;;  %9969 = vpow2.f32 %v7887_v32  ;;  %v9267_v53 = vadd.f32 %v8889_v23, %v13428_v56  ;;  %v3537_v1 = vpop.f32.mrb[21].mxu0 }
 0x391   : > { %v9954_v9 = vpop.eup %9953  ;;  %v4272_v42 = vmul.f32 %v11629_v59, %v3978_v43  ;;  %v3861_v41 = vadd.f32 1.0, %v9952_v4  ;;  %v7885_v29 = vmul.f32 -1.442695, %v11720_v2  ;;  %v9268_v24 = vadd.f32 %v3537_v1, %v13429_v34  ;;  %v8890_v31 = vpop.f32.mrb[22].mxu0 }
 0x392   : > { %v9956_v10 = vpop.eup %9955  ;;  %v11731_v8 = vpack.c.bf16 %v4274_v0, %v4273_v62  ;;  %9971 = vrcp.f32 %v3856_v26  ;;  %v3859_v22 = vadd.f32 1.0, %v9954_v9  ;;  %v11734_v15 = vadd.f32 %v9267_v53, %v11583_v38  ;;  %v3540_v50 = vpop.f32.mrb[23].mxu0 }
 0x393   : > { %v9958_v40 = vpop.eup %9957  ;;  %v11736_v16 = vpack.c.bf16 %v4272_v42, %v4271_v45  ;;  %9973 = vrcp.f32 %v3861_v41  ;;  %v3862_v59 = vadd.f32 1.0, %v9956_v10  ;;  %v11739_v18 = vadd.f32 %v9268_v24, %v11583_v38  ;;  %v4130_v44 = vpop.permute.xlu0 %4129 }
 0x394   : > { %9975 = vrcp.f32 %v3859_v22  ;;  %v3860_v27 = vadd.f32 1.0, %v9958_v40  ;;  %v7890_v46 = vmul.f32 -1.442695, %v11734_v15  ;;  %v9269_v58 = vadd.f32 %v8890_v31, %v13430_v60  ;;  %v4135_v26 = vpop.permute.xlu1 %4134 }
 0x395   : > { %v9960_v54 = vpop.eup %9959  ;;  %9977 = vrcp.f32 %v3862_v59  ;;  %v7888_v55 = vmul.f32 -1.442695, %v11739_v18  ;;  %v9270_v3 = vadd.f32 %v3540_v50, %v13431_v14  ;;  %v4334_v17 = vshrl.u32 %v11699_v28, 16 }
 0x396   : > { %v9962_v35 = vpop.eup %9961  ;;  %v3983_v20 = vmul.f32 %v9960_v54, %v11632_v37  ;;  %9979 = vrcp.f32 %v3860_v27  ;;  %v11748_v62 = vadd.f32 %v9269_v58, %v11583_v38  ;;  %v4336_v6 = vshll.u32 %v11699_v28, 16  ;;  %v13432_v27 = vld [vmem:[#allocation67_spill] sm:$0xff] }
 0x397   : > { %v9964_v32 = vpop.eup %9963  ;;  %v3981_v45 = vmul.f32 %v9962_v35, %v11636_v13  ;;  %9981 = vpow2.f32 %v7885_v29  ;;  %v11753_v43 = vadd.f32 %v9270_v3, %v11583_v38  ;;  %v13238_v23 = vshll.u32 %v11691_v63, 16  ;;  %v8893_v4 = vpop.f32.mrb[24].mxu0 }
 0x398   : > { %v9966_v0 = vpop.eup %9965  ;;  %v4277_v37 = vmul.f32 %v11697_v48, %v3983_v20  ;;  %v3984_v56 = vmul.f32 %v9964_v32, %v11641_v47  ;;  %9983 = vpow2.f32 %v7890_v46  ;;  %v7891_v53 = vmul.f32 -1.442695, %v11748_v62  ;;  %v3553_v1 = vpop.f32.mrb[25].mxu0 }
 0x399   : > { %v9968_v9 = vpop.eup %9967  ;;  %v4275_v13 = vmul.f32 %v11668_v19, %v3981_v45  ;;  %v3865_v42 = vadd.f32 1.0, %v9966_v0  ;;  %9985 = vpow2.f32 %v7888_v55  ;;  %v7889_v41 = vmul.f32 -1.442695, %v11753_v43  ;;  %v8894_v29 = vpop.f32.mrb[26].mxu0  ;;  %v13433_v55 = vld [vmem:[#allocation68_spill] sm:$0xff]  ;;  %v13434_v0 = vld [vmem:[#allocation69_spill] sm:$0xff] }
 0x39a   : > { %v9970_v34 = vpop.eup %9969  ;;  %v4278_v24 = vmul.f32 %v11704_v12, %v3984_v56  ;;  %v3863_v31 = vadd.f32 1.0, %v9968_v9  ;;  %9987 = vpow2.f32 %v7891_v53  ;;  %v4338_v48 = vrot.slane %v4336_v6, 1  ;;  %v3556_v10 = vpop.f32.mrb[27].mxu0 }
 0x39b   : > { %9989 = vrcp.f32 %v3865_v42  ;;  %v3866_v47 = vadd.f32 1.0, %v9970_v34  ;;  %v4343_v22 = vrot.slane %v13238_v23, 1  ;;  %v13239_v50 = vshrl.u32 %v11691_v63, 16  ;;  %v11768_v12 = vpop.permute.xlu0 %4139  ;;  %v11776_v35 = vpop.permute.xlu1 %4144  ;;  %v13435_v42 = vld [vmem:[#allocation70_spill] sm:$0xff] }
 0x39c   : > { %v9972_v19 = vpop.eup %9971  ;;  %v11765_v40 = vpack.c.bf16 %v4278_v24, %v4277_v37  ;;  %9991 = vrcp.f32 %v3863_v31  ;;  %v4339_v59 = vor.u32 %v4338_v48, %v4334_v17  ;;  %v9271_v46 = vadd.f32 %v8893_v4, %v13432_v27 }
 0x39d   : > { %v9974_v60 = vpop.eup %9973  ;;  %v3982_v58 = vmul.f32 %v9972_v19, %v11645_v36  ;;  %9993 = vrcp.f32 %v3866_v47  ;;  %v11773_v54 = vor.u32 %v13239_v50, %v4343_v22  ;;  %v9272_v14 = vadd.f32 %v3553_v1, %v13433_v55 }
 0x39e   : > { %v9976_v3 = vpop.eup %9975  ;;  %v3987_v20 = vmul.f32 %v9974_v60, %v11656_v25  ;;  %9995 = vpow2.f32 %v7889_v41  ;;  %v4344_v17 = vsel %vm728_vm3, %v4339_v59, %v4343_v22  ;;  %v11781_v6 = vadd.f32 %v9271_v46, %v11583_v38 }
 0x39f   : > { %v9978_v32 = vpop.eup %9977  ;;  %v4276_v36 = vmul.f32 %v11675_v30, %v3982_v58  ;;  %v3985_v45 = vmul.f32 %v9976_v3, %v11660_v21  ;;  %8913 = vmatprep.mubr.msk.bf16.mxu1 %vm450_vm2, %v4344_v17  ;;  %v11787_v4 = vadd.f32 %v9272_v14, %v11583_v38  ;;  %v9273_v37 = vadd.f32 %v8894_v29, %v13434_v0  ;;  %v8897_v56 = vpop.f32.mrb[28].mxu0 }
 0x3a0   : > { %v9980_v25 = vpop.eup %9979  ;;  %v4281_v53 = vmul.f32 %v4130_v44, %v3987_v20  ;;  %v3988_v1 = vmul.f32 %v9978_v32, %v11666_v11  ;;  %v7894_v9 = vmul.f32 -1.442695, %v11781_v6  ;;  %v9274_v41 = vadd.f32 %v3556_v10, %v13435_v42  ;;  %v3569_v34 = vpop.f32.mrb[29].mxu0 }
 0x3a1   : > { %v9982_v30 = vpop.eup %9981  ;;  %v11793_v24 = vpack.c.bf16 %v4276_v36, %v4275_v13  ;;  %v4279_v21 = vmul.f32 %v11724_v49, %v3985_v45  ;;  %v3986_v31 = vmul.f32 %v9980_v25, %v11673_v61  ;;  %v7892_v48 = vmul.f32 -1.442695, %v11787_v4  ;;  %v8898_v29 = vpop.f32.mrb[30].mxu0  ;;  %v13436_v25 = vld [vmem:[#allocation71_spill] sm:$0xff] }
 0x3a2   : > { %v9984_v47 = vpop.eup %9983  ;;  %v4282_v22 = vmul.f32 %v4135_v26, %v3988_v1  ;;  %v3864_v44 = vadd.f32 1.0, %v9982_v30  ;;  %9997 = vpow2.f32 %v7894_v9  ;;  %v11799_v11 = vadd.f32 %v9273_v37, %v11583_v38  ;;  %v3572_v19 = vpop.f32.mrb[31].mxu0 }
 0x3a3   : > { %v9986_v10 = vpop.eup %9985  ;;  %v4150_v59 = vpop.permute.xlu0 %4149  ;;  %v4280_v13 = vmul.f32 %v11729_v7, %v3986_v31  ;;  %v3869_v27 = vadd.f32 1.0, %v9984_v47  ;;  %9999 = vpow2.f32 %v7892_v48  ;;  %v11803_v49 = vadd.f32 %v9274_v41, %v11583_v38 }
 0x3a4   : > { %v9988_v61 = vpop.eup %9987  ;;  %v4155_v46 = vpop.permute.xlu1 %4154  ;;  %v11805_v60 = vpack.c.bf16 %v4282_v22, %v4281_v53  ;;  %10001 = vrcp.f32 %v3864_v44  ;;  %v3867_v26 = vadd.f32 1.0, %v9986_v10  ;;  %v7895_v58 = vmul.f32 -1.442695, %v11799_v11 }
 0x3a5   : > { %v9990_v55 = vpop.eup %9989  ;;  %v11808_v14 = vpack.c.bf16 %v4280_v13, %v4279_v21  ;;  %10003 = vrcp.f32 %v3869_v27  ;;  %v3870_v3 = vadd.f32 1.0, %v9988_v61  ;;  %v7893_v7 = vmul.f32 -1.442695, %v11803_v49  ;;  %v13437_v13 = vld [vmem:[#allocation72_spill] sm:$0xff]  ;;  %v13438_v61 = vld [vmem:[#allocation73_spill] sm:$0xff] }
 0x3a6   : > { %v9992_v20 = vpop.eup %9991  ;;  %v3991_v17 = vmul.f32 %v9990_v55, %v11694_v52  ;;  %10005 = vrcp.f32 %v3867_v26  ;;  %v11813_v32 = vshll.u32 %v11736_v16, 16  ;;  %v11816_v36 = vshrl.u32 %v11736_v16, 16 }
 0x3a7   : > { %v9994_v45 = vpop.eup %9993  ;;  %v3989_v0 = vmul.f32 %v9992_v20, %v11702_v33  ;;  %10007 = vrcp.f32 %v3870_v3  ;;  %v11820_v37 = vshll.u32 %v11731_v8, 16  ;;  %v9275_v53 = vadd.f32 %v8897_v56, %v13436_v25  ;;  %v11823_v1 = vpop.f32.mrb[32].mxu0 }
 0x3a8   : > { %v9996_v9 = vpop.eup %9995  ;;  %v4285_v52 = vmul.f32 %v4150_v59, %v3991_v17  ;;  %v3992_v42 = vmul.f32 %v9994_v45, %v11709_v57  ;;  %10009 = vpow2.f32 %v7895_v58  ;;  %v4351_v41 = vrot.slane %v11813_v32, 1  ;;  %v11827_v30 = vpop.f32.mrb[33].mxu0 }
 0x3a9   : > { %v11829_v21 = vpop.permute.xlu0 %4159  ;;  %v4283_v33 = vmul.f32 %v11768_v12, %v3989_v0  ;;  %v3868_v31 = vadd.f32 1.0, %v9996_v9  ;;  %10011 = vpow2.f32 %v7893_v7  ;;  %v4359_v48 = vrot.slane %v11820_v37, 1  ;;  %v11833_v56 = vpop.f32.mrb[34].mxu0  ;;  %v11848_v12 = vld [vmem:[%s13155_s3 + $0x4] sm:$0x3] }
 0x3aa   : > { %v11835_v47 = vpop.permute.xlu1 %4164  ;;  %v4286_v22 = vmul.f32 %v4155_v46, %v3992_v42  ;;  %v4352_v57 = vsel %vm728_vm3, %v11773_v54, %v4351_v41  ;;  %v4355_v44 = vor.u32 %v11816_v36, %v4351_v41  ;;  %v11841_v10 = vadd.f32 %v9275_v53, %v11583_v38  ;;  %v11843_v59 = vpop.f32.mrb[35].mxu0  ;;  %v13439_v54 = vld [vmem:[#allocation74_spill] sm:$0xff] }
 0x3ab   : > { %10013 = vrcp.f32 %v3868_v31  ;;  %8914 = vmatmul.mubr.msk.bf16.vlgmr.msra.gmra.mrb[36].mxu1 %vm450_vm2, %v4352_v57  ;;  %v9276_v27 = vadd.f32 %v3569_v34, %v13437_v13  ;;  %v9277_v46 = vadd.f32 %v8898_v29, %v13438_v61  ;;  %v9278_v26 = vadd.f32 %v3572_v19, %v13439_v54 }
 0x3ac   : > { %v9998_v58 = vpop.eup %9997  ;;  %v11854_v55 = vpack.c.bf16 %v4286_v22, %v4285_v52  ;;  %v4360_v3 = vsel %vm728_vm3, %v4355_v44, %v4359_v48  ;;  %8950 = vmatpush3.bf16.msra.mxu1 %v11681_v5  ;;  %v7898_v7 = vmul.f32 -1.442695, %v11841_v10  ;;  %v11860_v20 = vshrl.u32 %v11731_v8, 16 }
 0x3ad   : > { %v10000_v17 = vpop.eup %9999  ;;  %v3873_v45 = vadd.f32 1.0, %v9998_v58  ;;  %8917 = vmatprep.mubr.msk.bf16.mxu1 %vm450_vm2, %v4360_v3  ;;  %v11864_v34 = vadd.f32 %v9276_v27, %v11583_v38  ;;  %v11867_v29 = vadd.f32 %v9277_v46, %v11583_v38  ;;  %v11870_v19 = vadd.f32 %v9278_v26, %v11583_v38  ;;  %9875 = vmatprep.subr.msk.bf16.mxu1 %vm517_vm0, %v11848_v12  ;;  %v4170_v52 = vpop.permute.xlu0 %4169 }
 0x3ae   : > { %v10002_v5 = vpop.eup %10001  ;;  %v3871_v0 = vadd.f32 1.0, %v10000_v17  ;;  %10015 = vpow2.f32 %v7898_v7  ;;  %v4363_v25 = vor.u32 %v11860_v20, %v4359_v48  ;;  %v11876_v53 = vshll.u32 %v11793_v24, 16  ;;  %v4175_v44 = vpop.permute.xlu1 %4174 }
 0x3af   : > { %v10004_v9 = vpop.eup %10003  ;;  %v3990_v42 = vmul.f32 %v10002_v5, %v11720_v2  ;;  %10017 = vrcp.f32 %v3873_v45  ;;  %v7896_v41 = vmul.f32 -1.442695, %v11864_v34  ;;  %v7899_v31 = vmul.f32 -1.442695, %v11867_v29  ;;  %v11881_v22 = vpop.f32.mrb[36].mxu0 }
 0x3b0   : > { %13440 = vst [vmem:[#allocation4_spill] sm:$0xff] %v11876_v53  ;;  %v10006_v57 = vpop.eup %10005  ;;  %v3995_v13 = vmul.f32 %v10004_v9, %v11734_v15  ;;  %10019 = vrcp.f32 %v3871_v0  ;;  %v7897_v48 = vmul.f32 -1.442695, %v11870_v19  ;;  %v4367_v27 = vrot.slane %v11876_v53, 1  ;;  %v11886_v61 = vpop.f32.mrb[37].mxu0 }
 0x3b1   : > { %v10008_v46 = vpop.eup %10007  ;;  %v4284_v2 = vmul.f32 %v11776_v35, %v3990_v42  ;;  %v3993_v54 = vmul.f32 %v10006_v57, %v11739_v18  ;;  %10021 = vpow2.f32 %v7896_v41  ;;  %v11891_v26 = vshrl.u32 %v11793_v24, 16  ;;  %v11893_v58 = vpop.f32.mrb[38].mxu0  ;;  %v13443_v57 = vld [vmem:[#allocation76_spill] sm:$0xff] }
 0x3b2   : > { %v10010_v3 = vpop.eup %10009  ;;  %v4289_v15 = vmul.f32 %v4170_v52, %v3995_v13  ;;  %v3996_v7 = vmul.f32 %v10008_v46, %v11748_v62  ;;  %10023 = vpow2.f32 %v7899_v31  ;;  %v4368_v17 = vsel %vm728_vm3, %v4363_v25, %v4367_v27  ;;  %v11897_v45 = vpop.f32.mrb[39].mxu0  ;;  %v13442_v31 = vld [vmem:[#allocation75_spill] sm:$0xff]  ;;  %v13444_v13 = vld [vmem:[#allocation77_spill] sm:$0xff] }
 0x3b3   : > { %v10012_v5 = vpop.eup %10011  ;;  %v11899_v0 = vpack.c.bf16 %v4284_v2, %v4283_v33  ;;  %v4287_v18 = vmul.f32 %v11829_v21, %v3993_v54  ;;  %v3874_v35 = vadd.f32 1.0, %v10010_v3  ;;  %10025 = vpow2.f32 %v7897_v48  ;;  %8918 = vmatmul.mubr.msk.bf16.gmra.mrb[40].mxu1 %vm450_vm2, %v4368_v17  ;;  %v4180_v25 = vpop.permute.xlu0 %4179  ;;  %v13445_v3 = vld [vmem:[#allocation78_spill] sm:$0xff] }
 0x3b4   : > { %v4290_v9 = vmul.f32 %v4175_v44, %v3996_v7  ;;  %v3872_v42 = vadd.f32 1.0, %v10012_v5  ;;  %v4371_v52 = vor.u32 %v11891_v26, %v4367_v27  ;;  %v11905_v62 = vshll.u32 %v11765_v40, 16  ;;  %v11913_v46 = vpop.permute.xlu1 %4184 }
 0x3b5   : > { %v10014_v41 = vpop.eup %10013  ;;  %10027 = vrcp.f32 %v3874_v35  ;;  %v9279_v33 = vadd.f32 %v11823_v1, %v13442_v31  ;;  %v9280_v21 = vadd.f32 %v11827_v30, %v13443_v57  ;;  %v9281_v48 = vadd.f32 %v11833_v56, %v13444_v13 }
 0x3b6   : > { %13441 = vst [vmem:[#allocation5_spill] sm:$0xff] %v11905_v62  ;;  %v11915_v44 = vpack.c.bf16 %v4290_v9, %v4289_v15  ;;  %v3994_v27 = vmul.f32 %v10014_v41, %v11753_v43  ;;  %10029 = vrcp.f32 %v3872_v42  ;;  %v4375_v2 = vrot.slane %v11905_v62, 1 }
 0x3b7   : > { %v11920_v54 = vadd.f32 %v9279_v33, %v11583_v38  ;;  %v11923_v1 = vadd.f32 %v9280_v21, %v11583_v38  ;;  %v11926_v30 = vadd.f32 %v9281_v48, %v11583_v38  ;;  %v9282_v56 = vadd.f32 %v11843_v59, %v13445_v3  ;;  %v8909_v7 = vpop.f32.mrb[68].mxu0 }
 0x3b8   : > { %v10016_v15 = vpop.eup %10015  ;;  %v4288_v17 = vmul.f32 %v11835_v47, %v3994_v27  ;;  %v4376_v43 = vsel %vm728_vm3, %v4371_v52, %v4375_v2  ;;  %v11933_v5 = vshrl.u32 %v11765_v40, 16  ;;  %v11936_v35 = vshll.u32 %v11808_v14, 16  ;;  %v11938_v9 = vpop.f32.mrb[69].mxu0 }
 0x3b9   : > { %v10018_v42 = vpop.eup %10017  ;;  %v3877_v41 = vadd.f32 1.0, %v10016_v15  ;;  %8921 = vmatprep.mubr.msk.bf16.mxu1 %vm450_vm2, %v4376_v43  ;;  %v7902_v59 = vmul.f32 -1.442695, %v11920_v54  ;;  %v7900_v31 = vmul.f32 -1.442695, %v11923_v1  ;;  %v11944_v47 = vadd.f32 %v9282_v56, %v11583_v38  ;;  %v8910_v52 = vpop.f32.mrb[70].mxu0 }
 0x3ba   : > { %13446 = vst [vmem:[#allocation9_spill] sm:$0xff] %v11933_v5  ;;  %13447 = vst [vmem:[#allocation10_spill] sm:$0xff] %v11936_v35  ;;  %v10020_v33 = vpop.eup %10019  ;;  %v11946_v57 = vpack.c.bf16 %v4288_v17, %v4287_v18  ;;  %v3999_v21 = vmul.f32 %v10018_v42, %v11781_v6  ;;  %v7903_v13 = vmul.f32 -1.442695, %v11926_v30  ;;  %v4379_v48 = vor.u32 %v11933_v5, %v4375_v2  ;;  %v11951_v27 = vpop.f32.mrb[71].mxu0 }
 0x3bb   : > { %v10022_v3 = vpop.eup %10021  ;;  %v4190_v7 = vpop.permute.xlu0 %4189  ;;  %v3997_v15 = vmul.f32 %v10020_v33, %v11787_v4  ;;  %10031 = vrcp.f32 %v3877_v41  ;;  %v7901_v56 = vmul.f32 -1.442695, %v11944_v47  ;;  %v4383_v43 = vrot.slane %v11936_v35, 1 }
 0x3bc   : > { %v10024_v52 = vpop.eup %10023  ;;  %v4195_v18 = vpop.permute.xlu1 %4194  ;;  %v4293_v17 = vmul.f32 %v4190_v7, %v3999_v21  ;;  %v3875_v23 = vadd.f32 1.0, %v10022_v3  ;;  %10033 = vpow2.f32 %v7902_v59  ;;  %v11957_v6 = vshrl.u32 %v11808_v14, 16  ;;  %v13450_v59 = vld [vmem:[#allocation79_spill] sm:$0xff]  ;;  %v13451_v7 = vld [vmem:[#allocation80_spill] sm:$0xff] }
 0x3bd   : > { %v10026_v2 = vpop.eup %10025  ;;  %v4291_v42 = vmul.f32 %v4180_v25, %v3997_v15  ;;  %v3878_v50 = vadd.f32 1.0, %v10024_v52  ;;  %10035 = vpow2.f32 %v7900_v31  ;;  %v4384_v62 = vsel %vm728_vm3, %v4379_v48, %v4383_v43  ;;  %v13452_v31 = vld [vmem:[#allocation81_spill] sm:$0xff] }
 0x3be   : > { %13448 = vst [vmem:[#allocation15_spill] sm:$0xff] %v11957_v6  ;;  %10037 = vrcp.f32 %v3875_v23  ;;  %v3876_v4 = vadd.f32 1.0, %v10026_v2  ;;  %8922 = vmatmul.mubr.msk.bf16.gmra.mrb[44].mxu1 %vm450_vm2, %v4384_v62  ;;  %v4387_v41 = vor.u32 %v11957_v6, %v4383_v43  ;;  %v11963_v33 = vshll.u32 %v11805_v60, 16  ;;  %v13453_v43 = vld [vmem:[#allocation82_spill] sm:$0xff] }
 0x3bf   : > { %v10028_v21 = vpop.eup %10027  ;;  %10039 = vrcp.f32 %v3878_v50  ;;  %v9283_v3 = vadd.f32 %v11881_v22, %v13450_v59  ;;  %v9284_v25 = vadd.f32 %v11886_v61, %v13451_v7  ;;  %v9285_v48 = vadd.f32 %v11893_v58, %v13452_v31  ;;  %v4200_v2 = vpop.permute.xlu0 %4199 }
 0x3c0   : > { %13449 = vst [vmem:[#allocation16_spill] sm:$0xff] %v11963_v33  ;;  %v10030_v23 = vpop.eup %10029  ;;  %v4000_v15 = vmul.f32 %v10028_v21, %v11799_v11  ;;  %10041 = vrcp.f32 %v3876_v4  ;;  %v4391_v62 = vrot.slane %v11963_v33, 1  ;;  %v9286_v52 = vadd.f32 %v11897_v45, %v13453_v43  ;;  %v4205_v58 = vpop.permute.xlu1 %4204 }
 0x3c1   : > { %v3998_v50 = vmul.f32 %v10030_v23, %v11803_v49  ;;  %10043 = vpow2.f32 %v7903_v13  ;;  %v11977_v22 = vadd.f32 %v9283_v3, %v11583_v38  ;;  %v11980_v61 = vadd.f32 %v9284_v25, %v11583_v38 }
 0x3c2   : > { %v4294_v59 = vmul.f32 %v4195_v18, %v4000_v15  ;;  %10045 = vpow2.f32 %v7901_v56  ;;  %v4392_v11 = vsel %vm728_vm3, %v4387_v41, %v4391_v62  ;;  %v11984_v4 = vadd.f32 %v9285_v48, %v11583_v38 }
 0x3c3   : > { %v4292_v45 = vmul.f32 %v11913_v46, %v3998_v50  ;;  %8925 = vmatprep.mubr.msk.bf16.mxu1 %vm450_vm2, %v4392_v11  ;;  %v7906_v49 = vmul.f32 -1.442695, %v11977_v22  ;;  %v7904_v13 = vmul.f32 -1.442695, %v11980_v61  ;;  %v11991_v21 = vadd.f32 %v9286_v52, %v11583_v38  ;;  %v4210_v52 = vpop.permute.xlu0 %4209 }
 0x3c4   : > { %v11993_v3 = vpack.c.bf16 %v4294_v59, %v4293_v17  ;;  %v7907_v56 = vmul.f32 -1.442695, %v11984_v4  ;;  %v11997_v18 = vshrl.u32 %v11805_v60, 16  ;;  %v12000_v41 = vshll.u32 %v11899_v0, 16 }
 0x3c5   : > { %v10032_v46 = vpop.eup %10031  ;;  %v12002_v7 = vpack.c.bf16 %v4292_v45, %v4291_v42  ;;  %10047 = vpow2.f32 %v7906_v49  ;;  %v7905_v25 = vmul.f32 -1.442695, %v11991_v21  ;;  %v12006_v31 = vshrl.u32 %v11899_v0, 16  ;;  %v4215_v45 = vpop.permute.xlu1 %4214 }
 0x3c6   : > { %13454 = vst [vmem:[#allocation21_spill] sm:$0xff] %v11997_v18  ;;  %13455 = vst [vmem:[#allocation22_spill] sm:$0xff] %v12000_v41  ;;  %v10034_v48 = vpop.eup %10033  ;;  %v4003_v17 = vmul.f32 %v10032_v46, %v11841_v10  ;;  %10049 = vpow2.f32 %v7904_v13  ;;  %v4395_v23 = vor.u32 %v11997_v18, %v4391_v62  ;;  %v4399_v15 = vrot.slane %v12000_v41, 1 }
 0x3c7   : > { %13456 = vst [vmem:[#allocation27_spill] sm:$0xff] %v12006_v31  ;;  %v10036_v43 = vpop.eup %10035  ;;  %v3881_v50 = vadd.f32 1.0, %v10034_v48  ;;  %10051 = vpow2.f32 %v7907_v56  ;;  %v12012_v42 = vshll.u32 %v11854_v55, 16  ;;  %v3670_v59 = vadd.f32 %v11938_v9, %v11576_v51 }
 0x3c8   : > { %v10038_v11 = vpop.eup %10037  ;;  %v4297_v49 = vmul.f32 %v4210_v52, %v4003_v17  ;;  %v3879_v33 = vadd.f32 1.0, %v10036_v43  ;;  %10053 = vpow2.f32 %v7905_v25  ;;  %v4400_v10 = vsel %vm728_vm3, %v4395_v23, %v4399_v15 }
 0x3c9   : > { %13457 = vst [vmem:[#allocation28_spill] sm:$0xff] %v12012_v42  ;;  %v10040_v62 = vpop.eup %10039  ;;  %v4001_v13 = vmul.f32 %v10038_v11, %v11864_v34  ;;  %10055 = vrcp.f32 %v3881_v50  ;;  %8926 = vmatmul.mubr.msk.bf16.gmra.mrb[48].mxu1 %vm450_vm2, %v4400_v10  ;;  %v4403_v56 = vor.u32 %v12006_v31, %v4399_v15  ;;  %v4407_v46 = vrot.slane %v12012_v42, 1  ;;  %v12043_v10 = vpop.permute.xlu0 %4219 }
 0x3ca   : > { %v10042_v48 = vpop.eup %10041  ;;  %v4004_v51 = vmul.f32 %v10040_v62, %v11867_v29  ;;  %10057 = vrcp.f32 %v3879_v33  ;;  %v12023_v9 = vadd.f32 %v11583_v38, %v3670_v59  ;;  %v3671_v25 = vadd.f32 %v11951_v27, %v11578_v39  ;;  %v12041_v59 = vpop.permute.xlu1 %4224 }
 0x3cb   : > { %v10044_v17 = vpop.eup %10043  ;;  %v4295_v23 = vmul.f32 %v4200_v2, %v4001_v13  ;;  %v4002_v34 = vmul.f32 %v10042_v48, %v11870_v19  ;;  %v4408_v43 = vsel %vm728_vm3, %v4403_v56, %v4407_v46  ;;  %v12030_v15 = vshrl.u32 %v11854_v55, 16 }
 0x3cc   : > { %v10046_v52 = vpop.eup %10045  ;;  %v4298_v50 = vmul.f32 %v4215_v45, %v4004_v51  ;;  %v3882_v11 = vadd.f32 1.0, %v10044_v17  ;;  %8929 = vmatprep.mubr.msk.bf16.mxu1 %vm450_vm2, %v4408_v43  ;;  %v7908_v29 = vmul.f32 -1.442695, %v12023_v9  ;;  %v12035_v33 = vadd.f32 %v11583_v38, %v3671_v25 }
 0x3cd   : > { %13458 = vst [vmem:[#allocation33_spill] sm:$0xff] %v12030_v15  ;;  %v4296_v39 = vmul.f32 %v4205_v58, %v4002_v34  ;;  %v3880_v27 = vadd.f32 1.0, %v10046_v52  ;;  %v4411_v2 = vor.u32 %v12030_v15, %v4407_v46  ;;  %v12039_v19 = vshll.u32 %v11946_v57, 16 }
 0x3ce   : > { %v12045_v45 = vpack.c.bf16 %v4298_v50, %v4297_v49  ;;  %10059 = vrcp.f32 %v3882_v11  ;;  %v7909_v62 = vmul.f32 -1.442695, %v12035_v33  ;;  %v12049_v13 = vshrl.u32 %v11946_v57, 16 }
 0x3cf   : > { %v10048_v38 = vpop.eup %10047  ;;  %v12051_v58 = vpack.c.bf16 %v4296_v39, %v4295_v23  ;;  %10061 = vrcp.f32 %v3880_v27  ;;  %v4415_v56 = vrot.slane %v12039_v19, 1  ;;  %v12055_v46 = vshll.u32 %v11915_v44, 16 }
 0x3d0   : > { %13459 = vst [vmem:[#allocation34_spill] sm:$0xff] %v12045_v45  ;;  %v10050_v48 = vpop.eup %10049  ;;  %v3885_v51 = vadd.f32 1.0, %v10048_v38  ;;  %10063 = vpow2.f32 %v7908_v29  ;;  %v12058_v49 = vshrl.u32 %v11915_v44, 16  ;;  %v12061_v25 = vshll.u32 %v12002_v7, 16 }
 0x3d1   : > { %13460 = vst [vmem:[#allocation39_spill] sm:$0xff] %v12051_v58  ;;  %v10052_v17 = vpop.eup %10051  ;;  %v3883_v34 = vadd.f32 1.0, %v10050_v48  ;;  %10065 = vpow2.f32 %v7909_v62  ;;  %v4416_v23 = vsel %vm728_vm3, %v4411_v2, %v4415_v56  ;;  %v4419_v43 = vor.u32 %v12049_v13, %v4415_v56  ;;  %v4235_v56 = vpop.permute.xlu1 %4234 }
 0x3d2   : > { %v10054_v52 = vpop.eup %10053  ;;  %10067 = vrcp.f32 %v3885_v51  ;;  %v3886_v50 = vadd.f32 1.0, %v10052_v17  ;;  %8930 = vmatmul.mubr.msk.bf16.gmra.mrb[52].mxu1 %vm450_vm2, %v4416_v23  ;;  %v4423_v11 = vrot.slane %v12055_v46, 1  ;;  %v4431_v29 = vrot.slane %v12061_v25, 1  ;;  %v4230_v48 = vpop.permute.xlu0 %4229 }
 0x3d3   : > { %v10056_v39 = vpop.eup %10055  ;;  %10069 = vrcp.f32 %v3883_v34  ;;  %v3884_v27 = vadd.f32 1.0, %v10054_v52  ;;  %v12069_v38 = vshrl.u32 %v12002_v7, 16  ;;  %v12072_v62 = vshll.u32 %v11993_v3, 16 }
 0x3d4   : > { %v10058_v2 = vpop.eup %10057  ;;  %10071 = vrcp.f32 %v3886_v50  ;;  %v4424_v51 = vsel %vm728_vm3, %v4419_v43, %v4423_v11  ;;  %v4427_v17 = vor.u32 %v12058_v49, %v4423_v11  ;;  %v12080_v52 = vshll.u32 %v12051_v58, 16 }
 0x3d5   : > { %10073 = vrcp.f32 %v3884_v27  ;;  %8933 = vmatprep.mubr.msk.bf16.mxu1 %vm450_vm2, %v4424_v51  ;;  %v4435_v34 = vor.u32 %v12069_v38, %v4431_v29  ;;  %v4439_v23 = vrot.slane %v12072_v62, 1  ;;  %v4007_v42 = vmul.f32 %v10056_v39, %v11920_v54  ;;  %v4245_v18 = vpop.permute.xlu1 %4244 }
 0x3d6   : > { %v4432_v15 = vsel %vm728_vm3, %v4427_v17, %v4431_v29  ;;  %v4005_v50 = vmul.f32 %v10058_v2, %v11923_v1  ;;  %v4447_v27 = vrot.slane %v12080_v52, 1  ;;  %v4240_v35 = vpop.permute.xlu0 %4239  ;;  %v12091_v54 = vshrl.u32 %v12051_v58, 16 }
 0x3d7   : > { %v4440_v43 = vsel %vm728_vm3, %v4435_v34, %v4439_v23  ;;  %v12094_v29 = vshll.u32 %v12045_v45, 16  ;;  %v4301_v39 = vmul.f32 %v4230_v48, %v4007_v42 }
 0x3d8   : > { %v10060_v41 = vpop.eup %10059 }
 0x3d9   : > { %v10062_v51 = vpop.eup %10061  ;;  %v4008_v11 = vmul.f32 %v10060_v41, %v11926_v30  ;;  %v12098_v30 = vshrl.u32 %v11993_v3, 16 }
 0x3da   : > { %v10064_v31 = vpop.eup %10063  ;;  %v4006_v6 = vmul.f32 %v10062_v51, %v11944_v47  ;;  %8934 = vmatmul.mubr.msk.bf16.gmra.mrb[56].mxu1 %vm450_vm2, %v4432_v15  ;;  %v4299_v47 = vmul.f32 %v12043_v10, %v4005_v50  ;;  %v4451_v51 = vor.u32 %v12091_v54, %v4447_v27  ;;  %v4455_v10 = vrot.slane %v12094_v29, 1 }
 0x3db   : > { %v10066_v1 = vpop.eup %10065  ;;  %v4302_v2 = vmul.f32 %v4235_v56, %v4008_v11  ;;  %v3887_v17 = vadd.f32 1.0, %v10064_v31  ;;  %8937 = vmatprep.mubr.msk.bf16.mxu1 %vm450_vm2, %v4440_v43  ;;  %v4443_v31 = vor.u32 %v12098_v30, %v4439_v23  ;;  %v4255_v11 = vpop.permute.xlu1 %4254 }
 0x3dc   : > { %v10068_v41 = vpop.eup %10067  ;;  %v4300_v15 = vmul.f32 %v12041_v59, %v4006_v6  ;;  %v3888_v34 = vadd.f32 1.0, %v10066_v1  ;;  %v4250_v1 = vpop.permute.xlu0 %4249 }
 0x3dd   : > { %v10070_v5 = vpop.eup %10069  ;;  %v12103_v53 = vpack.c.bf16 %v4302_v2, %v4301_v39  ;;  %v4011_v42 = vmul.f32 %v10068_v41, %v11977_v22  ;;  %10075 = vrcp.f32 %v3887_v17  ;;  %v4448_v50 = vsel %vm728_vm3, %v4443_v31, %v4447_v27 }
 0x3de   : > { %v10072_v56 = vpop.eup %10071  ;;  %v12107_v48 = vpack.c.bf16 %v4300_v15, %v4299_v47  ;;  %v4009_v43 = vmul.f32 %v10070_v5, %v11980_v61  ;;  %10077 = vrcp.f32 %v3888_v34  ;;  %v4456_v39 = vsel %vm728_vm3, %v4451_v51, %v4455_v10 }
 0x3df   : > { %v10074_v6 = vpop.eup %10073  ;;  %v4012_v59 = vmul.f32 %v10072_v56, %v11984_v4  ;;  %v4305_v2 = vmul.f32 %v4250_v1, %v4011_v42  ;;  %v12119_v5 = vshll.u32 %v12103_v53, 16  ;;  %v12130_v47 = vshrl.u32 %v12045_v45, 16 }
 0x3e0   : > { %13461 = vst [vmem:[#allocation2_spill] sm:$0xff] %v12107_v48  ;;  %v4010_v22 = vmul.f32 %v10074_v6, %v11991_v21  ;;  %v12116_v23 = vshll.u32 %v12107_v48, 16  ;;  %v4303_v61 = vmul.f32 %v4240_v35, %v4009_v43  ;;  %v12124_v27 = vshrl.u32 %v12107_v48, 16 }
 0x3e1   : > { %v4306_v17 = vmul.f32 %v4255_v11, %v4012_v59  ;;  %v4459_v35 = vor.u32 %v12130_v47, %v4455_v10  ;;  %v4260_v11 = vpop.permute.xlu0 %4259  ;;  %v12146_v10 = vshrl.u32 %v12103_v53, 16 }
 0x3e2   : > { %v4304_v41 = vmul.f32 %v4245_v18, %v4010_v22  ;;  %8938 = vmatmul.mubr.msk.bf16.gmra.mrb[60].mxu1 %vm450_vm2, %v4448_v50  ;;  %v4463_v4 = vrot.slane %v12116_v23, 1  ;;  %v4471_v18 = vrot.slane %v12119_v5, 1  ;;  %v4265_v50 = vpop.permute.xlu1 %4264 }
 0x3e3   : > { %v12126_v21 = vpack.c.bf16 %v4306_v17, %v4305_v2  ;;  %8941 = vmatprep.mubr.msk.bf16.mxu1 %vm450_vm2, %v4456_v39 }
 0x3e4   : > { %v12132_v15 = vpack.c.bf16 %v4304_v41, %v4303_v61  ;;  %v4467_v34 = vor.u32 %v12124_v27, %v4463_v4  ;;  %v4464_v31 = vsel %vm728_vm3, %v4459_v35, %v4463_v4  ;;  %v5520_v4 = vrot.slane %v12049_v13, 1 }
 0x3e5   : > { %v5524_v35 = vrot.slane %v12058_v49, 1 }
 0x3e6   : > { %v12138_v51 = vshll.u32 %v12132_v15, 16  ;;  %v4472_v6 = vsel %vm728_vm3, %v4467_v34, %v4471_v18  ;;  %v13262_v2 = vrot.slane %v12132_v15, 1  ;;  %v5521_v34 = vrot.slane %v12039_v19, 2 }
 0x3e7   : > { %v10076_v42 = vpop.eup %10075 }
 0x3e8   : > { %v10078_v56 = vpop.eup %10077  ;;  %v4013_v43 = vmul.f32 %v10076_v42, %v12023_v9  ;;  %v4479_v1 = vrot.slane %v12138_v51, 1  ;;  %v5262_v9 = vrot.slane %v12126_v21, 1  ;;  %v5528_v42 = vrot.slane %v12069_v38, 1 }
 0x3e9   : > { %v4014_v59 = vmul.f32 %v10078_v56, %v12035_v33  ;;  %v4475_v33 = vor.u32 %v12146_v10, %v4471_v18  ;;  %v5525_v18 = vrot.slane %v12055_v46, 2  ;;  %v5529_v56 = vrot.slane %v12061_v25, 2 }
 0x3ea   : > { %8942 = vmatmul.mubr.msk.bf16.gmra.mrb[64].mxu1 %vm450_vm2, %v4464_v31  ;;  %v4307_v22 = vmul.f32 %v4260_v11, %v4013_v43  ;;  %v12158_v61 = vsel %vm406_vm1, %v13262_v2, %v5262_v9  ;;  %v12169_v31 = vor.u32 %v5521_v34, %v5520_v4  ;;  %v5532_v43 = vrot.slane %v12098_v30, 1 }
 0x3eb   : > { %v4308_v39 = vmul.f32 %v4265_v50, %v4014_v59  ;;  %8945 = vmatprep.mubr.msk.bf16.mxu1 %vm450_vm2, %v4472_v6  ;;  %v4480_v41 = vsel %vm728_vm3, %v4475_v33, %v4479_v1  ;;  %v5044_v6 = vsel %vm517_vm0, %v11848_v12, 0  ;;  %v5526_v59 = vor.u32 %v5525_v18, %v5524_v35  ;;  %v12180_v1 = vld [vmem:[%s13155_s3 + $0x6] sm:$0x3] }
 0x3ec   : > { %13462 = vst [vmem:[#allocation49_spill] sm:$0xff] %v12169_v31  ;;  %v5533_v50 = vrot.slane %v12072_v62, 2  ;;  %v5536_v11 = vrot.slane %v12091_v54, 1  ;;  %v5540_v9 = vrot.slane %v12130_v47, 1  ;;  %v5544_v4 = vrot.slane %v12124_v27, 1 }
 0x3ed   : > { %v12152_v17 = vpack.c.bf16 %v4308_v39, %v4307_v22  ;;  %v5530_v22 = vor.u32 %v5529_v56, %v5528_v42  ;;  %v5537_v39 = vrot.slane %v12080_v52, 2  ;;  %v12188_v12 = vsel %vm1182_vm4, %v12169_v31, %v5526_v59 }
 0x3ee   : > { %13463 = vst [vmem:[#allocation47_spill] sm:$0xff] %v12188_v12  ;;  %v5534_v33 = vor.u32 %v5533_v50, %v5532_v43  ;;  %v5545_v18 = vrot.slane %v12116_v23, 2  ;;  %v5548_v42 = vrot.slane %v12146_v10, 1  ;;  %v5552_v50 = vshrl.u32 %v12132_v15, 16 }
 0x3ef   : > { %v12195_v34 = vsel %vm1182_vm4, %v5526_v59, %v5530_v22  ;;  %v5538_v35 = vor.u32 %v5537_v39, %v5536_v11  ;;  %v5555_v11 = vrot.slane %v12138_v51, 2  ;;  %v5559_v39 = vshrl.u32 %v12126_v21, 16 }
 0x3f0   : > { %13464 = vst [vmem:[#allocation3_spill] sm:$0xff] %v12195_v34  ;;  %v12202_v56 = vsel %vm1182_vm4, %v5530_v22, %v5534_v33  ;;  %v5546_v59 = vor.u32 %v5545_v18, %v5544_v4  ;;  %v5554_v31 = vrot.slane %v5552_v50, 1  ;;  %v5562_v22 = vshll.u32 %v12126_v21, 16 }
 0x3f1   : > { %13465 = vst [vmem:[#allocation7_spill] sm:$0xff] %v12202_v56  ;;  %v12207_v2 = vsel %vm1182_vm4, %v5534_v33, %v5538_v35 }
 0x3f2   : > { %8946 = vmatmul.mubr.msk.bf16.gmra.mrb[68].mxu1 %vm450_vm2, %v4480_v41  ;;  %v5541_v41 = vrot.slane %v12094_v29, 2  ;;  %v5556_v33 = vor.u32 %v5555_v11, %v5554_v31  ;;  %v5564_v4 = vrot.slane %v5562_v22, 2  ;;  %v6149_v31 = vrot.slane %v12152_v17, 2 }
 0x3f3   : > { %8951 = vmatprep.mubr.msk.bf16.mxu1 %vm450_vm2, %v11699_v28  ;;  %v6403_v11 = vrot.slane %v12049_v13, 2  ;;  %v6415_v13 = vrot.slane %v12098_v30, 2 }
 0x3f4   : > { %v5542_v43 = vor.u32 %v5541_v41, %v5540_v9  ;;  %v5561_v41 = vrot.slane %v5559_v39, 1 }
 0x3f6   : > { %v12212_v34 = vsel %vm1182_vm4, %v5538_v35, %v5542_v43  ;;  %v12216_v9 = vsel %vm1182_vm4, %v5542_v43, %v5546_v59  ;;  %v5565_v35 = vor.u32 %v5564_v4, %v5561_v41  ;;  %v13264_v43 = vrot.slane %v12132_v15, 2 }
 0x3f7   : > { %v6404_v41 = vrot.slane %v12039_v19, 3  ;;  %v6408_v4 = vrot.slane %v12055_v46, 3  ;;  %v6419_v19 = vrot.slane %v12091_v54, 2  ;;  %v6424_v46 = vrot.slane %v12094_v29, 3 }
 0x3fa   : > { %8952 = vmatmul.mubr.msk.bf16.vlgmr.msra.gmra.mrb[36].mxu1 %vm450_vm2, %v11691_v63 }
 0x3fb   : > { %8988 = vmatpush3.bf16.msra.mxu1 %v5044_v6  ;;  %8955 = vmatprep.mubr.msk.bf16.mxu1 %vm450_vm2, %v11736_v16  ;;  %v5549_v6 = vrot.slane %v12119_v5, 2 }
 0x3fc   : > { %9876 = vmatprep.subr.msk.bf16.mxu1 %vm517_vm0, %v12180_v1 }
 0x3fd   : > { %v5550_v12 = vor.u32 %v5549_v6, %v5548_v42  ;;  %v12229_v42 = vsel %vm1182_vm4, %v5556_v33, %v5565_v35  ;;  %v5874_v6 = vrot.slane %v12126_v21, 2  ;;  %v6411_v35 = vrot.slane %v12069_v38, 2 }
 0x3fe   : > { %13467 = vst [vmem:[#allocation12_spill] sm:$0xff] %v12229_v42 }
 0x3ff   : > { %v12219_v56 = vsel %vm1182_vm4, %v5546_v59, %v5550_v12  ;;  %v12224_v18 = vsel %vm1182_vm4, %v5550_v12, %v5556_v33  ;;  %v12241_v12 = vsel %vm1860_vm5, %v13264_v43, %v5874_v6  ;;  %v12244_v59 = vsel %vm1860_vm5, %v5874_v6, %v6149_v31 }
 0x400   : > { %13466 = vst [vmem:[#allocation6_spill] sm:$0xff] %v12224_v18  ;;  %13468 = vst [vmem:[#allocation8_spill] sm:$0xff] %v12241_v12  ;;  %v6407_v33 = vrot.slane %v12058_v49, 2  ;;  %v6412_v43 = vrot.slane %v12061_v25, 3  ;;  %v12256_v6 = vor.u32 %v6404_v41, %v6403_v11  ;;  %v6416_v31 = vrot.slane %v12072_v62, 3 }
 0x401   : > { %13469 = vst [vmem:[#allocation13_spill] sm:$0xff] %v12244_v59  ;;  %v6420_v49 = vrot.slane %v12080_v52, 3  ;;  %v6423_v18 = vrot.slane %v12130_v47, 2  ;;  %v6427_v62 = vrot.slane %v12124_v27, 2  ;;  %v6428_v52 = vrot.slane %v12116_v23, 3 }
 0x402   : > { %8956 = vmatmul.mubr.msk.bf16.gmra.mrb[40].mxu1 %vm450_vm2, %v11731_v8  ;;  %v6409_v59 = vor.u32 %v6408_v4, %v6407_v33  ;;  %v6413_v12 = vor.u32 %v6412_v43, %v6411_v35  ;;  %v6417_v42 = vor.u32 %v6416_v31, %v6415_v13  ;;  %v6431_v47 = vrot.slane %v12146_v10, 2 }
 0x403   : > { %8959 = vmatprep.mubr.msk.bf16.mxu1 %vm450_vm2, %v11793_v24  ;;  %v6421_v30 = vor.u32 %v6420_v49, %v6419_v19  ;;  %v6425_v54 = vor.u32 %v6424_v46, %v6423_v18  ;;  %v6432_v11 = vrot.slane %v12119_v5, 3  ;;  %v6435_v41 = vrot.slane %v5552_v50, 2 }
 0x404   : > { %v12266_v25 = vsel %vm2224_vm6, %v12256_v6, %v6409_v59  ;;  %v12269_v38 = vsel %vm2224_vm6, %v6409_v59, %v6413_v12  ;;  %v12273_v43 = vsel %vm2224_vm6, %v6413_v12, %v6417_v42  ;;  %v6436_v59 = vrot.slane %v12138_v51, 3 }
 0x405   : > { %v12278_v29 = vsel %vm2224_vm6, %v6417_v42, %v6421_v30  ;;  %v12285_v27 = vsel %vm2224_vm6, %v6421_v30, %v6425_v54  ;;  %v6429_v12 = vor.u32 %v6428_v52, %v6427_v62  ;;  %v6439_v18 = vrot.slane %v5559_v39, 2 }
 0x406   : > { %v6440_v33 = vrot.slane %v5562_v22, 3  ;;  %v6433_v23 = vor.u32 %v6432_v11, %v6431_v47  ;;  %v6437_v10 = vor.u32 %v6436_v59, %v6435_v41  ;;  %v6444_v42 = vshrl.u32 %v12152_v17, 16 }
 0x407   : > { %v6447_v5 = vshll.u32 %v12152_v17, 16  ;;  %v12292_v51 = vsel %vm2224_vm6, %v6425_v54, %v6429_v12  ;;  %v13266_v49 = vrot.slane %v12132_v15, 3  ;;  %v6757_v46 = vrot.slane %v12126_v21, 3 }
 0x408   : > { %v6441_v50 = vor.u32 %v6440_v33, %v6439_v18  ;;  %v12295_v4 = vsel %vm2224_vm6, %v6429_v12, %v6433_v23  ;;  %v12298_v35 = vsel %vm2224_vm6, %v6433_v23, %v6437_v10  ;;  %v6446_v39 = vrot.slane %v6444_v42, 2 }
 0x409   : > { %v6449_v22 = vrot.slane %v6447_v5, 3  ;;  %v6759_v30 = vrot.slane %v12152_v17, 3  ;;  %v12316_v62 = vsel %vm2902_vm7, %v13266_v49, %v6757_v46  ;;  %v4952_v21 = vrot.slane %v11699_v28, 1  ;;  %v7985_v28 = vld [vmem:[%s13155_s3 + $0x8] sm:$0x3] }
 0x40a   : > { %8960 = vmatmul.mubr.msk.bf16.gmra.mrb[44].mxu1 %vm450_vm2, %v11765_v40  ;;  %v12301_v13 = vsel %vm2224_vm6, %v6437_v10, %v6441_v50  ;;  %13470 = vst [vmem:[#allocation11_spill] sm:$0xff] %v12316_v62  ;;  %v4953_v17 = vrot.slane %v11691_v63, 1  ;;  %v4955_v47 = vrot.slane %v11736_v16, 1  ;;  %v4957_v11 = vrot.slane %v11731_v8, 1 }
 0x40b   : > { %8963 = vmatprep.mubr.msk.bf16.mxu1 %vm450_vm2, %v11808_v14  ;;  %v6450_v31 = vor.u32 %v6449_v22, %v6446_v39  ;;  %v12319_v54 = vsel %vm2902_vm7, %v6757_v46, %v6759_v30  ;;  %v5268_v41 = vsel %vm517_vm0, %v12180_v1, 0  ;;  %v4959_v18 = vrot.slane %v11793_v24, 1 }
 0x40c   : > { %13471 = vst [vmem:[#allocation18_spill] sm:$0xff] %v12319_v54  ;;  %v4954_v52 = vsel %vm406_vm1, %v4952_v21, %v4953_v17  ;;  %v4956_v59 = vsel %vm406_vm1, %v4953_v17, %v4955_v47  ;;  %v4958_v12 = vsel %vm406_vm1, %v4955_v47, %v4957_v11  ;;  %v4961_v33 = vrot.slane %v11765_v40, 1 }
 0x40d   : > { %v12304_v19 = vsel %vm2224_vm6, %v6441_v50, %v6450_v31  ;;  %v4960_v1 = vsel %vm406_vm1, %v4957_v11, %v4959_v18  ;;  %v4963_v10 = vrot.slane %v11808_v14, 1  ;;  %v4965_v42 = vrot.slane %v11805_v60, 1 }
 0x40e   : > { %v4962_v23 = vsel %vm406_vm1, %v4959_v18, %v4961_v33  ;;  %v4967_v39 = vrot.slane %v11899_v0, 1  ;;  %v4969_v22 = vrot.slane %v11854_v55, 1  ;;  %v4971_v30 = vrot.slane %v11946_v57, 1 }
 0x40f   : > { %v4964_v5 = vsel %vm406_vm1, %v4961_v33, %v4963_v10  ;;  %v4966_v50 = vsel %vm406_vm1, %v4963_v10, %v4965_v42  ;;  %v4973_v21 = vrot.slane %v11915_v44, 1  ;;  %v4975_v47 = vrot.slane %v12002_v7, 1 }
 0x410   : > { %v4968_v31 = vsel %vm406_vm1, %v4965_v42, %v4967_v39  ;;  %v4970_v46 = vsel %vm406_vm1, %v4967_v39, %v4969_v22  ;;  %v4972_v17 = vsel %vm406_vm1, %v4969_v22, %v4971_v30  ;;  %v4977_v11 = vrot.slane %v11993_v3, 1 }
 0x411   : > { %v4979_v33 = vrot.slane %v12051_v58, 1  ;;  %v4981_v10 = vrot.slane %v12045_v45, 1  ;;  %v4983_v22 = vrot.slane %v12107_v48, 1 }
 0x412   : > { %8964 = vmatmul.mubr.msk.bf16.gmra.mrb[48].mxu1 %vm450_vm2, %v11805_v60  ;;  %v4978_v18 = vsel %vm406_vm1, %v4975_v47, %v4977_v11 }
 0x413   : > { %8967 = vmatprep.mubr.msk.bf16.mxu1 %vm450_vm2, %v11899_v0  ;;  %v4980_v42 = vsel %vm406_vm1, %v4977_v11, %v4979_v33  ;;  %v4982_v39 = vsel %vm406_vm1, %v4979_v33, %v4981_v10  ;;  %v13472_v11 = vrot.slane %v12132_v15, 1  ;;  %v5622_v33 = vsel %vm517_vm0, %v7985_v28, 0 }
 0x41a   : > { %8968 = vmatmul.mubr.msk.bf16.gmra.mrb[52].mxu1 %vm450_vm2, %v11854_v55 }
 0x41b   : > { %8971 = vmatprep.mubr.msk.bf16.mxu1 %vm450_vm2, %v11946_v57 }
 0x422   : > { %8972 = vmatmul.mubr.msk.bf16.gmra.mrb[56].mxu1 %vm450_vm2, %v11915_v44 }
 0x423   : > { %8975 = vmatprep.mubr.msk.bf16.mxu1 %vm450_vm2, %v12002_v7 }
 0x42a   : > { %8976 = vmatmul.mubr.msk.bf16.gmra.mrb[60].mxu1 %vm450_vm2, %v11993_v3 }
 0x42b   : > { %8979 = vmatprep.mubr.msk.bf16.mxu1 %vm450_vm2, %v12051_v58 }
 0x432   : > { %8980 = vmatmul.mubr.msk.bf16.gmra.mrb[64].mxu1 %vm450_vm2, %v12045_v45 }
 0x433   : > { %8983 = vmatprep.mubr.msk.bf16.mxu1 %vm450_vm2, %v12107_v48 }
 0x43a   : > { %8984 = vmatmul.mubr.msk.bf16.gmra.mrb[68].mxu1 %vm450_vm2, %v12103_v53 }
 0x43b   : > { %8989 = vmatprep.mubr.msk.bf16.mxu1 %vm450_vm2, %v4954_v52  ;;  %v4974_v52 = vsel %vm406_vm1, %v4971_v30, %v4973_v21  ;;  %v4985_v30 = vrot.slane %v12103_v53, 1 }
 0x43d   : > { %v4988_v49 = vsel %vm406_vm1, %v4985_v30, %v13472_v11  ;;  %v13477_v11 = vld [vmem:[#allocation5_spill] sm:$0xff] }
 0x442   : > { %8990 = vmatmul.mubr.msk.bf16.vlgmr.msra.gmra.mrb[36].mxu1 %vm450_vm2, %v4956_v59 }
 0x443   : > { %9026 = vmatpush3.bf16.msra.mxu1 %v5268_v41  ;;  %8993 = vmatprep.mubr.msk.bf16.mxu1 %vm450_vm2, %v4958_v12  ;;  %v4976_v41 = vsel %vm406_vm1, %v4973_v21, %v4975_v47  ;;  %v4984_v21 = vsel %vm406_vm1, %v4981_v10, %v4983_v22  ;;  %v4986_v47 = vsel %vm406_vm1, %v4983_v22, %v4985_v30  ;;  %v8004_v10 = vld [vmem:[%s13155_s3 + $0xa] sm:$0x3] }
 0x444   : > { %9877 = vmatprep.subr.msk.bf16.mxu1 %vm517_vm0, %v7985_v28  ;;  %v5489_v28 = vrot.slane %v11813_v32, 2  ;;  %v5931_v22 = vsel %vm517_vm0, %v8004_v10, 0 }
 0x44a   : > { %8994 = vmatmul.mubr.msk.bf16.gmra.mrb[40].mxu1 %vm450_vm2, %v4960_v1 }
 0x44b   : > { %8997 = vmatprep.mubr.msk.bf16.mxu1 %vm450_vm2, %v4962_v23 }
 0x452   : > { %8998 = vmatmul.mubr.msk.bf16.gmra.mrb[44].mxu1 %vm450_vm2, %v4964_v5 }
 0x453   : > { %9001 = vmatprep.mubr.msk.bf16.mxu1 %vm450_vm2, %v4966_v50 }
 0x45a   : > { %9002 = vmatmul.mubr.msk.bf16.gmra.mrb[48].mxu1 %vm450_vm2, %v4968_v31 }
 0x45b   : > { %9005 = vmatprep.mubr.msk.bf16.mxu1 %vm450_vm2, %v4970_v46 }
 0x462   : > { %9006 = vmatmul.mubr.msk.bf16.gmra.mrb[52].mxu1 %vm450_vm2, %v4972_v17 }
 0x463   : > { %9009 = vmatprep.mubr.msk.bf16.mxu1 %vm450_vm2, %v4974_v52 }
 0x46a   : > { %9010 = vmatmul.mubr.msk.bf16.gmra.mrb[56].mxu1 %vm450_vm2, %v4976_v41 }
 0x46b   : > { %9013 = vmatprep.mubr.msk.bf16.mxu1 %vm450_vm2, %v4978_v18 }
 0x472   : > { %9014 = vmatmul.mubr.msk.bf16.gmra.mrb[60].mxu1 %vm450_vm2, %v4980_v42 }
 0x473   : > { %9017 = vmatprep.mubr.msk.bf16.mxu1 %vm450_vm2, %v4982_v39 }
 0x47a   : > { %9018 = vmatmul.mubr.msk.bf16.gmra.mrb[64].mxu1 %vm450_vm2, %v4984_v21 }
 0x47b   : > { %9021 = vmatprep.mubr.msk.bf16.mxu1 %vm450_vm2, %v4986_v47 }
 0x482   : > { %9022 = vmatmul.mubr.msk.bf16.gmra.mrb[68].mxu1 %vm450_vm2, %v4988_v49 }
 0x483   : > { %9027 = vmatprep.mubr.msk.bf16.mxu1 %vm450_vm2, %v4956_v59  ;;  %v5488_v59 = vrot.slane %v11816_v36, 1 }
 0x48a   : > { %9028 = vmatmul.mubr.msk.bf16.vlgmr.msra.gmra.mrb[36].mxu1 %vm450_vm2, %v4958_v12  ;;  %v13473_v12 = vshrl.u32 %v11691_v63, 16 }
 0x48b   : > { %9064 = vmatpush3.bf16.msra.mxu1 %v5622_v33  ;;  %9031 = vmatprep.mubr.msk.bf16.mxu1 %vm450_vm2, %v4960_v1  ;;  %v5501_v33 = vrot.slane %v13477_v11, 2 }
 0x48c   : > { %9878 = vmatprep.subr.msk.bf16.mxu1 %vm517_vm0, %v8004_v10  ;;  %v5485_v1 = vrot.slane %v13473_v12, 1 }
 0x492   : > { %9032 = vmatmul.mubr.msk.bf16.gmra.mrb[40].mxu1 %vm450_vm2, %v4962_v23  ;;  %v13474_v23 = vshll.u32 %v11691_v63, 16 }
 0x493   : > { %9035 = vmatprep.mubr.msk.bf16.mxu1 %vm450_vm2, %v4964_v5 }
 0x494   : > { %v5486_v5 = vrot.slane %v13474_v23, 2 }
 0x49a   : > { %9036 = vmatmul.mubr.msk.bf16.gmra.mrb[44].mxu1 %vm450_vm2, %v4966_v50  ;;  %v5490_v50 = vor.u32 %v5489_v28, %v5488_v59  ;;  %v13478_v28 = vld [vmem:[#allocation15_spill] sm:$0xff] }
 0x49b   : > { %9039 = vmatprep.mubr.msk.bf16.mxu1 %vm450_vm2, %v4968_v31  ;;  %v5487_v31 = vor.u32 %v5486_v5, %v5485_v1  ;;  %v5504_v12 = vrot.slane %v13478_v28, 1  ;;  %v13479_v1 = vld [vmem:[#allocation10_spill] sm:$0xff] }
 0x49c   : > { %v5505_v23 = vrot.slane %v13479_v1, 2 }
 0x49e   : > { %v5506_v5 = vor.u32 %v5505_v23, %v5504_v12  ;;  %v13485_v12 = vld [vmem:[#allocation28_spill] sm:$0xff] }
 0x49f   : > { %v5517_v23 = vrot.slane %v13485_v12, 2 }
 0x4a2   : > { %9040 = vmatmul.mubr.msk.bf16.gmra.mrb[48].mxu1 %vm450_vm2, %v4970_v46  ;;  %v5492_v46 = vrot.slane %v11860_v20, 1 }
 0x4a3   : > { %9043 = vmatprep.mubr.msk.bf16.mxu1 %vm450_vm2, %v4972_v17  ;;  %v5493_v17 = vrot.slane %v11820_v37, 2 }
 0x4aa   : > { %9044 = vmatmul.mubr.msk.bf16.gmra.mrb[52].mxu1 %vm450_vm2, %v4974_v52  ;;  %v5491_v52 = vsel %vm1182_vm4, %v5487_v31, %v5490_v50  ;;  %v13480_v31 = vld [vmem:[#allocation21_spill] sm:$0xff] }
 0x4ab   : > { %9047 = vmatprep.mubr.msk.bf16.mxu1 %vm450_vm2, %v4976_v41  ;;  %v5496_v41 = vrot.slane %v11891_v26, 1 }
 0x4b2   : > { %9048 = vmatmul.mubr.msk.bf16.gmra.mrb[56].mxu1 %vm450_vm2, %v4978_v18 }
 0x4b3   : > { %9051 = vmatprep.mubr.msk.bf16.mxu1 %vm450_vm2, %v4980_v42  ;;  %v5494_v42 = vor.u32 %v5493_v17, %v5492_v46  ;;  %v5508_v46 = vrot.slane %v13480_v31, 1  ;;  %v13481_v17 = vld [vmem:[#allocation16_spill] sm:$0xff] }
 0x4b5   : > { %v5495_v30 = vsel %vm1182_vm4, %v5490_v50, %v5494_v42 }
 0x4ba   : > { %9052 = vmatmul.mubr.msk.bf16.gmra.mrb[60].mxu1 %vm450_vm2, %v4982_v39 }
 0x4bb   : > { %9055 = vmatprep.mubr.msk.bf16.mxu1 %vm450_vm2, %v4984_v21  ;;  %v13476_v21 = vld [vmem:[#allocation9_spill] sm:$0xff] }
 0x4c2   : > { %9056 = vmatmul.mubr.msk.bf16.gmra.mrb[64].mxu1 %vm450_vm2, %v4986_v47  ;;  %v5500_v47 = vrot.slane %v13476_v21, 1 }
 0x4c3   : > { %9059 = vmatprep.mubr.msk.bf16.mxu1 %vm450_vm2, %v4988_v49  ;;  %v13475_v49 = vld [vmem:[#allocation4_spill] sm:$0xff] }
 0x4c4   : > { %v5497_v18 = vrot.slane %v13475_v49, 2  ;;  %v5502_v10 = vor.u32 %v5501_v33, %v5500_v47  ;;  %v13484_v33 = vld [vmem:[#allocation33_spill] sm:$0xff] }
 0x4c6   : > { %v5498_v39 = vor.u32 %v5497_v18, %v5496_v41  ;;  %v5507_v41 = vsel %vm1182_vm4, %v5502_v10, %v5506_v5  ;;  %v13482_v18 = vld [vmem:[#allocation27_spill] sm:$0xff] }
 0x4c8   : > { %v5499_v59 = vsel %vm1182_vm4, %v5494_v42, %v5498_v39  ;;  %v5503_v50 = vsel %vm1182_vm4, %v5498_v39, %v5502_v10  ;;  %v5512_v42 = vrot.slane %v13482_v18, 1  ;;  %v5516_v39 = vrot.slane %v13484_v33, 1 }
 0x4ca   : > { %9060 = vmatmul.mubr.msk.bf16.gmra.mrb[68].mxu1 %vm450_vm2, %v12158_v61  ;;  %v8023_v61 = vld [vmem:[%s13155_s3 + $0xc] sm:$0x3]  ;;  %v5518_v10 = vor.u32 %v5517_v23, %v5516_v39  ;;  %v8042_v39 = vld [vmem:[%s13155_s3 + $0xe] sm:$0x3]  ;;  %v5846_v23 = vrot.slane %v11765_v40, 2 }
 0x4cb   : > { %9065 = vmatprep.mubr.msk.bf16.mxu1 %vm450_vm2, %v5491_v52  ;;  %v5509_v52 = vrot.slane %v13481_v17, 2 }
 0x4d2   : > { %9066 = vmatmul.mubr.msk.bf16.vlgmr.msra.gmra.mrb[36].mxu1 %vm450_vm2, %v5495_v30  ;;  %v13483_v30 = vld [vmem:[#allocation22_spill] sm:$0xff] }
 0x4d3   : > { %9102 = vmatpush3.bf16.msra.mxu1 %v5931_v22  ;;  %9069 = vmatprep.mubr.msk.bf16.mxu1 %vm450_vm2, %v5499_v59  ;;  %v5513_v22 = vrot.slane %v13483_v30, 2  ;;  %v5510_v59 = vor.u32 %v5509_v52, %v5508_v46  ;;  %v13488_v52 = vld [vmem:[#allocation3_spill] sm:$0xff] }
 0x4d4   : > { %9879 = vmatprep.subr.msk.bf16.mxu1 %vm517_vm0, %v8023_v61 }
 0x4d5   : > { %v5514_v54 = vor.u32 %v5513_v22, %v5512_v42  ;;  %v5511_v47 = vsel %vm1182_vm4, %v5506_v5, %v5510_v59  ;;  %v13487_v5 = vld [vmem:[#allocation47_spill] sm:$0xff]  ;;  %v5839_v22 = vrot.slane %v11691_v63, 2 }
 0x4d6   : > { %v13489_v42 = vld [vmem:[#allocation7_spill] sm:$0xff] }
 0x4d7   : > { %v5519_v62 = vsel %vm1182_vm4, %v5514_v54, %v5518_v10 }
 0x4da   : > { %9070 = vmatmul.mubr.msk.bf16.gmra.mrb[40].mxu1 %vm450_vm2, %v5503_v50  ;;  %v5515_v50 = vsel %vm1182_vm4, %v5510_v59, %v5514_v54  ;;  %v5840_v54 = vrot.slane %v11736_v16, 2  ;;  %v13491_v59 = vld [vmem:[#allocation12_spill] sm:$0xff] }
 0x4db   : > { %9073 = vmatprep.mubr.msk.bf16.mxu1 %vm450_vm2, %v5507_v41  ;;  %v13486_v41 = vld [vmem:[#allocation49_spill] sm:$0xff] }
 0x4dc   : > { %v5523_v46 = vsel %vm1182_vm4, %v5518_v10, %v13486_v41  ;;  %v5850_v41 = vrot.slane %v11805_v60, 2 }
 0x4e2   : > { %9074 = vmatmul.mubr.msk.bf16.gmra.mrb[44].mxu1 %vm450_vm2, %v5511_v47 }
 0x4e3   : > { %9077 = vmatprep.mubr.msk.bf16.mxu1 %vm450_vm2, %v5515_v50  ;;  %v5848_v50 = vrot.slane %v11808_v14, 2 }
 0x4e5   : > { %v5849_v10 = vsel %vm1860_vm5, %v5846_v23, %v5848_v50 }
 0x4ea   : > { %9078 = vmatmul.mubr.msk.bf16.gmra.mrb[48].mxu1 %vm450_vm2, %v5519_v62  ;;  %v13490_v62 = vld [vmem:[#allocation6_spill] sm:$0xff] }
 0x4eb   : > { %9081 = vmatprep.mubr.msk.bf16.mxu1 %vm450_vm2, %v5523_v46  ;;  %v5852_v46 = vrot.slane %v11899_v0, 2 }
 0x4f2   : > { %9082 = vmatmul.mubr.msk.bf16.gmra.mrb[52].mxu1 %vm450_vm2, %v13487_v5  ;;  %v5851_v5 = vsel %vm1860_vm5, %v5848_v50, %v5850_v41 }
 0x4f3   : > { %9085 = vmatprep.mubr.msk.bf16.mxu1 %vm450_vm2, %v13488_v52  ;;  %v5853_v52 = vsel %vm1860_vm5, %v5850_v41, %v5852_v46 }
 0x4fa   : > { %9086 = vmatmul.mubr.msk.bf16.gmra.mrb[56].mxu1 %vm450_vm2, %v13489_v42  ;;  %v5854_v42 = vrot.slane %v11854_v55, 2 }
 0x4fb   : > { %9089 = vmatprep.mubr.msk.bf16.mxu1 %vm450_vm2, %v12207_v2  ;;  %v5841_v2 = vsel %vm1860_vm5, %v5839_v22, %v5840_v54 }
 0x502   : > { %9090 = vmatmul.mubr.msk.bf16.gmra.mrb[60].mxu1 %vm450_vm2, %v12212_v34  ;;  %v5842_v34 = vrot.slane %v11731_v8, 2 }
 0x503   : > { %9093 = vmatprep.mubr.msk.bf16.mxu1 %vm450_vm2, %v12216_v9  ;;  %v5844_v9 = vrot.slane %v11793_v24, 2 }
 0x504   : > { %v5843_v47 = vsel %vm1860_vm5, %v5840_v54, %v5842_v34  ;;  %v5855_v54 = vsel %vm1860_vm5, %v5852_v46, %v5854_v42  ;;  %v5866_v46 = vrot.slane %v12045_v45, 2 }
 0x505   : > { %v5845_v63 = vsel %vm1860_vm5, %v5842_v34, %v5844_v9 }
 0x50a   : > { %9094 = vmatmul.mubr.msk.bf16.gmra.mrb[64].mxu1 %vm450_vm2, %v12219_v56  ;;  %v6155_v56 = vsel %vm517_vm0, %v8023_v61, 0  ;;  %v5847_v61 = vsel %vm1860_vm5, %v5844_v9, %v5846_v23  ;;  %v5864_v23 = vrot.slane %v12051_v58, 2 }
 0x50b   : > { %9097 = vmatprep.mubr.msk.bf16.mxu1 %vm450_vm2, %v13490_v62  ;;  %v5856_v62 = vrot.slane %v11946_v57, 2 }
 0x50d   : > { %v5857_v22 = vsel %vm1860_vm5, %v5854_v42, %v5856_v62  ;;  %v5868_v42 = vrot.slane %v12107_v48, 2  ;;  %v13493_v48 = vld [vmem:[#allocation8_spill] sm:$0xff] }
 0x512   : > { %9098 = vmatmul.mubr.msk.bf16.gmra.mrb[68].mxu1 %vm450_vm2, %v13491_v59  ;;  %v5858_v59 = vrot.slane %v11915_v44, 2 }
 0x513   : > { %9103 = vmatprep.mubr.msk.bf16.mxu1 %vm450_vm2, %v5841_v2  ;;  %v5860_v2 = vrot.slane %v12002_v7, 2 }
 0x514   : > { %v5859_v34 = vsel %vm1860_vm5, %v5856_v62, %v5858_v59  ;;  %v5867_v62 = vsel %vm1860_vm5, %v5864_v23, %v5866_v46 }
 0x515   : > { %v5861_v9 = vsel %vm1860_vm5, %v5858_v59, %v5860_v2  ;;  %v5869_v59 = vsel %vm1860_vm5, %v5866_v46, %v5868_v42  ;;  %v8061_v46 = vld [vmem:[%s13155_s3 + $0x10] sm:$0x3] }
 0x51a   : > { %9104 = vmatmul.mubr.msk.bf16.vlgmr.msra.gmra.mrb[36].mxu1 %vm450_vm2, %v5843_v47 }
 0x51b   : > { %9140 = vmatpush3.bf16.msra.mxu1 %v6155_v56  ;;  %9107 = vmatprep.mubr.msk.bf16.mxu1 %vm450_vm2, %v5845_v63  ;;  %v5862_v56 = vrot.slane %v11993_v3, 2 }
 0x51c   : > { %9880 = vmatprep.subr.msk.bf16.mxu1 %vm517_vm0, %v8042_v39 }
 0x51d   : > { %v5863_v50 = vsel %vm1860_vm5, %v5860_v2, %v5862_v56  ;;  %v5865_v41 = vsel %vm1860_vm5, %v5862_v56, %v5864_v23  ;;  %v5870_v2 = vrot.slane %v12103_v53, 2  ;;  %v13492_v56 = vrot.slane %v12132_v15, 2 }
 0x51e   : > { %v6507_v23 = vsel %vm517_vm0, %v8042_v39, 0  ;;  %v6373_v39 = vrot.slane %v11813_v32, 3  ;;  %v6383_v32 = vrot.slane %v13476_v21, 2  ;;  %v6391_v21 = vrot.slane %v13480_v31, 2 }
 0x51f   : > { %v5871_v58 = vsel %vm1860_vm5, %v5868_v42, %v5870_v2  ;;  %v5873_v45 = vsel %vm1860_vm5, %v5870_v2, %v13492_v56  ;;  %v6395_v42 = vrot.slane %v13482_v18, 2  ;;  %v6400_v31 = vrot.slane %v13485_v12, 3 }
 0x520   : > { %v6745_v12 = vrot.slane %v11993_v3, 3 }
 0x522   : > { %9108 = vmatmul.mubr.msk.bf16.gmra.mrb[40].mxu1 %vm450_vm2, %v5847_v61 }
 0x523   : > { %9111 = vmatprep.mubr.msk.bf16.mxu1 %vm450_vm2, %v5849_v10 }
 0x52a   : > { %9112 = vmatmul.mubr.msk.bf16.gmra.mrb[44].mxu1 %vm450_vm2, %v5851_v5 }
 0x52b   : > { %9115 = vmatprep.mubr.msk.bf16.mxu1 %vm450_vm2, %v5853_v52 }
 0x532   : > { %9116 = vmatmul.mubr.msk.bf16.gmra.mrb[48].mxu1 %vm450_vm2, %v5855_v54 }
 0x533   : > { %9119 = vmatprep.mubr.msk.bf16.mxu1 %vm450_vm2, %v5857_v22 }
 0x53a   : > { %9120 = vmatmul.mubr.msk.bf16.gmra.mrb[52].mxu1 %vm450_vm2, %v5859_v34 }
 0x53b   : > { %9123 = vmatprep.mubr.msk.bf16.mxu1 %vm450_vm2, %v5861_v9 }
 0x542   : > { %9124 = vmatmul.mubr.msk.bf16.gmra.mrb[56].mxu1 %vm450_vm2, %v5863_v50 }
 0x543   : > { %9127 = vmatprep.mubr.msk.bf16.mxu1 %vm450_vm2, %v5865_v41 }
 0x54a   : > { %9128 = vmatmul.mubr.msk.bf16.gmra.mrb[60].mxu1 %vm450_vm2, %v5867_v62 }
 0x54b   : > { %9131 = vmatprep.mubr.msk.bf16.mxu1 %vm450_vm2, %v5869_v59 }
 0x552   : > { %9132 = vmatmul.mubr.msk.bf16.gmra.mrb[64].mxu1 %vm450_vm2, %v5871_v58 }
 0x553   : > { %9135 = vmatprep.mubr.msk.bf16.mxu1 %vm450_vm2, %v5873_v45 }
 0x55a   : > { %9136 = vmatmul.mubr.msk.bf16.gmra.mrb[68].mxu1 %vm450_vm2, %v13493_v48 }
 0x55b   : > { %9141 = vmatprep.mubr.msk.bf16.mxu1 %vm450_vm2, %v5843_v47  ;;  %v6372_v47 = vrot.slane %v11816_v36, 2 }
 0x562   : > { %9142 = vmatmul.mubr.msk.bf16.vlgmr.msra.gmra.mrb[36].mxu1 %vm450_vm2, %v5845_v63  ;;  %v6375_v63 = vrot.slane %v11860_v20, 2  ;;  %v6384_v20 = vrot.slane %v13477_v11, 3  ;;  %v6392_v11 = vrot.slane %v13481_v17, 3 }
 0x563   : > { %9178 = vmatpush3.bf16.msra.mxu1 %v6507_v23  ;;  %9145 = vmatprep.mubr.msk.bf16.mxu1 %vm450_vm2, %v5847_v61  ;;  %v6376_v61 = vrot.slane %v11820_v37, 3 }
 0x564   : > { %9881 = vmatprep.subr.msk.bf16.mxu1 %vm517_vm0, %v8061_v46 }
 0x56a   : > { %9146 = vmatmul.mubr.msk.bf16.gmra.mrb[40].mxu1 %vm450_vm2, %v5849_v10  ;;  %v6374_v10 = vor.u32 %v6373_v39, %v6372_v47 }
 0x56b   : > { %9149 = vmatprep.mubr.msk.bf16.mxu1 %vm450_vm2, %v5851_v5  ;;  %v6377_v5 = vor.u32 %v6376_v61, %v6375_v63  ;;  %v6753_v61 = vrot.slane %v12103_v53, 3  ;;  %v13500_v53 = vld [vmem:[#allocation18_spill] sm:$0xff] }
 0x56d   : > { %v6378_v36 = vsel %vm2224_vm6, %v6374_v10, %v6377_v5 }
 0x572   : > { %9150 = vmatmul.mubr.msk.bf16.gmra.mrb[44].mxu1 %vm450_vm2, %v5853_v52  ;;  %v6379_v52 = vrot.slane %v11891_v26, 2  ;;  %v6387_v26 = vrot.slane %v13478_v28, 2  ;;  %v6396_v28 = vrot.slane %v13483_v30, 3 }
 0x573   : > { %9153 = vmatprep.mubr.msk.bf16.mxu1 %vm450_vm2, %v5855_v54  ;;  %v6380_v54 = vrot.slane %v13475_v49, 3  ;;  %v6388_v49 = vrot.slane %v13479_v1, 3 }
 0x574   : > { %v6397_v17 = vor.u32 %v6396_v28, %v6395_v42 }
 0x575   : > { %v6381_v37 = vor.u32 %v6380_v54, %v6379_v52  ;;  %v13498_v52 = vrot.slane %v12132_v15, 3 }
 0x577   : > { %v6756_v54 = vsel %vm2902_vm7, %v6753_v61, %v13498_v52 }
 0x57a   : > { %9154 = vmatmul.mubr.msk.bf16.gmra.mrb[48].mxu1 %vm450_vm2, %v5857_v22  ;;  %v6382_v22 = vsel %vm2224_vm6, %v6377_v5, %v6381_v37 }
 0x57b   : > { %9157 = vmatprep.mubr.msk.bf16.mxu1 %vm450_vm2, %v5859_v34 }
 0x582   : > { %9158 = vmatmul.mubr.msk.bf16.gmra.mrb[52].mxu1 %vm450_vm2, %v5861_v9  ;;  %v6389_v9 = vor.u32 %v6388_v49, %v6387_v26  ;;  %v12679_v26 = vld [vmem:[%s13157_s5] ss:$0 sm:$0xff]  ;;  %v10227_v49 = vld [vmem:[%s10354_s8 + $0x50] sm:$0xff] }
 0x583   : > { %9161 = vmatprep.mubr.msk.bf16.mxu1 %vm450_vm2, %v5863_v50  ;;  %v6393_v50 = vor.u32 %v6392_v11, %v6391_v21 }
 0x585   : > { %v6394_v1 = vsel %vm2224_vm6, %v6389_v9, %v6393_v50  ;;  %v6398_v2 = vsel %vm2224_vm6, %v6393_v50, %v6397_v17 }
 0x58a   : > { %9162 = vmatmul.mubr.msk.bf16.gmra.mrb[56].mxu1 %vm450_vm2, %v5865_v41 }
 0x58b   : > { %9165 = vmatprep.mubr.msk.bf16.mxu1 %vm450_vm2, %v5867_v62  ;;  %v6399_v62 = vrot.slane %v13484_v33, 2 }
 0x592   : > { %9166 = vmatmul.mubr.msk.bf16.gmra.mrb[60].mxu1 %vm450_vm2, %v5869_v59  ;;  %v6401_v59 = vor.u32 %v6400_v31, %v6399_v62  ;;  %v10228_v31 = vld [vmem:[%s10354_s8 + $0x60] sm:$0xff] }
 0x593   : > { %9169 = vmatprep.mubr.msk.bf16.mxu1 %vm450_vm2, %v5871_v58  ;;  %v13494_v58 = vld [vmem:[#allocation13_spill] sm:$0xff] }
 0x594   : > { %v6402_v18 = vsel %vm2224_vm6, %v6397_v17, %v6401_v59  ;;  %v6406_v30 = vsel %vm2224_vm6, %v6401_v59, %v12256_v6  ;;  %v6724_v6 = vrot.slane %v11736_v16, 3  ;;  %v6733_v16 = vrot.slane %v11805_v60, 3  ;;  %v10229_v59 = vld [vmem:[%s10354_s8 + $0x68] sm:$0xff] }
 0x595   : > { %v6739_v60 = vrot.slane %v11946_v57, 3  ;;  %v7123_v17 = vrot.slane %v10228_v31, 7 }
 0x59a   : > { %9170 = vmatmul.mubr.msk.bf16.gmra.mrb[64].mxu1 %vm450_vm2, %v5873_v45  ;;  %v6385_v45 = vor.u32 %v6384_v20, %v6383_v32  ;;  %v10224_v20 = vld [vmem:[%s10354_s8 + $0x48] sm:$0xff] }
 0x59b   : > { %9173 = vmatprep.mubr.msk.bf16.mxu1 %vm450_vm2, %v13493_v48  ;;  %v6816_v48 = vsel %vm517_vm0, %v8061_v46, 0  ;;  %v13496_v46 = vld [vmem:[#allocation34_spill] sm:$0xff] }
 0x59c   : > { %v6386_v34 = vsel %vm2224_vm6, %v6381_v37, %v6385_v45  ;;  %v6390_v41 = vsel %vm2224_vm6, %v6385_v45, %v6389_v9  ;;  %v6749_v47 = vrot.slane %v13496_v46, 3  ;;  %v7117_v37 = vrot.slane %v10224_v20, 7  ;;  %v10225_v45 = vld [vmem:[%s10354_s8 + $0x30] sm:$0xff]  ;;  %v10234_v46 = vld [vmem:[%s10354_s8 + $0x78] sm:$0xff] }
 0x59d   : > { %v10239_v20 = vld [vmem:[%s10354_s8 + $0xb0] sm:$0xff] }
 0x5a2   : > { %9174 = vmatmul.mubr.msk.bf16.gmra.mrb[68].mxu1 %vm450_vm2, %v13494_v58  ;;  %v13499_v58 = vld [vmem:[#allocation11_spill] sm:$0xff] }
 0x5a3   : > { %9179 = vmatprep.mubr.msk.bf16.mxu1 %vm450_vm2, %v6378_v36  ;;  %v10223_v36 = vld [vmem:[%s10354_s8 + $0x40] sm:$0xff] }
 0x5a4   : > { %v7115_v32 = vrot.slane %v10223_v36, 7  ;;  %v10238_v36 = vld [vmem:[%s10354_s8 + $0x98] sm:$0xff] }
 0x5a6   : > { %v7118_v11 = vsel %vm7111_vm9, %v7115_v32, %v7117_v37 }
 0x5aa   : > { %9180 = vmatmul.mubr.msk.bf16.vlgmr.msra.gmra.mrb[36].mxu1 %vm450_vm2, %v6382_v22  ;;  %v10226_v22 = vld [vmem:[%s10354_s8 + $0x38] sm:$0xff] }
 0x5ab   : > { %9216 = vmatpush3.bf16.msra.mxu1 %v6816_v48  ;;  %9183 = vmatprep.mubr.msk.bf16.mxu1 %vm450_vm2, %v6386_v34  ;;  %v7112_v48 = vrot.slane %v10225_v45, 7  ;;  %v7113_v15 = vrot.slane %v10226_v22, 7  ;;  %v7119_v34 = vrot.slane %v10227_v49, 7  ;;  %v10240_v22 = vld [vmem:[%s10354_s8 + $0xc0] sm:$0xff]  ;;  %v10241_v49 = vld [vmem:[%s10354_s8 + $0xc8] sm:$0xff] }
 0x5ad   : > { %v7116_v42 = vsel %vm7111_vm9, %v7113_v15, %v7115_v32  ;;  %v7120_v62 = vsel %vm7111_vm9, %v7117_v37, %v7119_v34  ;;  %v7137_v32 = vrot.slane %v10238_v36, 7  ;;  %v7143_v37 = vrot.slane %v10239_v20, 7 }
 0x5b2   : > { %9184 = vmatmul.mubr.msk.bf16.gmra.mrb[40].mxu1 %vm450_vm2, %v6390_v41  ;;  %v7114_v41 = vsel %vm7111_vm9, %v7112_v48, %v7113_v15  ;;  %v7147_v15 = vrot.slane %v10240_v22, 7 }
 0x5b3   : > { %9187 = vmatprep.mubr.msk.bf16.mxu1 %vm450_vm2, %v6394_v1 }
 0x5ba   : > { %9188 = vmatmul.mubr.msk.bf16.gmra.mrb[44].mxu1 %vm450_vm2, %v6398_v2  ;;  %v7125_v2 = vrot.slane %v10229_v59, 7 }
 0x5bb   : > { %9191 = vmatprep.mubr.msk.bf16.mxu1 %vm450_vm2, %v6402_v18 }
 0x5c2   : > { %9192 = vmatmul.mubr.msk.bf16.gmra.mrb[48].mxu1 %vm450_vm2, %v6406_v30 }
 0x5c3   : > { %9195 = vmatprep.mubr.msk.bf16.mxu1 %vm450_vm2, %v12266_v25  ;;  %v6725_v25 = vrot.slane %v11731_v8, 3  ;;  %v6731_v8 = vrot.slane %v11808_v14, 3 }
 0x5ca   : > { %9196 = vmatmul.mubr.msk.bf16.gmra.mrb[52].mxu1 %vm450_vm2, %v12269_v38  ;;  %v6726_v38 = vsel %vm2902_vm7, %v6724_v6, %v6725_v25 }
 0x5cb   : > { %9199 = vmatprep.mubr.msk.bf16.mxu1 %vm450_vm2, %v12273_v43  ;;  %v6727_v43 = vrot.slane %v11793_v24, 3  ;;  %v6734_v24 = vsel %vm2902_vm7, %v6731_v8, %v6733_v16 }
 0x5d2   : > { %9200 = vmatmul.mubr.msk.bf16.gmra.mrb[56].mxu1 %vm450_vm2, %v12278_v29  ;;  %v6729_v29 = vrot.slane %v11765_v40, 3  ;;  %v6735_v40 = vrot.slane %v11899_v0, 3 }
 0x5d3   : > { %9203 = vmatprep.mubr.msk.bf16.mxu1 %vm450_vm2, %v12285_v27  ;;  %v6728_v27 = vsel %vm2902_vm7, %v6725_v25, %v6727_v43  ;;  %v10230_v25 = vld [vmem:[%s10354_s8 + $0x58] sm:$0xff] }
 0x5da   : > { %9204 = vmatmul.mubr.msk.bf16.gmra.mrb[60].mxu1 %vm450_vm2, %v12292_v51  ;;  %v6730_v51 = vsel %vm2902_vm7, %v6727_v43, %v6729_v29  ;;  %v10231_v43 = vld [vmem:[%s10354_s8 + $0x70] sm:$0xff] }
 0x5db   : > { %9207 = vmatprep.mubr.msk.bf16.mxu1 %vm450_vm2, %v12295_v4  ;;  %v6732_v4 = vsel %vm2902_vm7, %v6729_v29, %v6731_v8  ;;  %v7127_v29 = vrot.slane %v10231_v43, 7  ;;  %v10232_v8 = vld [vmem:[%s10354_s8 + $0x80] sm:$0xff] }
 0x5e2   : > { %9208 = vmatmul.mubr.msk.bf16.gmra.mrb[64].mxu1 %vm450_vm2, %v12298_v35  ;;  %v6737_v35 = vrot.slane %v11854_v55, 3  ;;  %v6743_v55 = vrot.slane %v12002_v7, 3  ;;  %v13497_v7 = vld [vmem:[#allocation2_spill] sm:$0xff] }
 0x5e3   : > { %9211 = vmatprep.mubr.msk.bf16.mxu1 %vm450_vm2, %v12301_v13  ;;  %v6736_v13 = vsel %vm2902_vm7, %v6733_v16, %v6735_v40  ;;  %v6751_v63 = vrot.slane %v13497_v7, 3  ;;  %v7131_v16 = vrot.slane %v10232_v8, 7  ;;  %v12758_v8 = vld [vmem:[%s10354_s8 + $0xd0] sm:$0xff] }
 0x5e4   : > { %v6738_v14 = vsel %vm2902_vm7, %v6735_v40, %v6737_v35  ;;  %v6740_v33 = vsel %vm2902_vm7, %v6737_v35, %v6739_v60  ;;  %v6746_v57 = vsel %vm2902_vm7, %v6743_v55, %v6745_v12 }
 0x5e5   : > { %v6752_v10 = vsel %vm2902_vm7, %v6749_v47, %v6751_v63  ;;  %v6754_v5 = vsel %vm2902_vm7, %v6751_v63, %v6753_v61  ;;  %v10236_v61 = vld [vmem:[%s10354_s8 + $0xa0] sm:$0xff] }
 0x5ea   : > { %9212 = vmatmul.mubr.msk.bf16.gmra.mrb[68].mxu1 %vm450_vm2, %v12304_v19  ;;  %v6741_v19 = vrot.slane %v11915_v44, 3  ;;  %v13495_v44 = vld [vmem:[#allocation39_spill] sm:$0xff] }
 0x5eb   : > { %9217 = vmatprep.mubr.msk.bf16.mxu1 %vm450_vm2, %v6726_v38  ;;  %v6747_v23 = vrot.slane %v13495_v44, 3  ;;  %v7121_v38 = vrot.slane %v10230_v25, 7 }
 0x5ec   : > { %v6742_v0 = vsel %vm2902_vm7, %v6739_v60, %v6741_v19  ;;  %v6744_v56 = vsel %vm2902_vm7, %v6741_v19, %v6743_v55  ;;  %v7126_v60 = vsel %vm7111_vm9, %v7123_v17, %v7125_v2 }
 0x5ed   : > { %v6748_v39 = vsel %vm2902_vm7, %v6745_v12, %v6747_v23  ;;  %v6750_v3 = vsel %vm2902_vm7, %v6747_v23, %v6749_v47  ;;  %v7129_v47 = vrot.slane %v10234_v46, 7 }
 0x5f2   : > { %9218 = vmatmul.mubr.msk.bf16.vlgmr.msra.gmra.mrb[36].mxu1 %vm450_vm2, %v6728_v27 }
 0x5f3   : > { %9221 = vmatprep.mubr.msk.bf16.mxu1 %vm450_vm2, %v6730_v51 }
 0x5fa   : > { %9222 = vmatmul.mubr.msk.bf16.gmra.mrb[40].mxu1 %vm450_vm2, %v6732_v4  ;;  %v10233_v4 = vld [vmem:[%s10354_s8 + $0x88] sm:$0xff] }
 0x5fb   : > { %9225 = vmatprep.mubr.msk.bf16.mxu1 %vm450_vm2, %v6734_v24  ;;  %v7133_v24 = vrot.slane %v10233_v4, 7 }
 0x602   : > { %9226 = vmatmul.mubr.msk.bf16.gmra.mrb[44].mxu1 %vm450_vm2, %v6736_v13 }
 0x603   : > { %9229 = vmatprep.mubr.msk.bf16.mxu1 %vm450_vm2, %v6738_v14 }
 0x60a   : > { %9230 = vmatmul.mubr.msk.bf16.gmra.mrb[48].mxu1 %vm450_vm2, %v6740_v33  ;;  %v7122_v33 = vsel %vm7111_vm9, %v7119_v34, %v7121_v38  ;;  %v7149_v34 = vrot.slane %v10241_v49, 7 }
 0x60b   : > { %9233 = vmatprep.mubr.msk.bf16.mxu1 %vm450_vm2, %v6742_v0  ;;  %v7124_v0 = vsel %vm7111_vm9, %v7121_v38, %v7123_v17 }
 0x612   : > { %9234 = vmatmul.mubr.msk.bf16.gmra.mrb[52].mxu1 %vm450_vm2, %v6744_v56  ;;  %v7128_v56 = vsel %vm7111_vm9, %v7125_v2, %v7127_v29 }
 0x613   : > { %9237 = vmatprep.mubr.msk.bf16.mxu1 %vm450_vm2, %v6746_v57  ;;  %v7134_v57 = vsel %vm7111_vm9, %v7131_v16, %v7133_v24 }
 0x61a   : > { %9238 = vmatmul.mubr.msk.bf16.gmra.mrb[56].mxu1 %vm450_vm2, %v6748_v39  ;;  %v10235_v39 = vld [vmem:[%s10354_s8 + $0x90] sm:$0xff] }
 0x61b   : > { %9241 = vmatprep.mubr.msk.bf16.mxu1 %vm450_vm2, %v6750_v3  ;;  %v7135_v3 = vrot.slane %v10235_v39, 7 }
 0x61d   : > { %v12743_v31 = vsel %vm7111_vm9, %v7135_v3, %v7137_v32 }
 0x622   : > { %9242 = vmatmul.mubr.msk.bf16.gmra.mrb[60].mxu1 %vm450_vm2, %v6752_v10  ;;  %v7139_v10 = vrot.slane %v10236_v61, 7 }
 0x623   : > { %9245 = vmatprep.mubr.msk.bf16.mxu1 %vm450_vm2, %v6754_v5  ;;  %v10237_v5 = vld [vmem:[%s10354_s8 + $0xa8] sm:$0xff] }
 0x624   : > { %v7141_v52 = vrot.slane %v10237_v5, 7  ;;  %v12746_v17 = vsel %vm7111_vm9, %v7137_v32, %v7139_v10 }
 0x62a   : > { %9246 = vmatmul.mubr.msk.bf16.gmra.mrb[64].mxu1 %vm450_vm2, %v6756_v54 }
 0x62b   : > { %9249 = vmatprep.mubr.msk.bf16.mxu1 %vm450_vm2, %v13499_v58 }
 0x632   : > { %9250 = vmatmul.mubr.msk.bf16.gmra.mrb[68].mxu1 %vm450_vm2, %v13500_v53 }
 0x6c5   : > { %v9219_v21 = vpop.f32.mrb[36].mxu1 }
 0x6c6   : > { %v7040_v9 = vadd.f32 %v9219_v21, %v12679_v26  ;;  %v6852_v50 = vpop.f32.mrb[37].mxu1 }
 0x6c7   : > { %v7038_v28 = vadd.f32 %v12679_v26, %v6852_v50  ;;  %v9220_v1 = vpop.f32.mrb[38].mxu1  ;;  %v7132_v50 = vsel %vm7111_vm9, %v7129_v47, %v7131_v16  ;;  %v7151_v16 = vrot.slane %v12758_v8, 7 }
 0x6c8   : > { %v12690_v18 = vadd.f32 %v7118_v11, %v7040_v9  ;;  %v7041_v30 = vadd.f32 %v9220_v1, %v12679_v26  ;;  %v6855_v6 = vpop.f32.mrb[39].mxu1  ;;  %v7130_v9 = vsel %vm7111_vm9, %v7127_v29, %v7129_v47  ;;  %v12739_v1 = vsel %vm7111_vm9, %v7139_v10, %v7141_v52  ;;  %v10242_v29 = vld [vmem:[%s10354_s8 + $0xb8] sm:$0xff] }
 0x6c9   : > { %v12695_v27 = vadd.f32 %v7114_v41, %v7038_v28  ;;  %v7039_v51 = vadd.f32 %v12679_v26, %v6855_v6  ;;  %v7136_v28 = vsel %vm7111_vm9, %v7133_v24, %v7135_v3  ;;  %v12753_v6 = vsel %vm7111_vm9, %v7147_v15, %v7149_v34 }
 0x6ca   : > { %v8083_v40 = vmul.f32 -1.442695, %v12690_v18  ;;  %v12701_v35 = vadd.f32 %v7120_v62, %v7041_v30  ;;  %v12750_v30 = vsel %vm7111_vm9, %v7141_v52, %v7143_v37 }
 0x6cb   : > { %v8081_v13 = vmul.f32 -1.442695, %v12695_v27  ;;  %v12704_v14 = vadd.f32 %v7116_v42, %v7039_v51  ;;  %v7145_v51 = vrot.slane %v10242_v29, 7 }
 0x6cc   : > { %10079 = vpow2.f32 %v8083_v40  ;;  %v8084_v19 = vmul.f32 -1.442695, %v12701_v35 }
 0x6cd   : > { %10081 = vpow2.f32 %v8081_v13  ;;  %v8082_v55 = vmul.f32 -1.442695, %v12704_v14  ;;  %v9223_v12 = vpop.f32.mrb[40].mxu1  ;;  %v12783_v5 = vsel %vm7111_vm9, %v7143_v37, %v7145_v51  ;;  %v10246_v37 = vld [vmem:[%s10354_s8 + $0xd8] sm:$0xff] }
 0x6ce   : > { %10083 = vpow2.f32 %v8084_v19  ;;  %v7044_v44 = vadd.f32 %v9223_v12, %v12679_v26  ;;  %v6868_v23 = vpop.f32.mrb[41].mxu1 }
 0x6cf   : > { %10085 = vpow2.f32 %v8082_v55  ;;  %v7042_v7 = vadd.f32 %v12679_v26, %v6868_v23  ;;  %v9224_v63 = vpop.f32.mrb[42].mxu1 }
 0x6d0   : > { %v12719_v54 = vadd.f32 %v7126_v60, %v7044_v44  ;;  %v7045_v58 = vadd.f32 %v9224_v63, %v12679_v26  ;;  %v6871_v53 = vpop.f32.mrb[43].mxu1  ;;  %v12763_v60 = vld [vmem:[%s10354_s8 + $0xe0] sm:$0xff]  ;;  %v12770_v44 = vld [vmem:[%s10354_s8 + $0xe8] sm:$0xff] }
 0x6d1   : > { %v12724_v45 = vadd.f32 %v7122_v33, %v7042_v7  ;;  %v7043_v48 = vadd.f32 %v12679_v26, %v6871_v53  ;;  %v7155_v19 = vrot.slane %v12763_v60, 7  ;;  %v7157_v23 = vrot.slane %v12770_v44, 7 }
 0x6d2   : > { %v8087_v21 = vmul.f32 -1.442695, %v12719_v54  ;;  %v12730_v11 = vadd.f32 %v7128_v56, %v7045_v58  ;;  %v12789_v58 = vsel %vm7111_vm9, %v7149_v34, %v7151_v16  ;;  %v12792_v53 = vsel %vm7111_vm9, %v7145_v51, %v7147_v15  ;;  %v12805_v34 = vld [vmem:[%s10354_s8 + $0xf0] sm:$0xff] }
 0x6d3   : > { %v8085_v41 = vmul.f32 -1.442695, %v12724_v45  ;;  %v12735_v42 = vadd.f32 %v7124_v0, %v7043_v48  ;;  %v12800_v20 = vsel %vm7111_vm9, %v7155_v19, %v7157_v23  ;;  %v7153_v48 = vrot.slane %v10246_v37, 7  ;;  %v12876_v37 = vld [vmem:[%s10354_s8 + $0xf8] sm:$0xff] }
 0x6d4   : > { %10087 = vpow2.f32 %v8087_v21  ;;  %v8088_v62 = vmul.f32 -1.442695, %v12730_v11  ;;  %v7159_v21 = vrot.slane %v12805_v34, 7 }
 0x6d5   : > { %10089 = vpow2.f32 %v8085_v41  ;;  %v8086_v59 = vmul.f32 -1.442695, %v12735_v42  ;;  %v9227_v2 = vpop.f32.mrb[44].mxu1 }
 0x6d6   : > { %v10080_v25 = vpop.eup %10079  ;;  %10091 = vpow2.f32 %v8088_v62  ;;  %v7048_v38 = vadd.f32 %v9227_v2, %v12679_v26  ;;  %v6884_v43 = vpop.f32.mrb[45].mxu1  ;;  %v12815_v2 = vld [vmem:[%s10354_s8 + $0x108] sm:$0xff] }
 0x6d7   : > { %v10082_v4 = vpop.eup %10081  ;;  %v7367_v24 = vadd.f32 1.0, %v10080_v25  ;;  %10093 = vpow2.f32 %v8086_v59  ;;  %v7046_v40 = vadd.f32 %v12679_v26, %v6884_v43  ;;  %v9228_v13 = vpop.f32.mrb[46].mxu1  ;;  %v7165_v25 = vrot.slane %v12815_v2, 7 }
 0x6d8   : > { %v10084_v33 = vpop.eup %10083  ;;  %v7365_v0 = vadd.f32 1.0, %v10082_v4  ;;  %v12766_v55 = vadd.f32 %v7134_v57, %v7048_v38  ;;  %v7049_v12 = vadd.f32 %v9228_v13, %v12679_v26  ;;  %v6887_v56 = vpop.f32.mrb[47].mxu1 }
 0x6d9   : > { %v10086_v46 = vpop.eup %10085  ;;  %10095 = vrcp.f32 %v7367_v24  ;;  %v7368_v47 = vadd.f32 1.0, %v10084_v33  ;;  %v12773_v39 = vadd.f32 %v7130_v9, %v7046_v40  ;;  %v7047_v3 = vadd.f32 %v12679_v26, %v6887_v56  ;;  %v12809_v9 = vld [vmem:[%s10354_s8 + $0x100] sm:$0xff] }
 0x6da   : > { %10097 = vrcp.f32 %v7365_v0  ;;  %v7366_v7 = vadd.f32 1.0, %v10086_v46  ;;  %v8091_v57 = vmul.f32 -1.442695, %v12766_v55  ;;  %v12777_v63 = vadd.f32 %v7136_v28, %v7049_v12 }
 0x6db   : > { %10099 = vrcp.f32 %v7368_v47  ;;  %v8089_v61 = vmul.f32 -1.442695, %v12773_v39  ;;  %v12780_v10 = vadd.f32 %v7132_v50, %v7047_v3  ;;  %v7163_v50 = vrot.slane %v12809_v9, 7 }
 0x6dc   : > { %10101 = vrcp.f32 %v7366_v7  ;;  %v8092_v52 = vmul.f32 -1.442695, %v12777_v63  ;;  %v12842_v47 = vsel %vm7111_vm9, %v7151_v16, %v7153_v48 }
 0x6dd   : > { %10103 = vpow2.f32 %v8091_v57  ;;  %v8090_v36 = vmul.f32 -1.442695, %v12780_v10  ;;  %v9231_v32 = vpop.f32.mrb[48].mxu1  ;;  %v12849_v57 = vsel %vm7111_vm9, %v7153_v48, %v7155_v19  ;;  %v7161_v48 = vrot.slane %v12876_v37, 7 }
 0x6de   : > { %v10088_v22 = vpop.eup %10087  ;;  %10105 = vpow2.f32 %v8089_v61  ;;  %v7052_v15 = vadd.f32 %v9231_v32, %v12679_v26  ;;  %v6900_v49 = vpop.f32.mrb[49].mxu1 }
 0x6df   : > { %v10090_v41 = vpop.eup %10089  ;;  %v7371_v28 = vadd.f32 1.0, %v10088_v22  ;;  %10107 = vpow2.f32 %v8092_v52  ;;  %v7050_v62 = vadd.f32 %v12679_v26, %v6900_v49  ;;  %v9232_v59 = vpop.f32.mrb[50].mxu1 }
 0x6e0   : > { %v10092_v38 = vpop.eup %10091  ;;  %v7369_v43 = vadd.f32 1.0, %v10090_v41  ;;  %10109 = vpow2.f32 %v8090_v36  ;;  %v12819_v29 = vadd.f32 %v12739_v1, %v7052_v15  ;;  %v7053_v51 = vadd.f32 %v9232_v59, %v12679_v26  ;;  %v6903_v4 = vpop.f32.mrb[51].mxu1 }
 0x6e1   : > { %v10094_v24 = vpop.eup %10093  ;;  %10111 = vrcp.f32 %v7371_v28  ;;  %v7372_v40 = vadd.f32 1.0, %v10092_v38  ;;  %v12823_v13 = vadd.f32 %v12743_v31, %v7050_v62  ;;  %v7051_v33 = vadd.f32 %v12679_v26, %v6903_v4 }
 0x6e2   : > { %10113 = vrcp.f32 %v7369_v43  ;;  %v7370_v0 = vadd.f32 1.0, %v10094_v24  ;;  %v8095_v12 = vmul.f32 -1.442695, %v12819_v29  ;;  %v12828_v56 = vadd.f32 %v12750_v30, %v7053_v51  ;;  %v12892_v43 = vld [vmem:[%s10354_s8 + $0x110] sm:$0xff] }
 0x6e3   : > { %v10096_v1 = vpop.eup %10095  ;;  %10115 = vrcp.f32 %v7372_v40  ;;  %v8093_v31 = vmul.f32 -1.442695, %v12823_v13  ;;  %v12837_v46 = vadd.f32 %v12746_v17, %v7051_v33  ;;  %v12869_v36 = vsel %vm7111_vm9, %v7163_v50, %v7165_v25 }
 0x6e4   : > { %v10098_v30 = vpop.eup %10097  ;;  %v7475_v3 = vmul.f32 %v10096_v1, %v12690_v18  ;;  %10117 = vrcp.f32 %v7370_v0  ;;  %v8096_v7 = vmul.f32 -1.442695, %v12828_v56  ;;  %v12858_v18 = vsel %vm7111_vm9, %v7157_v23, %v7159_v21 }
 0x6e5   : > { %v10100_v61 = vpop.eup %10099  ;;  %v7473_v17 = vmul.f32 %v10098_v30, %v12695_v27  ;;  %10119 = vpow2.f32 %v8095_v12  ;;  %v8094_v8 = vmul.f32 -1.442695, %v12837_v46  ;;  %v9235_v16 = vpop.f32.mrb[52].mxu1  ;;  %v7167_v51 = vrot.slane %v12892_v43, 7 }
 0x6e6   : > { %v10102_v60 = vpop.eup %10101  ;;  %7511 = vst.msk [vmem:[%s12833_s17 + $0x10] sm:$0xff] %vm450_vm2, %v7475_v3  ;;  %v7476_v19 = vmul.f32 %v10100_v61, %v12701_v35  ;;  %10121 = vpow2.f32 %v8093_v31  ;;  %v7056_v27 = vadd.f32 %v9235_v16, %v12679_v26  ;;  %v6916_v52 = vpop.f32.mrb[53].mxu1 }
 0x6e7   : > { %v10104_v44 = vpop.eup %10103  ;;  %7509 = vst.msk [vmem:[%s12833_s17] sm:$0xff] %vm450_vm2, %v7473_v17  ;;  %v7474_v23 = vmul.f32 %v10102_v60, %v12704_v14  ;;  %10123 = vpow2.f32 %v8096_v7  ;;  %v7054_v35 = vadd.f32 %v12679_v26, %v6916_v52  ;;  %v9236_v32 = vpop.f32.mrb[54].mxu1 }
 0x6e8   : > { %v10106_v22 = vpop.eup %10105  ;;  %7512 = vst.msk [vmem:[%s12833_s17 + $0x18] sm:$0xff] %vm450_vm2, %v7476_v19  ;;  %v7375_v15 = vadd.f32 1.0, %v10104_v44  ;;  %10125 = vpow2.f32 %v8094_v8  ;;  %v12882_v49 = vadd.f32 %v12753_v6, %v7056_v27  ;;  %v7057_v41 = vadd.f32 %v9236_v32, %v12679_v26  ;;  %v6919_v14 = vpop.f32.mrb[55].mxu1 }
 0x6e9   : > { %v10108_v28 = vpop.eup %10107  ;;  %7510 = vst.msk [vmem:[%s12833_s17 + $0x8] sm:$0xff] %vm450_vm2, %v7474_v23  ;;  %v7373_v62 = vadd.f32 1.0, %v10106_v22  ;;  %v12888_v59 = vadd.f32 %v12783_v5, %v7054_v35  ;;  %v7055_v38 = vadd.f32 %v12679_v26, %v6919_v14  ;;  %v12931_v23 = vld [vmem:[%s10354_s8 + $0x118] sm:$0xff] }
 0x6ea   : > { %v10110_v4 = vpop.eup %10109  ;;  %10127 = vrcp.f32 %v7375_v15  ;;  %v7376_v6 = vadd.f32 1.0, %v10108_v28  ;;  %v8099_v24 = vmul.f32 -1.442695, %v12882_v49  ;;  %v12897_v40 = vadd.f32 %v12789_v58, %v7057_v41 }
 0x6eb   : > { %v10112_v33 = vpop.eup %10111  ;;  %10129 = vrcp.f32 %v7373_v62  ;;  %v7374_v0 = vadd.f32 1.0, %v10110_v4  ;;  %v8097_v5 = vmul.f32 -1.442695, %v12888_v59  ;;  %v12901_v12 = vadd.f32 %v12792_v53, %v7055_v38 }
 0x6ec   : > { %v10114_v1 = vpop.eup %10113  ;;  %v7479_v31 = vmul.f32 %v10112_v33, %v12719_v54  ;;  %10131 = vrcp.f32 %v7376_v6  ;;  %v8100_v30 = vmul.f32 -1.442695, %v12897_v40  ;;  %v12910_v58 = vsel %vm7111_vm9, %v7159_v21, %v7161_v48  ;;  %v12915_v54 = vld [vmem:[%s10354_s8 + $0x120] sm:$0xff] }
 0x6ed   : > { %v10116_v3 = vpop.eup %10115  ;;  %v7477_v7 = vmul.f32 %v10114_v1, %v12724_v45  ;;  %10133 = vrcp.f32 %v7374_v0  ;;  %v8098_v53 = vmul.f32 -1.442695, %v12901_v12  ;;  %v9239_v61 = vpop.f32.mrb[56].mxu1  ;;  %v7171_v17 = vrot.slane %v12915_v54, 7  ;;  %v12923_v45 = vld [vmem:[%s10354_s8 + $0x128] sm:$0xff] }
 0x6ee   : > { %v10118_v8 = vpop.eup %10117  ;;  %7515 = vst.msk [vmem:[%s12833_s17 + $0x30] sm:$0xff] %vm450_vm2, %v7479_v31  ;;  %v7480_v34 = vmul.f32 %v10116_v3, %v12730_v11  ;;  %10135 = vpow2.f32 %v8099_v24  ;;  %v7060_v21 = vadd.f32 %v9239_v61, %v12679_v26  ;;  %v6932_v16 = vpop.f32.mrb[57].mxu1  ;;  %v7173_v60 = vrot.slane %v12923_v45, 7 }
 0x6ef   : > { %v10120_v19 = vpop.eup %10119  ;;  %7513 = vst.msk [vmem:[%s12833_s17 + $0x20] sm:$0xff] %vm450_vm2, %v7477_v7  ;;  %v7478_v27 = vmul.f32 %v10118_v8, %v12735_v42  ;;  %10137 = vpow2.f32 %v8097_v5  ;;  %v7058_v52 = vadd.f32 %v12679_v26, %v6932_v16  ;;  %v9240_v44 = vpop.f32.mrb[58].mxu1  ;;  %v7169_v11 = vrot.slane %v12931_v23, 7 }
 0x6f0   : > { %v10122_v35 = vpop.eup %10121  ;;  %7516 = vst.msk [vmem:[%s12833_s17 + $0x38] sm:$0xff] %vm450_vm2, %v7480_v34  ;;  %v7379_v32 = vadd.f32 1.0, %v10120_v19  ;;  %10139 = vpow2.f32 %v8100_v30  ;;  %v12937_v22 = vadd.f32 %v12800_v20, %v7060_v21  ;;  %v7061_v15 = vadd.f32 %v9240_v44, %v12679_v26  ;;  %v6935_v41 = vpop.f32.mrb[59].mxu1 }
 0x6f1   : > { %v10124_v42 = vpop.eup %10123  ;;  %7514 = vst.msk [vmem:[%s12833_s17 + $0x28] sm:$0xff] %vm450_vm2, %v7478_v27  ;;  %v7377_v14 = vadd.f32 1.0, %v10122_v35  ;;  %10141 = vpow2.f32 %v8098_v53  ;;  %v12943_v28 = vadd.f32 %v12842_v47, %v7058_v52  ;;  %v7059_v62 = vadd.f32 %v12679_v26, %v6935_v41 }
 0x6f2   : > { %v10126_v38 = vpop.eup %10125  ;;  %10143 = vrcp.f32 %v7379_v32  ;;  %v7380_v4 = vadd.f32 1.0, %v10124_v42  ;;  %v8103_v6 = vmul.f32 -1.442695, %v12937_v22  ;;  %v12948_v20 = vadd.f32 %v12858_v18, %v7061_v15 }
 0x6f3   : > { %10145 = vrcp.f32 %v7377_v14  ;;  %v7378_v24 = vadd.f32 1.0, %v10126_v38  ;;  %v8101_v33 = vmul.f32 -1.442695, %v12943_v28  ;;  %v12952_v0 = vadd.f32 %v12849_v57, %v7059_v62 }
 0x6f4   : > { %v10128_v5 = vpop.eup %10127  ;;  %10147 = vrcp.f32 %v7380_v4  ;;  %v8104_v47 = vmul.f32 -1.442695, %v12948_v20  ;;  %v7168_v1 = vsel %vm7111_vm9, %v7165_v25, %v7167_v51  ;;  %v7164_v18 = vsel %vm7111_vm9, %v7161_v48, %v7163_v50  ;;  %v13026_v4 = vld [vmem:[%s10354_s8 + $0x148] sm:$0xff] }
 0x6f5   : > { %v10130_v57 = vpop.eup %10129  ;;  %v7483_v31 = vmul.f32 %v10128_v5, %v12766_v55  ;;  %10149 = vrcp.f32 %v7378_v24  ;;  %v8102_v30 = vmul.f32 -1.442695, %v12952_v0  ;;  %v9243_v3 = vpop.f32.mrb[60].mxu1  ;;  %v12972_v2 = vsel %vm7111_vm9, %v7171_v17, %v7173_v60  ;;  %v12977_v55 = vld [vmem:[%s10354_s8 + $0x130] sm:$0xff] }
 0x6f6   : > { %v10132_v9 = vpop.eup %10131  ;;  %v7481_v25 = vmul.f32 %v10130_v57, %v12773_v39  ;;  %10151 = vpow2.f32 %v8103_v6  ;;  %v7064_v50 = vadd.f32 %v9243_v3, %v12679_v26  ;;  %v6948_v37 = vpop.f32.mrb[61].mxu1  ;;  %v7175_v48 = vrot.slane %v12977_v55, 7 }
 0x6f7   : > { %v10134_v7 = vpop.eup %10133  ;;  %7519 = vst.msk [vmem:[%s12833_s17 + $0x50] sm:$0xff] %vm450_vm2, %v7483_v31  ;;  %v7484_v53 = vmul.f32 %v10132_v9, %v12777_v63  ;;  %10153 = vpow2.f32 %v8101_v33  ;;  %v7062_v61 = vadd.f32 %v12679_v26, %v6948_v37  ;;  %v9244_v8 = vpop.f32.mrb[62].mxu1  ;;  %v12989_v39 = vsel %vm7111_vm9, %v7167_v51, %v7169_v11 }
 0x6f8   : > { %v10136_v34 = vpop.eup %10135  ;;  %7517 = vst.msk [vmem:[%s12833_s17 + $0x40] sm:$0xff] %vm450_vm2, %v7481_v25  ;;  %v7482_v21 = vmul.f32 %v10134_v7, %v12780_v10  ;;  %10155 = vpow2.f32 %v8104_v47  ;;  %v12995_v63 = vadd.f32 %v12869_v36, %v7064_v50  ;;  %v7065_v16 = vadd.f32 %v9244_v8, %v12679_v26  ;;  %v6951_v19 = vpop.f32.mrb[63].mxu1 }
 0x6f9   : > { %v10138_v27 = vpop.eup %10137  ;;  %7520 = vst.msk [vmem:[%s12833_s17 + $0x58] sm:$0xff] %vm450_vm2, %v7484_v53  ;;  %v7383_v43 = vadd.f32 1.0, %v10136_v34  ;;  %10157 = vpow2.f32 %v8102_v30  ;;  %v13001_v51 = vadd.f32 %v12910_v58, %v7062_v61  ;;  %v7063_v52 = vadd.f32 %v12679_v26, %v6951_v19  ;;  %v10258_v30 = vld [vmem:[%s10354_s8 + $0x138] sm:$0xff]  ;;  %v10259_v34 = vld [vmem:[%s10354_s8 + $0x150] sm:$0xff] }
 0x6fa   : > { %v10140_v44 = vpop.eup %10139  ;;  %7518 = vst.msk [vmem:[%s12833_s17 + $0x48] sm:$0xff] %vm450_vm2, %v7482_v21  ;;  %v7381_v10 = vadd.f32 1.0, %v10138_v27  ;;  %v13006_v36 = vadd.f32 %v7168_v1, %v7065_v16  ;;  %v7176_v35 = vsel %vm7111_vm9, %v7173_v60, %v7175_v48  ;;  %v7172_v58 = vsel %vm7111_vm9, %v7169_v11, %v7171_v17  ;;  %v10256_v60 = vld [vmem:[%s10354_s8 + $0x140] sm:$0xff] }
 0x6fb   : > { %v10142_v32 = vpop.eup %10141  ;;  %10159 = vrcp.f32 %v7383_v43  ;;  %v7384_v15 = vadd.f32 1.0, %v10140_v44  ;;  %v8107_v41 = vmul.f32 -1.442695, %v12995_v63  ;;  %v13019_v42 = vadd.f32 %v7164_v18, %v7063_v52 }
 0x6fc   : > { %v10144_v14 = vpop.eup %10143  ;;  %10161 = vrcp.f32 %v7381_v10  ;;  %v7382_v62 = vadd.f32 1.0, %v10142_v32  ;;  %v8105_v45 = vmul.f32 -1.442695, %v13001_v51  ;;  %v7179_v54 = vrot.slane %v10256_v60, 7 }
 0x6fd   : > { %v10146_v38 = vpop.eup %10145  ;;  %v7487_v23 = vmul.f32 %v10144_v14, %v12819_v29  ;;  %10163 = vrcp.f32 %v7384_v15  ;;  %v8108_v17 = vmul.f32 -1.442695, %v13006_v36  ;;  %v9247_v11 = vpop.f32.mrb[64].mxu1  ;;  %v7181_v6 = vrot.slane %v13026_v4, 7 }
 0x6fe   : > { %v10148_v24 = vpop.eup %10147  ;;  %v7485_v33 = vmul.f32 %v10146_v38, %v12823_v13  ;;  %10165 = vrcp.f32 %v7382_v62  ;;  %v8106_v5 = vmul.f32 -1.442695, %v13019_v42  ;;  %v7068_v47 = vadd.f32 %v9247_v11, %v12679_v26  ;;  %v6964_v1 = vpop.f32.mrb[65].mxu1 }
 0x6ff   : > { %v10150_v29 = vpop.eup %10149  ;;  %7523 = vst.msk [vmem:[%s12833_s17 + $0x70] sm:$0xff] %vm450_vm2, %v7487_v23  ;;  %v7488_v18 = vmul.f32 %v10148_v24, %v12828_v56  ;;  %10167 = vpow2.f32 %v8107_v41  ;;  %v7066_v57 = vadd.f32 %v12679_v26, %v6964_v1  ;;  %v9248_v31 = vpop.f32.mrb[66].mxu1  ;;  %v7177_v3 = vrot.slane %v10258_v30, 7 }
 0x700   : > { %v10152_v13 = vpop.eup %10151  ;;  %7521 = vst.msk [vmem:[%s12833_s17 + $0x60] sm:$0xff] %vm450_vm2, %v7485_v33  ;;  %v7486_v9 = vmul.f32 %v10150_v29, %v12837_v46  ;;  %10169 = vpow2.f32 %v8105_v45  ;;  %v13041_v25 = vadd.f32 %v12972_v2, %v7068_v47  ;;  %v7069_v50 = vadd.f32 %v9248_v31, %v12679_v26  ;;  %v6967_v56 = vpop.f32.mrb[67].mxu1 }
 0x701   : > { %v10154_v37 = vpop.eup %10153  ;;  %7524 = vst.msk [vmem:[%s12833_s17 + $0x78] sm:$0xff] %vm450_vm2, %v7488_v18  ;;  %v7387_v7 = vadd.f32 1.0, %v10152_v13  ;;  %10171 = vpow2.f32 %v8108_v17  ;;  %v13047_v53 = vadd.f32 %v12989_v39, %v7066_v57  ;;  %v7067_v61 = vadd.f32 %v12679_v26, %v6967_v56 }
 0x702   : > { %v10156_v8 = vpop.eup %10155  ;;  %7522 = vst.msk [vmem:[%s12833_s17 + $0x68] sm:$0xff] %vm450_vm2, %v7486_v9  ;;  %v7385_v46 = vadd.f32 1.0, %v10154_v37  ;;  %10173 = vpow2.f32 %v8106_v5  ;;  %v13052_v2 = vadd.f32 %v7176_v35, %v7069_v50  ;;  %v7183_v21 = vrot.slane %v10259_v34, 7 }
 0x703   : > { %v10158_v16 = vpop.eup %10157  ;;  %10175 = vrcp.f32 %v7387_v7  ;;  %v7388_v19 = vadd.f32 1.0, %v10156_v8  ;;  %v8111_v27 = vmul.f32 -1.442695, %v13041_v25  ;;  %v13056_v43 = vadd.f32 %v7172_v58, %v7067_v61 }
 0x704   : > { %10177 = vrcp.f32 %v7385_v46  ;;  %v7386_v39 = vadd.f32 1.0, %v10158_v16  ;;  %v8109_v52 = vmul.f32 -1.442695, %v13047_v53  ;;  %v7182_v44 = vsel %vm7111_vm9, %v7179_v54, %v7181_v6 }
 0x705   : > { %v10160_v10 = vpop.eup %10159  ;;  %10179 = vrcp.f32 %v7388_v19  ;;  %v8112_v35 = vmul.f32 -1.442695, %v13052_v2  ;;  %v9251_v32 = vpop.f32.mrb[68].mxu1  ;;  %v7178_v15 = vsel %vm7111_vm9, %v7175_v48, %v7177_v3  ;;  %v7180_v41 = vsel %vm7111_vm9, %v7177_v3, %v7179_v54 }
 0x706   : > { %v10162_v58 = vpop.eup %10161  ;;  %v7491_v14 = vmul.f32 %v10160_v10, %v12882_v49  ;;  %10181 = vrcp.f32 %v7386_v39  ;;  %v8110_v62 = vmul.f32 -1.442695, %v13056_v43  ;;  %v7072_v45 = vadd.f32 %v9251_v32, %v12679_v26  ;;  %v6980_v60 = vpop.f32.mrb[69].mxu1 }
 0x707   : > { %v10164_v38 = vpop.eup %10163  ;;  %v7489_v23 = vmul.f32 %v10162_v58, %v12888_v59  ;;  %10183 = vpow2.f32 %v8111_v27  ;;  %v7070_v55 = vadd.f32 %v12679_v26, %v6980_v60  ;;  %v9252_v17 = vpop.f32.mrb[70].mxu1  ;;  %v7184_v48 = vsel %vm7111_vm9, %v7181_v6, %v7183_v21 }
 0x708   : > { %v10166_v54 = vpop.eup %10165  ;;  %7527 = vst.msk [vmem:[%s12833_s17 + $0x90] sm:$0xff] %vm450_vm2, %v7491_v14  ;;  %v7492_v49 = vmul.f32 %v10164_v38, %v12897_v40  ;;  %10185 = vpow2.f32 %v8109_v52  ;;  %v13074_v11 = vadd.f32 %v7182_v44, %v7072_v45  ;;  %v7073_v4 = vadd.f32 %v9252_v17, %v12679_v26  ;;  %v6983_v24 = vpop.f32.mrb[71].mxu1 }
 0x709   : > { %v10168_v59 = vpop.eup %10167  ;;  %7525 = vst.msk [vmem:[%s12833_s17 + $0x80] sm:$0xff] %vm450_vm2, %v7489_v23  ;;  %v7490_v33 = vmul.f32 %v10166_v54, %v12901_v12  ;;  %10187 = vpow2.f32 %v8112_v35  ;;  %v13080_v5 = vadd.f32 %v7178_v15, %v7070_v55  ;;  %v7071_v6 = vadd.f32 %v12679_v26, %v6983_v24 }
 0x70a   : > { %v10170_v47 = vpop.eup %10169  ;;  %7528 = vst.msk [vmem:[%s12833_s17 + $0x98] sm:$0xff] %vm450_vm2, %v7492_v49  ;;  %v7391_v40 = vadd.f32 1.0, %v10168_v59  ;;  %10189 = vpow2.f32 %v8110_v62  ;;  %v13085_v1 = vadd.f32 %v7184_v48, %v7073_v4  ;;  %v8115_v30 = vmul.f32 -1.442695, %v13074_v11 }
 0x70b   : > { %v10172_v29 = vpop.eup %10171  ;;  %7526 = vst.msk [vmem:[%s12833_s17 + $0x88] sm:$0xff] %vm450_vm2, %v7490_v33  ;;  %v7389_v18 = vadd.f32 1.0, %v10170_v47  ;;  %v13089_v57 = vadd.f32 %v7180_v41, %v7071_v6  ;;  %v8113_v13 = vmul.f32 -1.442695, %v13080_v5 }
 0x70c   : > { %v10174_v31 = vpop.eup %10173  ;;  %10191 = vrcp.f32 %v7391_v40  ;;  %v7392_v12 = vadd.f32 1.0, %v10172_v29  ;;  %v8116_v56 = vmul.f32 -1.442695, %v13085_v1 }
 0x70d   : > { %v10176_v26 = vpop.eup %10175  ;;  %10193 = vrcp.f32 %v7389_v18  ;;  %v7390_v3 = vadd.f32 1.0, %v10174_v31  ;;  %v8114_v61 = vmul.f32 -1.442695, %v13089_v57 }
 0x70e   : > { %v10178_v9 = vpop.eup %10177  ;;  %v7495_v50 = vmul.f32 %v10176_v26, %v12937_v22  ;;  %10195 = vrcp.f32 %v7392_v12 }
 0x70f   : > { %v10180_v37 = vpop.eup %10179  ;;  %v7493_v7 = vmul.f32 %v10178_v9, %v12943_v28  ;;  %10197 = vrcp.f32 %v7390_v3 }
 0x710   : > { %v10182_v8 = vpop.eup %10181  ;;  %7531 = vst.msk [vmem:[%s12833_s17 + $0xb0] sm:$0xff] %vm450_vm2, %v7495_v50  ;;  %v7496_v46 = vmul.f32 %v10180_v37, %v12948_v20  ;;  %10199 = vpow2.f32 %v8115_v30 }
 0x711   : > { %v10184_v34 = vpop.eup %10183  ;;  %7529 = vst.msk [vmem:[%s12833_s17 + $0xa0] sm:$0xff] %vm450_vm2, %v7493_v7  ;;  %v7494_v22 = vmul.f32 %v10182_v8, %v12952_v0  ;;  %10201 = vpow2.f32 %v8113_v13 }
 0x712   : > { %v10186_v21 = vpop.eup %10185  ;;  %7532 = vst.msk [vmem:[%s12833_s17 + $0xb8] sm:$0xff] %vm450_vm2, %v7496_v46  ;;  %v7395_v28 = vadd.f32 1.0, %v10184_v34  ;;  %10203 = vpow2.f32 %v8116_v56 }
 0x713   : > { %v10188_v16 = vpop.eup %10187  ;;  %7530 = vst.msk [vmem:[%s12833_s17 + $0xa8] sm:$0xff] %vm450_vm2, %v7494_v22  ;;  %v7393_v19 = vadd.f32 1.0, %v10186_v21  ;;  %10205 = vpow2.f32 %v8114_v61 }
 0x714   : > { %v10190_v27 = vpop.eup %10189  ;;  %10207 = vrcp.f32 %v7395_v28  ;;  %v7396_v20 = vadd.f32 1.0, %v10188_v16 }
 0x715   : > { %10209 = vrcp.f32 %v7393_v19  ;;  %v7394_v39 = vadd.f32 1.0, %v10190_v27 }
 0x716   : > { %v10192_v0 = vpop.eup %10191  ;;  %10211 = vrcp.f32 %v7396_v20 }
 0x717   : > { %v10194_v52 = vpop.eup %10193  ;;  %v7499_v44 = vmul.f32 %v10192_v0, %v12995_v63  ;;  %10213 = vrcp.f32 %v7394_v39 }
 0x718   : > { %v10196_v10 = vpop.eup %10195  ;;  %v7497_v35 = vmul.f32 %v10194_v52, %v13001_v51 }
 0x719   : > { %v10198_v32 = vpop.eup %10197  ;;  %7535 = vst.msk [vmem:[%s12833_s17 + $0xd0] sm:$0xff] %vm450_vm2, %v7499_v44  ;;  %v7500_v15 = vmul.f32 %v10196_v10, %v13006_v36 }
 0x71a   : > { %v10200_v41 = vpop.eup %10199  ;;  %7533 = vst.msk [vmem:[%s12833_s17 + $0xc0] sm:$0xff] %vm450_vm2, %v7497_v35  ;;  %v7498_v58 = vmul.f32 %v10198_v32, %v13019_v42 }
 0x71b   : > { %v10202_v14 = vpop.eup %10201  ;;  %7536 = vst.msk [vmem:[%s12833_s17 + $0xd8] sm:$0xff] %vm450_vm2, %v7500_v15  ;;  %v7399_v62 = vadd.f32 1.0, %v10200_v41 }
 0x71c   : > { %v10204_v45 = vpop.eup %10203  ;;  %7534 = vst.msk [vmem:[%s12833_s17 + $0xc8] sm:$0xff] %vm450_vm2, %v7498_v58  ;;  %v7397_v63 = vadd.f32 1.0, %v10202_v14 }
 0x71d   : > { %v10206_v51 = vpop.eup %10205  ;;  %10215 = vrcp.f32 %v7399_v62  ;;  %v7400_v60 = vadd.f32 1.0, %v10204_v45 }
 0x71e   : > { %v10208_v36 = vpop.eup %10207  ;;  %10217 = vrcp.f32 %v7397_v63  ;;  %v7398_v38 = vadd.f32 1.0, %v10206_v51 }
 0x71f   : > { %v10210_v23 = vpop.eup %10209  ;;  %v7503_v42 = vmul.f32 %v10208_v36, %v13041_v25  ;;  %10219 = vrcp.f32 %v7400_v60 }
 0x720   : > { %v10212_v55 = vpop.eup %10211  ;;  %v7501_v17 = vmul.f32 %v10210_v23, %v13047_v53  ;;  %10221 = vrcp.f32 %v7398_v38 }
 0x721   : > { %v10214_v48 = vpop.eup %10213  ;;  %7539 = vst.msk [vmem:[%s12833_s17 + $0xf0] sm:$0xff] %vm450_vm2, %v7503_v42  ;;  %v7504_v54 = vmul.f32 %v10212_v55, %v13052_v2 }
 0x722   : > { %7537 = vst.msk [vmem:[%s12833_s17 + $0xe0] sm:$0xff] %vm450_vm2, %v7501_v17  ;;  %v7502_v49 = vmul.f32 %v10214_v48, %v13056_v43 }
 0x723   : > { %7540 = vst.msk [vmem:[%s12833_s17 + $0xf8] sm:$0xff] %vm450_vm2, %v7504_v54 }
 0x724   : > { %7538 = vst.msk [vmem:[%s12833_s17 + $0xe8] sm:$0xff] %vm450_vm2, %v7502_v49 }
 0x727   : > { %v10216_v25 = vpop.eup %10215 }
 0x728   : > { %v10218_v4 = vpop.eup %10217  ;;  %v7507_v53 = vmul.f32 %v10216_v25, %v13074_v11 }
 0x729   : > { %v10220_v24 = vpop.eup %10219  ;;  %v7505_v59 = vmul.f32 %v10218_v4, %v13080_v5 }
 0x72a   : > { %v10222_v33 = vpop.eup %10221  ;;  %7543 = vst.msk [vmem:[%s12833_s17 + $0x110] sm:$0xff] %vm450_vm2, %v7507_v53  ;;  %v7508_v2 = vmul.f32 %v10220_v24, %v13085_v1 }
 0x72b   : > { %7541 = vst.msk [vmem:[%s12833_s17 + $0x100] sm:$0xff] %vm450_vm2, %v7505_v59  ;;  %v7506_v43 = vmul.f32 %v10222_v33, %v13089_v57 }
 0x72c   : > { %7544 = vst.msk [vmem:[%s12833_s17 + $0x118] sm:$0xff] %vm450_vm2, %v7508_v2 }
 0x72d   : > { %7542 = vst.msk [vmem:[%s12833_s17 + $0x108] sm:$0xff] %vm450_vm2, %v7506_v43 }
 0x72e PF: > { %s16_s23 = sadd.s32 1, %s10282_s23   ;;  %s13501_s21 = smov %s10278_s22 }
 0x72f   : > { %p13_p5 = scmp.ge.s32.totalorder %s16_s23, 4   ;;  %s13502_s22 = smov %s13504_s24 }
 0x731   :  { %15 = sbr.rel (!%p13_p5) target bundleno = 2 (0x2), region = 93 }

</bundles_post_ra>
